<compile_context>
chip_gen: v7x
topology: tpu7x:2x2x1
jax: 0.10.0
libtpu: 0.0.40
codegen_flags: <defaults>
</compile_context>

<pallas_src>
import functools
from math import sqrt

import jax
import jax.numpy as jnp
from jax.experimental import pallas as pl
from jax.experimental.pallas import tpu as pltpu

EPS = 1e-5
ROW_TILE = 256            # target M tile (rows of batch*seq)
COL_TILE = 256            # target N tile (output lanes)
K_TILE = 512              # target K tile (contraction)
VMEM_LIMIT = 48 * 1024 * 1024   # leave headroom under v7x's 64 MiB VMEM


def _tile(dim, target, align):
    """Largest tile <= target that divides `dim` and is a multiple of `align`;
    falls back to the full dim (which always satisfies the layout rule)."""
    if dim <= target:
        return dim
    t = (target // align) * align
    while t >= align:
        if dim % t == 0:
            return t
        t -= align
    return dim


# ------------------- fused LayerNorm + matmul (+bias/relu/residual) -------------------

def _linear_kernel(x_ref, w_ref, b_ref, *rest, has_ln, has_res, activation, eps):
    pos = 0
    if has_ln:
        g_ref, bt_ref = rest[0], rest[1]
        pos = 2
    if has_res:
        res_ref = rest[pos]
        pos += 1
    o_ref, acc_ref = rest[pos], rest[pos + 1]

    k_id = pl.program_id(2)

    @pl.when(k_id == 0)
    def _init():
        acc_ref[...] = jnp.zeros_like(acc_ref)

    x = x_ref[...]
    if has_ln:                     # LayerNorm fused on the input (full K block)
        xf = x.astype(jnp.float32)
        mean = jnp.mean(xf, axis=-1, keepdims=True)
        var = jnp.mean(jnp.square(xf - mean), axis=-1, keepdims=True)
        xf = (xf - mean) * jax.lax.rsqrt(var + eps)
        x = (xf * g_ref[...] + bt_ref[...]).astype(w_ref.dtype)
    else:
        x = x.astype(w_ref.dtype)
    # bf16 x bf16 on the MXU, f32 accumulation.
    acc_ref[...] += jnp.dot(x, w_ref[...], preferred_element_type=jnp.float32)

    @pl.when(k_id == pl.num_programs(2) - 1)
    def _fin():
        y = acc_ref[...] + b_ref[...].astype(jnp.float32)
        if activation == "relu":
            y = jnp.maximum(y, 0.0)
        if has_res:
            y = y + res_ref[...].astype(jnp.float32)
        o_ref[...] = y.astype(o_ref.dtype)


def ln_linear(x2d, w, b, *, gamma=None, beta=None, residual=None,
              activation=None, out_dtype=None, eps=EPS):
    """out = [residual +] act( LN_opt(x) @ w + b )."""
    M, K = x2d.shape
    Kw, N = w.shape
    assert K == Kw
    has_ln = gamma is not None
    has_res = residual is not None
    out_dtype = x2d.dtype if out_dtype is None else out_dtype

    tm = _tile(M, ROW_TILE, 8)
    tn = _tile(N, COL_TILE, 128)
    tk = K if has_ln else _tile(K, K_TILE, 128)   # LN needs the full feature axis

    in_specs = [pl.BlockSpec((tm, tk), lambda i, j, k: (i, k)),
                pl.BlockSpec((tk, tn), lambda i, j, k: (k, j)),
                pl.BlockSpec((1, tn), lambda i, j, k: (0, j))]
    args = [x2d, w, b.reshape(1, N).astype(jnp.float32)]
    if has_ln:
        in_specs += [pl.BlockSpec((1, tk), lambda i, j, k: (0, k)),
                     pl.BlockSpec((1, tk), lambda i, j, k: (0, k))]
        args += [gamma.reshape(1, K).astype(jnp.float32),
                 beta.reshape(1, K).astype(jnp.float32)]
    if has_res:
        in_specs += [pl.BlockSpec((tm, tn), lambda i, j, k: (i, j))]
        args += [residual]

    kernel = functools.partial(_linear_kernel, has_ln=has_ln, has_res=has_res,
                               activation=activation, eps=eps)
    return pl.pallas_call(
        kernel,
        out_shape=jax.ShapeDtypeStruct((M, N), out_dtype),
        grid=(M // tm, N // tn, K // tk),
        in_specs=in_specs,
        out_specs=pl.BlockSpec((tm, tn), lambda i, j, k: (i, j)),
        scratch_shapes=[pltpu.VMEM((tm, tn), jnp.float32)],
        compiler_params=pltpu.CompilerParams(
            dimension_semantics=("parallel", "parallel", "arbitrary"),
            vmem_limit_bytes=VMEM_LIMIT),
    )(*args)


# --------------------- flash-style GQA attention (online softmax) ---------------------

def _flash_gqa_kernel(q_ref, k_ref, v_ref, o_ref, m_ref, l_ref, acc_ref, *,
                      kv_heads, head_dim, scale, causal, tq, tkv):
    qi = pl.program_id(1)
    ki = pl.program_id(2)

    @pl.when(ki == 0)
    def _init():
        m_ref[...] = jnp.full_like(m_ref, -jnp.inf)
        l_ref[...] = jnp.zeros_like(l_ref)
        acc_ref[...] = jnp.zeros_like(acc_ref)

    def process():
        q = q_ref[0]          # (tq,  kv_heads*head_dim)  bf16, group-folded queries
        k = k_ref[0]          # (tkv, kv_heads*head_dim)
        v = v_ref[0]
        if causal:
            row = qi * tq + jax.lax.broadcasted_iota(jnp.int32, (tq, tkv), 0)
            col = ki * tkv + jax.lax.broadcasted_iota(jnp.int32, (tq, tkv), 1)
            mask = row >= col
        for h in range(kv_heads):                     # static unroll over kv heads
            lo, hi = h * head_dim, (h + 1) * head_dim
            qh, kh, vh = q[:, lo:hi], k[:, lo:hi], v[:, lo:hi]
            s = jax.lax.dot_general(qh, kh, (((1,), (1,)), ((), ())),
                                    preferred_element_type=jnp.float32) * scale
            if causal:
                s = jnp.where(mask, s, -1e30)
            m_prev = m_ref[h]                                      # (tq, 1)
            m_new = jnp.maximum(m_prev, jnp.max(s, axis=-1, keepdims=True))
            alpha = jnp.exp(m_prev - m_new)
            p = jnp.exp(s - m_new)                                 # f32 softmax math
            if causal:
                p = jnp.where(mask, p, 0.0)
            l_ref[h] = alpha * l_ref[h] + jnp.sum(p, axis=-1, keepdims=True)
            acc_ref[h] = alpha * acc_ref[h] + jax.lax.dot_general(
                p.astype(vh.dtype), vh, (((1,), (0,)), ((), ())),
                preferred_element_type=jnp.float32)
            m_ref[h] = m_new

    if causal:
        # skip KV blocks that lie entirely above the causal diagonal
        pl.when(qi * tq + tq - 1 >= ki * tkv)(process)
    else:
        process()

    @pl.when(ki == pl.num_programs(2) - 1)
    def _fin():
        parts = []
        for h in range(kv_heads):
            inv = pl.reciprocal(l_ref[h], approx=True)             # (tq, 1)
            parts.append(acc_ref[h] * inv)
        o_ref[0] = jnp.concatenate(parts, axis=-1).astype(o_ref.dtype)


def flash_gqa_attention(q, k, v, *, kv_heads, head_dim, causal):
    # q: (B, Nq, kv_heads*head_dim) group-folded queries; k, v: (B, S, kv_heads*head_dim)
    B, Nq, Hd = q.shape
    S = k.shape[1]
    tq = _tile(Nq, 256, 8)
    tkv = _tile(S, 256, 8)
    kernel = functools.partial(_flash_gqa_kernel, kv_heads=kv_heads,
                               head_dim=head_dim, scale=1.0 / sqrt(head_dim),
                               causal=causal, tq=tq, tkv=tkv)
    return pl.pallas_call(
        kernel,
        out_shape=jax.ShapeDtypeStruct((B, Nq, Hd), q.dtype),
        grid=(B, Nq // tq, S // tkv),
        in_specs=[pl.BlockSpec((1, tq, Hd), lambda b, i, j: (b, i, 0)),
                  pl.BlockSpec((1, tkv, Hd), lambda b, i, j: (b, j, 0)),
                  pl.BlockSpec((1, tkv, Hd), lambda b, i, j: (b, j, 0))],
        out_specs=pl.BlockSpec((1, tq, Hd), lambda b, i, j: (b, i, 0)),
        scratch_shapes=[pltpu.VMEM((kv_heads, tq, 1), jnp.float32),
                        pltpu.VMEM((kv_heads, tq, 1), jnp.float32),
                        pltpu.VMEM((kv_heads, tq, head_dim), jnp.float32)],
        compiler_params=pltpu.CompilerParams(
            dimension_semantics=("parallel", "parallel", "arbitrary"),
            vmem_limit_bytes=VMEM_LIMIT),
    )(q, k, v)


# ------------------------------ XPOS (x + xpos(x)) kernel ------------------------------

def _xpos_add_kernel(x_ref, rot_ref, cos_ref, sin_ref, o_ref):
    x = x_ref[0].astype(jnp.float32)                   # (ts, D)
    r = rot_ref[0].astype(jnp.float32)                 # rotate_every_two(x)
    o_ref[0] = (x + x * cos_ref[...] + r * sin_ref[...]).astype(o_ref.dtype)


def xpos_add(emb, emb_rot, cos_d, sin_d, out_dtype=jnp.bfloat16):
    B, S, D = emb.shape
    ts = _tile(S, 256, 8)
    return pl.pallas_call(
        _xpos_add_kernel,
        out_shape=jax.ShapeDtypeStruct((B, S, D), out_dtype),
        grid=(B, S // ts),
        in_specs=[pl.BlockSpec((1, ts, D), lambda b, i: (b, i, 0)),
                  pl.BlockSpec((1, ts, D), lambda b, i: (b, i, 0)),
                  pl.BlockSpec((ts, D), lambda b, i: (i, 0)),
                  pl.BlockSpec((ts, D), lambda b, i: (i, 0))],
        out_specs=pl.BlockSpec((1, ts, D), lambda b, i: (b, i, 0)),
        compiler_params=pltpu.CompilerParams(
            dimension_semantics=("parallel", "parallel"),
            vmem_limit_bytes=VMEM_LIMIT),
    )(emb, emb_rot, cos_d.astype(jnp.float32), sin_d.astype(jnp.float32))


# --------------------------------- glue (plain JAX) ---------------------------------

def xpos_tables(seq_len, d_model, scale_base=512, offset=0):
    half = d_model // 2
    base_scale = (jnp.arange(0, d_model, 2, dtype=jnp.float32) + 0.4 * d_model) / (1.4 * d_model)
    min_pos = -(seq_len + offset) // 2
    max_pos = seq_len + offset + min_pos
    power = jnp.arange(min_pos, max_pos, dtype=jnp.float32) / scale_base
    scale = base_scale[None, :] ** power[:, None]                       # (S, half)
    inv_freq = 1.0 / (10000.0 ** (jnp.arange(0, half, dtype=jnp.float32) / half))
    sinusoid = jnp.arange(seq_len, dtype=jnp.float32)[:, None] * inv_freq[None, :]
    sin = jnp.sin(sinusoid) * scale
    cos = jnp.cos(sinusoid) * scale
    # duplicate_interleave: (S, half) -> (S, D) with columns 2j, 2j+1 == col j
    return jnp.repeat(sin, 2, axis=1), jnp.repeat(cos, 2, axis=1)


def rotate_every_two(x):
    # x: (B, S, D) -> (-x[..,1], x[..,0], -x[..,3], x[..,2], ...)
    B, S, D = x.shape
    e = x.reshape(B, S, D // 2, 2)
    return jnp.stack((-e[..., 1], e[..., 0]), axis=-1).reshape(B, S, D)


def self_attention_block(x, p, norm_g, norm_b, *, kv_heads, head_dim, causal):
    B, S, D = x.shape
    M = B * S
    kv_dim = kv_heads * head_dim
    x2d = x.reshape(M, D)
    # pre-LN fused into the (group-folded) q|k|v projection (single matmul)
    qkv = ln_linear(x2d, p["wqkv"], p["bqkv"], gamma=norm_g, beta=norm_b)
    q = qkv[:, :kv_dim].reshape(B, S, kv_dim)
    k = qkv[:, kv_dim:2 * kv_dim].reshape(B, S, kv_dim)
    v = qkv[:, 2 * kv_dim:].reshape(B, S, kv_dim)
    attn = flash_gqa_attention(q, k, v, kv_heads=kv_heads, head_dim=head_dim, causal=causal)
    # optional inner LayerNorm + out_proj + residual, all in one kernel
    out = ln_linear(attn.reshape(M, kv_dim), p["wo"], p["bo"],
                    gamma=p.get("ln_g"), beta=p.get("ln_b"), residual=x2d)
    return out.reshape(B, S, D)


def cross_attention_block(x, memory, p, norm_g, norm_b, *, kv_heads, head_dim, causal):
    B, S, D = x.shape
    Sm = memory.shape[1]
    M, Mm = B * S, B * Sm
    kv_dim = kv_heads * head_dim
    x2d = x.reshape(M, D)
    q = ln_linear(x2d, p["wq"], p["bq"], gamma=norm_g, beta=norm_b).reshape(B, S, kv_dim)
    kv = ln_linear(memory.reshape(Mm, D), p["wkv"], p["bkv"]).reshape(B, Sm, 2 * kv_dim)
    k = kv[:, :, :kv_dim]
    v = kv[:, :, kv_dim:]
    attn = flash_gqa_attention(q, k, v, kv_heads=kv_heads, head_dim=head_dim, causal=causal)
    out = ln_linear(attn.reshape(M, kv_dim), p["wo"], p["bo"],
                    gamma=p["ln_g"], beta=p["ln_b"], residual=x2d)
    return out.reshape(B, S, D)


def ffn_block(x, p, norm_pre_g, norm_pre_b, norm_mid_g, norm_mid_b):
    B, S, D = x.shape
    M = B * S
    x2d = x.reshape(M, D)
    h = ln_linear(x2d, p["w1"], p["b1"], gamma=norm_pre_g, beta=norm_pre_b, activation="relu")
    out = ln_linear(h, p["w2"], p["b2"], gamma=norm_mid_g, beta=norm_mid_b, residual=x2d)
    return out.reshape(B, S, D)


def encoder_layer(x, p, *, kv_heads, head_dim, is_causal):
    x = self_attention_block(x, p["self_attn"], p["norm1_g"], p["norm1_b"],
                             kv_heads=kv_heads, head_dim=head_dim, causal=is_causal)
    x = ffn_block(x, p, p["norm2_g"], p["norm2_b"], p["norm3_g"], p["norm3_b"])
    return x


def decoder_layer(x, memory, p, *, kv_heads, head_dim, tgt_is_causal, memory_is_causal):
    x = self_attention_block(x, p["self_attn"], p["norm1_g"], p["norm1_b"],
                             kv_heads=kv_heads, head_dim=head_dim, causal=tgt_is_causal)
    x = cross_attention_block(x, memory, p["cross_attn"], p["norm2_g"], p["norm2_b"],
                              kv_heads=kv_heads, head_dim=head_dim, causal=memory_is_causal)
    x = ffn_block(x, p, p["norm3_g"], p["norm3_b"], p["norm4_g"], p["norm4_b"])
    return x


def gqa_transformer_lm(tokens, params, *, nhead, kv_heads, is_causal=True):
    emb = params["embedding"][tokens]                   # XLA gather, (B, S, D) f32
    B, S, D = emb.shape
    head_dim = D // nhead
    sin_d, cos_d = xpos_tables(S, D)
    emb_rot = rotate_every_two(emb)                     # cheap pair-swap in XLA
    x = xpos_add(emb, emb_rot, cos_d, sin_d)            # x = emb + XPOS(emb), bf16
    tgt = x
    for p in params["encoder_layers"]:
        x = encoder_layer(x, p, kv_heads=kv_heads, head_dim=head_dim, is_causal=is_causal)
    mem = x
    for p in params["decoder_layers"]:
        tgt = decoder_layer(tgt, mem, p, kv_heads=kv_heads, head_dim=head_dim,
                            tgt_is_causal=is_causal, memory_is_causal=is_causal)
    # final LayerNorm fused with the vocab projection (vocab N-tiled, f32 logits)
    logits = ln_linear(tgt.reshape(B * S, D), params["w_out"], params["b_out"],
                       gamma=params["norm_g"], beta=params["norm_b"],
                       out_dtype=jnp.float32)
    return logits.reshape(B, S, -1)


# ----------------------------------- parameter init -----------------------------------

def init_params(key, *, vocab, d_model, nhead, kv_heads, ffn, n_enc, n_dec):
    head_dim = d_model // nhead
    kv_dim = head_dim * kv_heads
    g = nhead // kv_heads
    keys = iter(jax.random.split(key, 256))

    def dense(k_in, k_out):
        w = jax.random.normal(next(keys), (k_in, k_out), jnp.float32) / jnp.sqrt(float(k_in))
        return w, jnp.zeros((k_out,), jnp.float32)

    def ln(d):
        return jnp.ones((d,), jnp.float32), jnp.zeros((d,), jnp.float32)

    def fold_q(wq, bq):
        # GQA sums query heads over their group before softmax (einops "(h g)");
        # fold that sum into the projection: sum_g(x@Wq_g + b_g) == x@(sum_g Wq_g) + sum_g b_g
        wqf = wq.reshape(d_model, kv_heads, g, head_dim).sum(axis=2).reshape(d_model, kv_dim)
        bqf = bq.reshape(kv_heads, g, head_dim).sum(axis=1).reshape(kv_dim)
        return wqf, bqf

    def self_attn_params(use_ln):
        wq, bq = dense(d_model, d_model)
        wk, bk = dense(d_model, kv_dim)
        wv, bv = dense(d_model, kv_dim)
        wqf, bqf = fold_q(wq, bq)
        wo, bo = dense(kv_dim, d_model)
        p = {"wqkv": jnp.concatenate([wqf, wk, wv], axis=1).astype(jnp.bfloat16),
             "bqkv": jnp.concatenate([bqf, bk, bv]),
             "wo": wo.astype(jnp.bfloat16), "bo": bo}
        if use_ln:
            p["ln_g"], p["ln_b"] = ln(kv_dim)
        return p

    def cross_attn_params():
        wq, bq = dense(d_model, d_model)
        wqf, bqf = fold_q(wq, bq)
        wk, bk = dense(d_model, kv_dim)
        wv, bv = dense(d_model, kv_dim)
        wo, bo = dense(kv_dim, d_model)
        p = {"wq": wqf.astype(jnp.bfloat16), "bq": bqf,
             "wkv": jnp.concatenate([wk, wv], axis=1).astype(jnp.bfloat16),
             "bkv": jnp.concatenate([bk, bv]),
             "wo": wo.astype(jnp.bfloat16), "bo": bo}
        p["ln_g"], p["ln_b"] = ln(kv_dim)
        return p

    def enc_layer():
        p = {}
        p["norm1_g"], p["norm1_b"] = ln(d_model)
        p["self_attn"] = self_attn_params(use_ln=True)
        p["norm2_g"], p["norm2_b"] = ln(d_model)
        w1, b1 = dense(d_model, ffn)
        p["w1"], p["b1"] = w1.astype(jnp.bfloat16), b1
        p["norm3_g"], p["norm3_b"] = ln(ffn)
        w2, b2 = dense(ffn, d_model)
        p["w2"], p["b2"] = w2.astype(jnp.bfloat16), b2
        return p

    def dec_layer():
        p = {}
        p["norm1_g"], p["norm1_b"] = ln(d_model)
        p["self_attn"] = self_attn_params(use_ln=False)
        p["norm2_g"], p["norm2_b"] = ln(d_model)
        p["cross_attn"] = cross_attn_params()
        p["norm3_g"], p["norm3_b"] = ln(d_model)
        w1, b1 = dense(d_model, ffn)
        p["w1"], p["b1"] = w1.astype(jnp.bfloat16), b1
        p["norm4_g"], p["norm4_b"] = ln(ffn)
        w2, b2 = dense(ffn, d_model)
        p["w2"], p["b2"] = w2.astype(jnp.bfloat16), b2
        return p

    params = {
        "embedding": jax.random.normal(next(keys), (vocab, d_model), jnp.float32),
        "encoder_layers": [enc_layer() for _ in range(n_enc)],
        "decoder_layers": [dec_layer() for _ in range(n_dec)],
    }
    params["norm_g"], params["norm_b"] = ln(d_model)
    w_out, b_out = dense(d_model, vocab)
    params["w_out"], params["b_out"] = w_out.astype(jnp.bfloat16), b_out
    return params


# ---------------------------------------- main ----------------------------------------

if __name__ == "__main__":
    key = jax.random.PRNGKey(0)
    B, S = 2, 8
    vocab, d_model, nhead, kv_heads, ffn = 64, 32, 4, 2, 64
    n_enc, n_dec = 2, 2

    pkey, tkey = jax.random.split(key)
    params = init_params(pkey, vocab=vocab, d_model=d_model, nhead=nhead,
                         kv_heads=kv_heads, ffn=ffn, n_enc=n_enc, n_dec=n_dec)
    tokens = jax.random.randint(tkey, (B, S), 0, vocab)

    fwd = jax.jit(functools.partial(gqa_transformer_lm, nhead=nhead, kv_heads=kv_heads))
    logits = jax.block_until_ready(fwd(tokens, params))

    assert logits.shape == (B, S, vocab), logits.shape
    assert bool(jnp.all(jnp.isfinite(logits)))
    print("KERNEL_OK")
</pallas_src>

<mosaic_0001>
module attributes {stable_mosaic.version = 11 : i64} {
  func.func @_xpos_add_kernel(%arg0: i32, %arg1: i32, %arg2: memref<1x8x32xf32, #tpu.memory_space<vmem>>, %arg3: memref<1x8x32xf32, #tpu.memory_space<vmem>>, %arg4: memref<8x32xf32, #tpu.memory_space<vmem>>, %arg5: memref<8x32xf32, #tpu.memory_space<vmem>>, %arg6: memref<1x8x32xbf16, #tpu.memory_space<vmem>>) attributes {dimension_semantics = [#tpu.dimension_semantics<parallel>, #tpu.dimension_semantics<parallel>], iteration_bounds = array<i64: 2, 1>, scalar_prefetch = 0 : i64, scratch_operands = 0 : i64, tpu.core_type = #tpu.core_type<tc>, window_params = [{transform_indices = @transform_0, window_bounds = array<i64: 1, 8, 32>}, {transform_indices = @transform_1, window_bounds = array<i64: 1, 8, 32>}, {transform_indices = @transform_2, window_bounds = array<i64: 8, 32>}, {transform_indices = @transform_3, window_bounds = array<i64: 8, 32>}, {transform_indices = @transform_4, window_bounds = array<i64: 1, 8, 32>}]} {
    %c0 = arith.constant 0 : index
    %c0_0 = arith.constant 0 : index
    %c0_1 = arith.constant 0 : index
    %0 = vector.load %arg2[%c0, %c0_0, %c0_1] : memref<1x8x32xf32, #tpu.memory_space<vmem>>, vector<1x8x32xf32>
    %1 = vector.shape_cast %0 : vector<1x8x32xf32> to vector<8x32xf32>
    %c0_2 = arith.constant 0 : index
    %c0_3 = arith.constant 0 : index
    %c0_4 = arith.constant 0 : index
    %2 = vector.load %arg3[%c0_2, %c0_3, %c0_4] : memref<1x8x32xf32, #tpu.memory_space<vmem>>, vector<1x8x32xf32>
    %3 = vector.shape_cast %2 : vector<1x8x32xf32> to vector<8x32xf32>
    %c0_5 = arith.constant 0 : index
    %c0_6 = arith.constant 0 : index
    %4 = vector.load %arg4[%c0_5, %c0_6] : memref<8x32xf32, #tpu.memory_space<vmem>>, vector<8x32xf32>
    %5 = arith.mulf %1, %4 : vector<8x32xf32>
    %6 = arith.addf %1, %5 : vector<8x32xf32>
    %c0_7 = arith.constant 0 : index
    %c0_8 = arith.constant 0 : index
    %7 = vector.load %arg5[%c0_7, %c0_8] : memref<8x32xf32, #tpu.memory_space<vmem>>, vector<8x32xf32>
    %8 = arith.mulf %3, %7 : vector<8x32xf32>
    %9 = arith.addf %6, %8 : vector<8x32xf32>
    %10 = arith.truncf %9 : vector<8x32xf32> to vector<8x32xbf16>
    %c0_9 = arith.constant 0 : index
    %c0_10 = arith.constant 0 : index
    %c0_11 = arith.constant 0 : index
    %11 = vector.load %arg6[%c0_9, %c0_10, %c0_11] : memref<1x8x32xbf16, #tpu.memory_space<vmem>>, vector<1x8x32xbf16>
    %12 = vector.shape_cast %11 : vector<1x8x32xbf16> to vector<8x32xbf16>
    %13 = vector.shape_cast %10 : vector<8x32xbf16> to vector<1x8x32xbf16>
    tpu.vector_store %arg6[%c0_9, %c0_10, %c0_11], %13 {strides = array<i32>} : memref<1x8x32xbf16, #tpu.memory_space<vmem>>, vector<1x8x32xbf16>,
    return
  }
  func.func @transform_0(%arg0: i32, %arg1: i32) -> (i32, i32, i32) {
    %c0_i32 = arith.constant 0 : i32
    %c0_i32_0 = arith.constant 0 : i32
    return %arg0, %arg1, %c0_i32 : i32, i32, i32
  }
  func.func @transform_1(%arg0: i32, %arg1: i32) -> (i32, i32, i32) {
    %c0_i32 = arith.constant 0 : i32
    %c0_i32_0 = arith.constant 0 : i32
    return %arg0, %arg1, %c0_i32 : i32, i32, i32
  }
  func.func @transform_2(%arg0: i32, %arg1: i32) -> (i32, i32) {
    %c0_i32 = arith.constant 0 : i32
    %c0_i32_0 = arith.constant 0 : i32
    return %arg1, %c0_i32 : i32, i32
  }
  func.func @transform_3(%arg0: i32, %arg1: i32) -> (i32, i32) {
    %c0_i32 = arith.constant 0 : i32
    %c0_i32_0 = arith.constant 0 : i32
    return %arg1, %c0_i32 : i32, i32
  }
  func.func @transform_4(%arg0: i32, %arg1: i32) -> (i32, i32, i32) {
    %c0_i32 = arith.constant 0 : i32
    %c0_i32_0 = arith.constant 0 : i32
    return %arg0, %arg1, %c0_i32 : i32, i32, i32
  }
}

module attributes {stable_mosaic.version = 11 : i64} {
  func.func @_flash_gqa_kernel(%arg0: i32, %arg1: i32, %arg2: i32, %arg3: memref<1x8x16xbf16, #tpu.memory_space<vmem>>, %arg4: memref<1x8x16xbf16, #tpu.memory_space<vmem>>, %arg5: memref<1x8x16xbf16, #tpu.memory_space<vmem>>, %arg6: memref<1x8x16xbf16, #tpu.memory_space<vmem>>, %arg7: memref<2x8x1xf32, #tpu.memory_space<vmem>>, %arg8: memref<2x8x1xf32, #tpu.memory_space<vmem>>, %arg9: memref<2x8x8xf32, #tpu.memory_space<vmem>>) attributes {dimension_semantics = [#tpu.dimension_semantics<parallel>, #tpu.dimension_semantics<parallel>, #tpu.dimension_semantics<arbitrary>], iteration_bounds = array<i64: 2, 1, 1>, scalar_prefetch = 0 : i64, scratch_operands = 3 : i64, tpu.core_type = #tpu.core_type<tc>, window_params = [{transform_indices = @transform_0, window_bounds = array<i64: 1, 8, 16>}, {transform_indices = @transform_1, window_bounds = array<i64: 1, 8, 16>}, {transform_indices = @transform_2, window_bounds = array<i64: 1, 8, 16>}, {transform_indices = @transform_3, window_bounds = array<i64: 1, 8, 16>}]} {
    %c0_i32 = arith.constant 0 : i32
    %0 = arith.cmpi eq, %arg2, %c0_i32 : i32
    %1 = arith.extui %0 : i1 to i32
    %c0_i32_0 = arith.constant 0 : i32
    %2 = arith.cmpi ne, %1, %c0_i32_0 : i32
    scf.if %2 {
      %cst = arith.constant 0xFF800000 : f32
      %13 = vector.broadcast %cst : f32 to vector<2x8x1xf32>
      %c0 = arith.constant 0 : index
      %c0_6 = arith.constant 0 : index
      %c0_7 = arith.constant 0 : index
      %14 = vector.load %arg7[%c0, %c0_6, %c0_7] : memref<2x8x1xf32, #tpu.memory_space<vmem>>, vector<2x8x1xf32>
      tpu.vector_store %arg7[%c0, %c0_6, %c0_7], %13 {strides = array<i32>} : memref<2x8x1xf32, #tpu.memory_space<vmem>>, vector<2x8x1xf32>,
      %cst_8 = arith.constant 0.000000e+00 : f32
      %15 = vector.broadcast %cst_8 : f32 to vector<2x8x1xf32>
      %c0_9 = arith.constant 0 : index
      %c0_10 = arith.constant 0 : index
      %c0_11 = arith.constant 0 : index
      %16 = vector.load %arg8[%c0_9, %c0_10, %c0_11] : memref<2x8x1xf32, #tpu.memory_space<vmem>>, vector<2x8x1xf32>
      tpu.vector_store %arg8[%c0_9, %c0_10, %c0_11], %15 {strides = array<i32>} : memref<2x8x1xf32, #tpu.memory_space<vmem>>, vector<2x8x1xf32>,
      %cst_12 = arith.constant 0.000000e+00 : f32
      %17 = vector.broadcast %cst_12 : f32 to vector<2x8x8xf32>
      %c0_13 = arith.constant 0 : index
      %c0_14 = arith.constant 0 : index
      %c0_15 = arith.constant 0 : index
      %18 = vector.load %arg9[%c0_13, %c0_14, %c0_15] : memref<2x8x8xf32, #tpu.memory_space<vmem>>, vector<2x8x8xf32>
      tpu.vector_store %arg9[%c0_13, %c0_14, %c0_15], %17 {strides = array<i32>} : memref<2x8x8xf32, #tpu.memory_space<vmem>>, vector<2x8x8xf32>,
    } else {
    }
    %c8_i32 = arith.constant 8 : i32
    %3 = arith.muli %arg1, %c8_i32 : i32
    %c8_i32_1 = arith.constant 8 : i32
    %4 = arith.addi %3, %c8_i32_1 : i32
    %c1_i32 = arith.constant 1 : i32
    %5 = arith.subi %4, %c1_i32 : i32
    %c8_i32_2 = arith.constant 8 : i32
    %6 = arith.muli %arg2, %c8_i32_2 : i32
    %7 = arith.cmpi sge, %5, %6 : i32
    %8 = arith.extui %7 : i1 to i32
    %c0_i32_3 = arith.constant 0 : i32
    %9 = arith.cmpi ne, %8, %c0_i32_3 : i32
    scf.if %9 {
      %c0 = arith.constant 0 : index
      %c0_6 = arith.constant 0 : index
      %c0_7 = arith.constant 0 : index
      %13 = vector.load %arg3[%c0, %c0_6, %c0_7] : memref<1x8x16xbf16, #tpu.memory_space<vmem>>, vector<1x8x16xbf16>
      %14 = vector.shape_cast %13 : vector<1x8x16xbf16> to vector<8x16xbf16>
      %c0_8 = arith.constant 0 : index
      %c0_9 = arith.constant 0 : index
      %c0_10 = arith.constant 0 : index
      %15 = vector.load %arg4[%c0_8, %c0_9, %c0_10] : memref<1x8x16xbf16, #tpu.memory_space<vmem>>, vector<1x8x16xbf16>
      %16 = vector.shape_cast %15 : vector<1x8x16xbf16> to vector<8x16xbf16>
      %c0_11 = arith.constant 0 : index
      %c0_12 = arith.constant 0 : index
      %c0_13 = arith.constant 0 : index
      %17 = vector.load %arg5[%c0_11, %c0_12, %c0_13] : memref<1x8x16xbf16, #tpu.memory_space<vmem>>, vector<1x8x16xbf16>
      %18 = vector.shape_cast %17 : vector<1x8x16xbf16> to vector<8x16xbf16>
      %c8_i32_14 = arith.constant 8 : i32
      %19 = arith.muli %arg1, %c8_i32_14 : i32
      %20 = tpu.iota {dimensions = array<i32: 0>} : vector<8x8xi32>
      %21 = vector.broadcast %19 : i32 to vector<8x8xi32>
      %22 = arith.addi %21, %20 : vector<8x8xi32>
      %c8_i32_15 = arith.constant 8 : i32
      %23 = arith.muli %arg2, %c8_i32_15 : i32
      %24 = tpu.iota {dimensions = array<i32: 1>} : vector<8x8xi32>
      %25 = vector.broadcast %23 : i32 to vector<8x8xi32>
      %26 = arith.addi %25, %24 : vector<8x8xi32>
      %27 = arith.cmpi sge, %22, %26 : vector<8x8xi32>
      %28 = vector.extract_strided_slice %14 {offsets = [0, 0], sizes = [8, 8], strides = [1, 1]} : vector<8x16xbf16> to vector<8x8xbf16>
      %29 = vector.extract_strided_slice %16 {offsets = [0, 0], sizes = [8, 8], strides = [1, 1]} : vector<8x16xbf16> to vector<8x8xbf16>
      %30 = vector.extract_strided_slice %18 {offsets = [0, 0], sizes = [8, 8], strides = [1, 1]} : vector<8x16xbf16> to vector<8x8xbf16>
      %cst = arith.constant dense<0.000000e+00> : vector<8x8xf32>
      %31 = tpu.matmul %28, %29, %cst {dimension_numbers = #tpu.dot_dimension_numbers<[1], [1], [0], [0], [0, 0, 1, 0], [], []>} : vector<8x8xbf16>, vector<8x8xbf16>, vector<8x8xf32> -> vector<8x8xf32>
      %cst_16 = arith.constant 0.353553385 : f32
      %32 = vector.broadcast %cst_16 : f32 to vector<8x8xf32>
      %33 = arith.mulf %31, %32 : vector<8x8xf32>
      %cst_17 = arith.constant -1.000000e+30 : f32
      %34 = vector.broadcast %cst_17 : f32 to vector<8x8xf32>
      %35 = arith.select %27, %33, %34 : vector<8x8xi1>, vector<8x8xf32>
      %c0_18 = arith.constant 0 : index
      %c0_19 = arith.constant 0 : index
      %c0_20 = arith.constant 0 : index
      %36 = vector.load %arg7[%c0_18, %c0_19, %c0_20] : memref<2x8x1xf32, #tpu.memory_space<vmem>>, vector<1x8x1xf32>
      %37 = vector.shape_cast %36 : vector<1x8x1xf32> to vector<8x1xf32>
      %cst_21 = arith.constant dense<0xFF800000> : vector<8xf32>
      %38 = vector.multi_reduction <maximumf>, %35, %cst_21 [1] : vector<8x8xf32> to vector<8xf32>
      %39 = vector.shape_cast %38 : vector<8xf32> to vector<8x1xf32>
      %40 = arith.maximumf %37, %39 : vector<8x1xf32>
      %41 = arith.subf %37, %40 : vector<8x1xf32>
      %42 = math.exp %41 : vector<8x1xf32>
      %43 = vector.broadcast %40 : vector<8x1xf32> to vector<8x8xf32>
      %44 = arith.subf %35, %43 : vector<8x8xf32>
      %45 = math.exp %44 : vector<8x8xf32>
      %cst_22 = arith.constant 0.000000e+00 : f32
      %46 = vector.broadcast %cst_22 : f32 to vector<8x8xf32>
      %47 = arith.select %27, %45, %46 : vector<8x8xi1>, vector<8x8xf32>
      %c0_23 = arith.constant 0 : index
      %c0_24 = arith.constant 0 : index
      %c0_25 = arith.constant 0 : index
      %48 = vector.load %arg8[%c0_23, %c0_24, %c0_25] : memref<2x8x1xf32, #tpu.memory_space<vmem>>, vector<1x8x1xf32>
      %49 = vector.shape_cast %48 : vector<1x8x1xf32> to vector<8x1xf32>
      %50 = arith.mulf %42, %49 : vector<8x1xf32>
      %cst_26 = arith.constant dense<0.000000e+00> : vector<8xf32>
      %51 = vector.multi_reduction <add>, %47, %cst_26 [1] : vector<8x8xf32> to vector<8xf32>
      %52 = vector.shape_cast %51 : vector<8xf32> to vector<8x1xf32>
      %53 = arith.addf %50, %52 : vector<8x1xf32>
      %c0_27 = arith.constant 0 : index
      %c0_28 = arith.constant 0 : index
      %c0_29 = arith.constant 0 : index
      %54 = vector.load %arg8[%c0_27, %c0_28, %c0_29] : memref<2x8x1xf32, #tpu.memory_space<vmem>>, vector<1x8x1xf32>
      %55 = vector.shape_cast %54 : vector<1x8x1xf32> to vector<8x1xf32>
      %56 = vector.shape_cast %53 : vector<8x1xf32> to vector<1x8x1xf32>
      tpu.vector_store %arg8[%c0_27, %c0_28, %c0_29], %56 {strides = array<i32>} : memref<2x8x1xf32, #tpu.memory_space<vmem>>, vector<1x8x1xf32>,
      %c0_30 = arith.constant 0 : index
      %c0_31 = arith.constant 0 : index
      %c0_32 = arith.constant 0 : index
      %57 = vector.load %arg9[%c0_30, %c0_31, %c0_32] : memref<2x8x8xf32, #tpu.memory_space<vmem>>, vector<1x8x8xf32>
      %58 = vector.shape_cast %57 : vector<1x8x8xf32> to vector<8x8xf32>
      %59 = vector.broadcast %42 : vector<8x1xf32> to vector<8x8xf32>
      %60 = arith.mulf %59, %58 : vector<8x8xf32>
      %61 = arith.truncf %47 : vector<8x8xf32> to vector<8x8xbf16>
      %cst_33 = arith.constant dense<0.000000e+00> : vector<8x8xf32>
      %62 = tpu.matmul %61, %30, %cst_33 {dimension_numbers = #tpu.dot_dimension_numbers<[1], [0], [0], [1], [0, 0, 1, 1], [], []>} : vector<8x8xbf16>, vector<8x8xbf16>, vector<8x8xf32> -> vector<8x8xf32>
      %63 = arith.addf %60, %62 : vector<8x8xf32>
      %c0_34 = arith.constant 0 : index
      %c0_35 = arith.constant 0 : index
      %c0_36 = arith.constant 0 : index
      %64 = vector.load %arg9[%c0_34, %c0_35, %c0_36] : memref<2x8x8xf32, #tpu.memory_space<vmem>>, vector<1x8x8xf32>
      %65 = vector.shape_cast %64 : vector<1x8x8xf32> to vector<8x8xf32>
      %66 = vector.shape_cast %63 : vector<8x8xf32> to vector<1x8x8xf32>
      tpu.vector_store %arg9[%c0_34, %c0_35, %c0_36], %66 {strides = array<i32>} : memref<2x8x8xf32, #tpu.memory_space<vmem>>, vector<1x8x8xf32>,
      %c0_37 = arith.constant 0 : index
      %c0_38 = arith.constant 0 : index
      %c0_39 = arith.constant 0 : index
      %67 = vector.load %arg7[%c0_37, %c0_38, %c0_39] : memref<2x8x1xf32, #tpu.memory_space<vmem>>, vector<1x8x1xf32>
      %68 = vector.shape_cast %67 : vector<1x8x1xf32> to vector<8x1xf32>
      %69 = vector.shape_cast %40 : vector<8x1xf32> to vector<1x8x1xf32>
      tpu.vector_store %arg7[%c0_37, %c0_38, %c0_39], %69 {strides = array<i32>} : memref<2x8x1xf32, #tpu.memory_space<vmem>>, vector<1x8x1xf32>,
      %70 = vector.extract_strided_slice %14 {offsets = [0, 8], sizes = [8, 8], strides = [1, 1]} : vector<8x16xbf16> to vector<8x8xbf16>
      %71 = vector.extract_strided_slice %16 {offsets = [0, 8], sizes = [8, 8], strides = [1, 1]} : vector<8x16xbf16> to vector<8x8xbf16>
      %72 = vector.extract_strided_slice %18 {offsets = [0, 8], sizes = [8, 8], strides = [1, 1]} : vector<8x16xbf16> to vector<8x8xbf16>
      %cst_40 = arith.constant dense<0.000000e+00> : vector<8x8xf32>
      %73 = tpu.matmul %70, %71, %cst_40 {dimension_numbers = #tpu.dot_dimension_numbers<[1], [1], [0], [0], [0, 0, 1, 0], [], []>} : vector<8x8xbf16>, vector<8x8xbf16>, vector<8x8xf32> -> vector<8x8xf32>
      %cst_41 = arith.constant 0.353553385 : f32
      %74 = vector.broadcast %cst_41 : f32 to vector<8x8xf32>
      %75 = arith.mulf %73, %74 : vector<8x8xf32>
      %cst_42 = arith.constant -1.000000e+30 : f32
      %76 = vector.broadcast %cst_42 : f32 to vector<8x8xf32>
      %77 = arith.select %27, %75, %76 : vector<8x8xi1>, vector<8x8xf32>
      %c1 = arith.constant 1 : index
      %c0_43 = arith.constant 0 : index
      %c0_44 = arith.constant 0 : index
      %78 = vector.load %arg7[%c1, %c0_43, %c0_44] : memref<2x8x1xf32, #tpu.memory_space<vmem>>, vector<1x8x1xf32>
      %79 = vector.shape_cast %78 : vector<1x8x1xf32> to vector<8x1xf32>
      %cst_45 = arith.constant dense<0xFF800000> : vector<8xf32>
      %80 = vector.multi_reduction <maximumf>, %77, %cst_45 [1] : vector<8x8xf32> to vector<8xf32>
      %81 = vector.shape_cast %80 : vector<8xf32> to vector<8x1xf32>
      %82 = arith.maximumf %79, %81 : vector<8x1xf32>
      %83 = arith.subf %79, %82 : vector<8x1xf32>
      %84 = math.exp %83 : vector<8x1xf32>
      %85 = vector.broadcast %82 : vector<8x1xf32> to vector<8x8xf32>
      %86 = arith.subf %77, %85 : vector<8x8xf32>
      %87 = math.exp %86 : vector<8x8xf32>
      %cst_46 = arith.constant 0.000000e+00 : f32
      %88 = vector.broadcast %cst_46 : f32 to vector<8x8xf32>
      %89 = arith.select %27, %87, %88 : vector<8x8xi1>, vector<8x8xf32>
      %c1_47 = arith.constant 1 : index
      %c0_48 = arith.constant 0 : index
      %c0_49 = arith.constant 0 : index
      %90 = vector.load %arg8[%c1_47, %c0_48, %c0_49] : memref<2x8x1xf32, #tpu.memory_space<vmem>>, vector<1x8x1xf32>
      %91 = vector.shape_cast %90 : vector<1x8x1xf32> to vector<8x1xf32>
      %92 = arith.mulf %84, %91 : vector<8x1xf32>
      %cst_50 = arith.constant dense<0.000000e+00> : vector<8xf32>
      %93 = vector.multi_reduction <add>, %89, %cst_50 [1] : vector<8x8xf32> to vector<8xf32>
      %94 = vector.shape_cast %93 : vector<8xf32> to vector<8x1xf32>
      %95 = arith.addf %92, %94 : vector<8x1xf32>
      %c1_51 = arith.constant 1 : index
      %c0_52 = arith.constant 0 : index
      %c0_53 = arith.constant 0 : index
      %96 = vector.load %arg8[%c1_51, %c0_52, %c0_53] : memref<2x8x1xf32, #tpu.memory_space<vmem>>, vector<1x8x1xf32>
      %97 = vector.shape_cast %96 : vector<1x8x1xf32> to vector<8x1xf32>
      %98 = vector.shape_cast %95 : vector<8x1xf32> to vector<1x8x1xf32>
      tpu.vector_store %arg8[%c1_51, %c0_52, %c0_53], %98 {strides = array<i32>} : memref<2x8x1xf32, #tpu.memory_space<vmem>>, vector<1x8x1xf32>,
      %c1_54 = arith.constant 1 : index
      %c0_55 = arith.constant 0 : index
      %c0_56 = arith.constant 0 : index
      %99 = vector.load %arg9[%c1_54, %c0_55, %c0_56] : memref<2x8x8xf32, #tpu.memory_space<vmem>>, vector<1x8x8xf32>
      %100 = vector.shape_cast %99 : vector<1x8x8xf32> to vector<8x8xf32>
      %101 = vector.broadcast %84 : vector<8x1xf32> to vector<8x8xf32>
      %102 = arith.mulf %101, %100 : vector<8x8xf32>
      %103 = arith.truncf %89 : vector<8x8xf32> to vector<8x8xbf16>
      %cst_57 = arith.constant dense<0.000000e+00> : vector<8x8xf32>
      %104 = tpu.matmul %103, %72, %cst_57 {dimension_numbers = #tpu.dot_dimension_numbers<[1], [0], [0], [1], [0, 0, 1, 1], [], []>} : vector<8x8xbf16>, vector<8x8xbf16>, vector<8x8xf32> -> vector<8x8xf32>
      %105 = arith.addf %102, %104 : vector<8x8xf32>
      %c1_58 = arith.constant 1 : index
      %c0_59 = arith.constant 0 : index
      %c0_60 = arith.constant 0 : index
      %106 = vector.load %arg9[%c1_58, %c0_59, %c0_60] : memref<2x8x8xf32, #tpu.memory_space<vmem>>, vector<1x8x8xf32>
      %107 = vector.shape_cast %106 : vector<1x8x8xf32> to vector<8x8xf32>
      %108 = vector.shape_cast %105 : vector<8x8xf32> to vector<1x8x8xf32>
      tpu.vector_store %arg9[%c1_58, %c0_59, %c0_60], %108 {strides = array<i32>} : memref<2x8x8xf32, #tpu.memory_space<vmem>>, vector<1x8x8xf32>,
      %c1_61 = arith.constant 1 : index
      %c0_62 = arith.constant 0 : index
      %c0_63 = arith.constant 0 : index
      %109 = vector.load %arg7[%c1_61, %c0_62, %c0_63] : memref<2x8x1xf32, #tpu.memory_space<vmem>>, vector<1x8x1xf32>
      %110 = vector.shape_cast %109 : vector<1x8x1xf32> to vector<8x1xf32>
      %111 = vector.shape_cast %82 : vector<8x1xf32> to vector<1x8x1xf32>
      tpu.vector_store %arg7[%c1_61, %c0_62, %c0_63], %111 {strides = array<i32>} : memref<2x8x1xf32, #tpu.memory_space<vmem>>, vector<1x8x1xf32>,
    } else {
    }
    %c0_i32_4 = arith.constant 0 : i32
    %10 = arith.cmpi eq, %arg2, %c0_i32_4 : i32
    %11 = arith.extui %10 : i1 to i32
    %c0_i32_5 = arith.constant 0 : i32
    %12 = arith.cmpi ne, %11, %c0_i32_5 : i32
    scf.if %12 {
      %c0 = arith.constant 0 : index
      %c0_6 = arith.constant 0 : index
      %c0_7 = arith.constant 0 : index
      %13 = vector.load %arg8[%c0, %c0_6, %c0_7] : memref<2x8x1xf32, #tpu.memory_space<vmem>>, vector<1x8x1xf32>
      %14 = vector.shape_cast %13 : vector<1x8x1xf32> to vector<8x1xf32>
      %15 = tpu.reciprocal %14 {approx = true} : vector<8x1xf32> -> vector<8x1xf32>
      %c0_8 = arith.constant 0 : index
      %c0_9 = arith.constant 0 : index
      %c0_10 = arith.constant 0 : index
      %16 = vector.load %arg9[%c0_8, %c0_9, %c0_10] : memref<2x8x8xf32, #tpu.memory_space<vmem>>, vector<1x8x8xf32>
      %17 = vector.shape_cast %16 : vector<1x8x8xf32> to vector<8x8xf32>
      %18 = vector.broadcast %15 : vector<8x1xf32> to vector<8x8xf32>
      %19 = arith.mulf %17, %18 : vector<8x8xf32>
      %c1 = arith.constant 1 : index
      %c0_11 = arith.constant 0 : index
      %c0_12 = arith.constant 0 : index
      %20 = vector.load %arg8[%c1, %c0_11, %c0_12] : memref<2x8x1xf32, #tpu.memory_space<vmem>>, vector<1x8x1xf32>
      %21 = vector.shape_cast %20 : vector<1x8x1xf32> to vector<8x1xf32>
      %22 = tpu.reciprocal %21 {approx = true} : vector<8x1xf32> -> vector<8x1xf32>
      %c1_13 = arith.constant 1 : index
      %c0_14 = arith.constant 0 : index
      %c0_15 = arith.constant 0 : index
      %23 = vector.load %arg9[%c1_13, %c0_14, %c0_15] : memref<2x8x8xf32, #tpu.memory_space<vmem>>, vector<1x8x8xf32>
      %24 = vector.shape_cast %23 : vector<1x8x8xf32> to vector<8x8xf32>
      %25 = vector.broadcast %22 : vector<8x1xf32> to vector<8x8xf32>
      %26 = arith.mulf %24, %25 : vector<8x8xf32>
      %27 = tpu.concatenate %19, %26 in 1 : vector<8x8xf32>, vector<8x8xf32> -> vector<8x16xf32>
      %28 = arith.truncf %27 : vector<8x16xf32> to vector<8x16xbf16>
      %c0_16 = arith.constant 0 : index
      %c0_17 = arith.constant 0 : index
      %c0_18 = arith.constant 0 : index
      %29 = vector.load %arg6[%c0_16, %c0_17, %c0_18] : memref<1x8x16xbf16, #tpu.memory_space<vmem>>, vector<1x8x16xbf16>
      %30 = vector.shape_cast %29 : vector<1x8x16xbf16> to vector<8x16xbf16>
      %31 = vector.shape_cast %28 : vector<8x16xbf16> to vector<1x8x16xbf16>
      tpu.vector_store %arg6[%c0_16, %c0_17, %c0_18], %31 {strides = array<i32>} : memref<1x8x16xbf16, #tpu.memory_space<vmem>>, vector<1x8x16xbf16>,
    } else {
    }
    return
  }
  func.func @transform_0(%arg0: i32, %arg1: i32, %arg2: i32) -> (i32, i32, i32) {
    %c0_i32 = arith.constant 0 : i32
    %c0_i32_0 = arith.constant 0 : i32
    return %arg0, %arg1, %c0_i32 : i32, i32, i32
  }
  func.func @transform_1(%arg0: i32, %arg1: i32, %arg2: i32) -> (i32, i32, i32) {
    %c0_i32 = arith.constant 0 : i32
    %c0_i32_0 = arith.constant 0 : i32
    return %arg0, %arg2, %c0_i32 : i32, i32, i32
  }
  func.func @transform_2(%arg0: i32, %arg1: i32, %arg2: i32) -> (i32, i32, i32) {
    %c0_i32 = arith.constant 0 : i32
    %c0_i32_0 = arith.constant 0 : i32
    return %arg0, %arg2, %c0_i32 : i32, i32, i32
  }
  func.func @transform_3(%arg0: i32, %arg1: i32, %arg2: i32) -> (i32, i32, i32) {
    %c0_i32 = arith.constant 0 : i32
    %c0_i32_0 = arith.constant 0 : i32
    return %arg0, %arg1, %c0_i32 : i32, i32, i32
  }
}

module attributes {stable_mosaic.version = 11 : i64} {
  func.func @_linear_kernel(%arg0: i32, %arg1: i32, %arg2: i32, %arg3: memref<16x32xbf16, #tpu.memory_space<vmem>>, %arg4: memref<32x48xbf16, #tpu.memory_space<vmem>>, %arg5: memref<1x48xf32, #tpu.memory_space<vmem>>, %arg6: memref<1x32xf32, #tpu.memory_space<vmem>>, %arg7: memref<1x32xf32, #tpu.memory_space<vmem>>, %arg8: memref<16x48xbf16, #tpu.memory_space<vmem>>, %arg9: memref<16x48xf32, #tpu.memory_space<vmem>>) attributes {dimension_semantics = [#tpu.dimension_semantics<parallel>, #tpu.dimension_semantics<parallel>, #tpu.dimension_semantics<arbitrary>], iteration_bounds = array<i64: 1, 1, 1>, scalar_prefetch = 0 : i64, scratch_operands = 1 : i64, tpu.core_type = #tpu.core_type<tc>, window_params = [{transform_indices = @transform_0, window_bounds = array<i64: 16, 32>}, {transform_indices = @transform_1, window_bounds = array<i64: 32, 48>}, {transform_indices = @transform_2, window_bounds = array<i64: 1, 48>}, {transform_indices = @transform_3, window_bounds = array<i64: 1, 32>}, {transform_indices = @transform_4, window_bounds = array<i64: 1, 32>}, {transform_indices = @transform_5, window_bounds = array<i64: 16, 48>}]} {
    %c0_i32 = arith.constant 0 : i32
    %0 = arith.cmpi eq, %arg2, %c0_i32 : i32
    %1 = arith.extui %0 : i1 to i32
    %c0_i32_0 = arith.constant 0 : i32
    %2 = arith.cmpi ne, %1, %c0_i32_0 : i32
    scf.if %2 {
      %cst_19 = arith.constant 0.000000e+00 : f32
      %38 = vector.broadcast %cst_19 : f32 to vector<16x48xf32>
      %c0_20 = arith.constant 0 : index
      %c0_21 = arith.constant 0 : index
      %39 = vector.load %arg9[%c0_20, %c0_21] : memref<16x48xf32, #tpu.memory_space<vmem>>, vector<16x48xf32>
      tpu.vector_store %arg9[%c0_20, %c0_21], %38 {strides = array<i32>} : memref<16x48xf32, #tpu.memory_space<vmem>>, vector<16x48xf32>,
    } else {
    }
    %c0 = arith.constant 0 : index
    %c0_1 = arith.constant 0 : index
    %3 = vector.load %arg3[%c0, %c0_1] : memref<16x32xbf16, #tpu.memory_space<vmem>>, vector<16x32xbf16>
    %4 = arith.extf %3 : vector<16x32xbf16> to vector<16x32xf32>
    %cst = arith.constant dense<0.000000e+00> : vector<16xf32>
    %5 = vector.multi_reduction <add>, %4, %cst [1] : vector<16x32xf32> to vector<16xf32>
    %6 = vector.shape_cast %5 : vector<16xf32> to vector<16x1xf32>
    %cst_2 = arith.constant 3.200000e+01 : f32
    %7 = vector.broadcast %cst_2 : f32 to vector<16x1xf32>
    %8 = arith.divf %6, %7 : vector<16x1xf32>
    %9 = vector.broadcast %8 : vector<16x1xf32> to vector<16x32xf32>
    %10 = arith.subf %4, %9 : vector<16x32xf32>
    %11 = arith.mulf %10, %10 : vector<16x32xf32>
    %cst_3 = arith.constant dense<0.000000e+00> : vector<16xf32>
    %12 = vector.multi_reduction <add>, %11, %cst_3 [1] : vector<16x32xf32> to vector<16xf32>
    %13 = vector.shape_cast %12 : vector<16xf32> to vector<16x1xf32>
    %cst_4 = arith.constant 3.200000e+01 : f32
    %14 = vector.broadcast %cst_4 : f32 to vector<16x1xf32>
    %15 = arith.divf %13, %14 : vector<16x1xf32>
    %16 = vector.broadcast %8 : vector<16x1xf32> to vector<16x32xf32>
    %17 = arith.subf %4, %16 : vector<16x32xf32>
    %cst_5 = arith.constant 9.99999974E-6 : f32
    %18 = vector.broadcast %cst_5 : f32 to vector<16x1xf32>
    %19 = arith.addf %15, %18 : vector<16x1xf32>
    %20 = math.rsqrt %19 : vector<16x1xf32>
    %21 = vector.broadcast %20 : vector<16x1xf32> to vector<16x32xf32>
    %22 = arith.mulf %17, %21 : vector<16x32xf32>
    %c0_6 = arith.constant 0 : index
    %c0_7 = arith.constant 0 : index
    %23 = vector.load %arg6[%c0_6, %c0_7] : memref<1x32xf32, #tpu.memory_space<vmem>>, vector<1x32xf32>
    %24 = vector.broadcast %23 : vector<1x32xf32> to vector<16x32xf32>
    %25 = arith.mulf %22, %24 : vector<16x32xf32>
    %c0_8 = arith.constant 0 : index
    %c0_9 = arith.constant 0 : index
    %26 = vector.load %arg7[%c0_8, %c0_9] : memref<1x32xf32, #tpu.memory_space<vmem>>, vector<1x32xf32>
    %27 = vector.broadcast %26 : vector<1x32xf32> to vector<16x32xf32>
    %28 = arith.addf %25, %27 : vector<16x32xf32>
    %29 = arith.truncf %28 : vector<16x32xf32> to vector<16x32xbf16>
    %c0_10 = arith.constant 0 : index
    %c0_11 = arith.constant 0 : index
    %30 = vector.load %arg9[%c0_10, %c0_11] : memref<16x48xf32, #tpu.memory_space<vmem>>, vector<16x48xf32>
    %c0_12 = arith.constant 0 : index
    %c0_13 = arith.constant 0 : index
    %31 = vector.load %arg4[%c0_12, %c0_13] : memref<32x48xbf16, #tpu.memory_space<vmem>>, vector<32x48xbf16>
    %cst_14 = arith.constant dense<0.000000e+00> : vector<16x48xf32>
    %32 = tpu.matmul %29, %31, %cst_14 {dimension_numbers = #tpu.dot_dimension_numbers<[1], [0], [0], [1], [0, 0, 1, 1], [], []>} : vector<16x32xbf16>, vector<32x48xbf16>, vector<16x48xf32> -> vector<16x48xf32>
    %33 = arith.addf %30, %32 : vector<16x48xf32>
    %c0_15 = arith.constant 0 : index
    %c0_16 = arith.constant 0 : index
    %34 = vector.load %arg9[%c0_15, %c0_16] : memref<16x48xf32, #tpu.memory_space<vmem>>, vector<16x48xf32>
    tpu.vector_store %arg9[%c0_15, %c0_16], %33 {strides = array<i32>} : memref<16x48xf32, #tpu.memory_space<vmem>>, vector<16x48xf32>,
    %c0_i32_17 = arith.constant 0 : i32
    %35 = arith.cmpi eq, %arg2, %c0_i32_17 : i32
    %36 = arith.extui %35 : i1 to i32
    %c0_i32_18 = arith.constant 0 : i32
    %37 = arith.cmpi ne, %36, %c0_i32_18 : i32
    scf.if %37 {
      %c0_19 = arith.constant 0 : index
      %c0_20 = arith.constant 0 : index
      %38 = vector.load %arg9[%c0_19, %c0_20] : memref<16x48xf32, #tpu.memory_space<vmem>>, vector<16x48xf32>
      %c0_21 = arith.constant 0 : index
      %c0_22 = arith.constant 0 : index
      %39 = vector.load %arg5[%c0_21, %c0_22] : memref<1x48xf32, #tpu.memory_space<vmem>>, vector<1x48xf32>
      %40 = vector.broadcast %39 : vector<1x48xf32> to vector<16x48xf32>
      %41 = arith.addf %38, %40 : vector<16x48xf32>
      %42 = arith.truncf %41 : vector<16x48xf32> to vector<16x48xbf16>
      %c0_23 = arith.constant 0 : index
      %c0_24 = arith.constant 0 : index
      %43 = vector.load %arg8[%c0_23, %c0_24] : memref<16x48xbf16, #tpu.memory_space<vmem>>, vector<16x48xbf16>
      tpu.vector_store %arg8[%c0_23, %c0_24], %42 {strides = array<i32>} : memref<16x48xbf16, #tpu.memory_space<vmem>>, vector<16x48xbf16>,
    } else {
    }
    return
  }
  func.func @transform_0(%arg0: i32, %arg1: i32, %arg2: i32) -> (i32, i32) {
    %c0_i32 = arith.constant 0 : i32
    return %arg0, %arg2 : i32, i32
  }
  func.func @transform_1(%arg0: i32, %arg1: i32, %arg2: i32) -> (i32, i32) {
    %c0_i32 = arith.constant 0 : i32
    return %arg2, %arg1 : i32, i32
  }
  func.func @transform_2(%arg0: i32, %arg1: i32, %arg2: i32) -> (i32, i32) {
    %c0_i32 = arith.constant 0 : i32
    %c0_i32_0 = arith.constant 0 : i32
    return %c0_i32, %arg1 : i32, i32
  }
  func.func @transform_3(%arg0: i32, %arg1: i32, %arg2: i32) -> (i32, i32) {
    %c0_i32 = arith.constant 0 : i32
    %c0_i32_0 = arith.constant 0 : i32
    return %c0_i32, %arg2 : i32, i32
  }
  func.func @transform_4(%arg0: i32, %arg1: i32, %arg2: i32) -> (i32, i32) {
    %c0_i32 = arith.constant 0 : i32
    %c0_i32_0 = arith.constant 0 : i32
    return %c0_i32, %arg2 : i32, i32
  }
  func.func @transform_5(%arg0: i32, %arg1: i32, %arg2: i32) -> (i32, i32) {
    %c0_i32 = arith.constant 0 : i32
    return %arg0, %arg1 : i32, i32
  }
}

module attributes {stable_mosaic.version = 11 : i64} {
  func.func @_linear_kernel(%arg0: i32, %arg1: i32, %arg2: i32, %arg3: memref<16x16xbf16, #tpu.memory_space<vmem>>, %arg4: memref<16x32xbf16, #tpu.memory_space<vmem>>, %arg5: memref<1x32xf32, #tpu.memory_space<vmem>>, %arg6: memref<1x16xf32, #tpu.memory_space<vmem>>, %arg7: memref<1x16xf32, #tpu.memory_space<vmem>>, %arg8: memref<16x32xbf16, #tpu.memory_space<vmem>>, %arg9: memref<16x32xbf16, #tpu.memory_space<vmem>>, %arg10: memref<16x32xf32, #tpu.memory_space<vmem>>) attributes {dimension_semantics = [#tpu.dimension_semantics<parallel>, #tpu.dimension_semantics<parallel>, #tpu.dimension_semantics<arbitrary>], iteration_bounds = array<i64: 1, 1, 1>, scalar_prefetch = 0 : i64, scratch_operands = 1 : i64, tpu.core_type = #tpu.core_type<tc>, window_params = [{transform_indices = @transform_0, window_bounds = array<i64: 16, 16>}, {transform_indices = @transform_1, window_bounds = array<i64: 16, 32>}, {transform_indices = @transform_2, window_bounds = array<i64: 1, 32>}, {transform_indices = @transform_3, window_bounds = array<i64: 1, 16>}, {transform_indices = @transform_4, window_bounds = array<i64: 1, 16>}, {transform_indices = @transform_5, window_bounds = array<i64: 16, 32>}, {transform_indices = @transform_6, window_bounds = array<i64: 16, 32>}]} {
    %c0_i32 = arith.constant 0 : i32
    %0 = arith.cmpi eq, %arg2, %c0_i32 : i32
    %1 = arith.extui %0 : i1 to i32
    %c0_i32_0 = arith.constant 0 : i32
    %2 = arith.cmpi ne, %1, %c0_i32_0 : i32
    scf.if %2 {
      %cst_19 = arith.constant 0.000000e+00 : f32
      %38 = vector.broadcast %cst_19 : f32 to vector<16x32xf32>
      %c0_20 = arith.constant 0 : index
      %c0_21 = arith.constant 0 : index
      %39 = vector.load %arg10[%c0_20, %c0_21] : memref<16x32xf32, #tpu.memory_space<vmem>>, vector<16x32xf32>
      tpu.vector_store %arg10[%c0_20, %c0_21], %38 {strides = array<i32>} : memref<16x32xf32, #tpu.memory_space<vmem>>, vector<16x32xf32>,
    } else {
    }
    %c0 = arith.constant 0 : index
    %c0_1 = arith.constant 0 : index
    %3 = vector.load %arg3[%c0, %c0_1] : memref<16x16xbf16, #tpu.memory_space<vmem>>, vector<16x16xbf16>
    %4 = arith.extf %3 : vector<16x16xbf16> to vector<16x16xf32>
    %cst = arith.constant dense<0.000000e+00> : vector<16xf32>
    %5 = vector.multi_reduction <add>, %4, %cst [1] : vector<16x16xf32> to vector<16xf32>
    %6 = vector.shape_cast %5 : vector<16xf32> to vector<16x1xf32>
    %cst_2 = arith.constant 1.600000e+01 : f32
    %7 = vector.broadcast %cst_2 : f32 to vector<16x1xf32>
    %8 = arith.divf %6, %7 : vector<16x1xf32>
    %9 = vector.broadcast %8 : vector<16x1xf32> to vector<16x16xf32>
    %10 = arith.subf %4, %9 : vector<16x16xf32>
    %11 = arith.mulf %10, %10 : vector<16x16xf32>
    %cst_3 = arith.constant dense<0.000000e+00> : vector<16xf32>
    %12 = vector.multi_reduction <add>, %11, %cst_3 [1] : vector<16x16xf32> to vector<16xf32>
    %13 = vector.shape_cast %12 : vector<16xf32> to vector<16x1xf32>
    %cst_4 = arith.constant 1.600000e+01 : f32
    %14 = vector.broadcast %cst_4 : f32 to vector<16x1xf32>
    %15 = arith.divf %13, %14 : vector<16x1xf32>
    %16 = vector.broadcast %8 : vector<16x1xf32> to vector<16x16xf32>
    %17 = arith.subf %4, %16 : vector<16x16xf32>
    %cst_5 = arith.constant 9.99999974E-6 : f32
    %18 = vector.broadcast %cst_5 : f32 to vector<16x1xf32>
    %19 = arith.addf %15, %18 : vector<16x1xf32>
    %20 = math.rsqrt %19 : vector<16x1xf32>
    %21 = vector.broadcast %20 : vector<16x1xf32> to vector<16x16xf32>
    %22 = arith.mulf %17, %21 : vector<16x16xf32>
    %c0_6 = arith.constant 0 : index
    %c0_7 = arith.constant 0 : index
    %23 = vector.load %arg6[%c0_6, %c0_7] : memref<1x16xf32, #tpu.memory_space<vmem>>, vector<1x16xf32>
    %24 = vector.broadcast %23 : vector<1x16xf32> to vector<16x16xf32>
    %25 = arith.mulf %22, %24 : vector<16x16xf32>
    %c0_8 = arith.constant 0 : index
    %c0_9 = arith.constant 0 : index
    %26 = vector.load %arg7[%c0_8, %c0_9] : memref<1x16xf32, #tpu.memory_space<vmem>>, vector<1x16xf32>
    %27 = vector.broadcast %26 : vector<1x16xf32> to vector<16x16xf32>
    %28 = arith.addf %25, %27 : vector<16x16xf32>
    %29 = arith.truncf %28 : vector<16x16xf32> to vector<16x16xbf16>
    %c0_10 = arith.constant 0 : index
    %c0_11 = arith.constant 0 : index
    %30 = vector.load %arg10[%c0_10, %c0_11] : memref<16x32xf32, #tpu.memory_space<vmem>>, vector<16x32xf32>
    %c0_12 = arith.constant 0 : index
    %c0_13 = arith.constant 0 : index
    %31 = vector.load %arg4[%c0_12, %c0_13] : memref<16x32xbf16, #tpu.memory_space<vmem>>, vector<16x32xbf16>
    %cst_14 = arith.constant dense<0.000000e+00> : vector<16x32xf32>
    %32 = tpu.matmul %29, %31, %cst_14 {dimension_numbers = #tpu.dot_dimension_numbers<[1], [0], [0], [1], [0, 0, 1, 1], [], []>} : vector<16x16xbf16>, vector<16x32xbf16>, vector<16x32xf32> -> vector<16x32xf32>
    %33 = arith.addf %30, %32 : vector<16x32xf32>
    %c0_15 = arith.constant 0 : index
    %c0_16 = arith.constant 0 : index
    %34 = vector.load %arg10[%c0_15, %c0_16] : memref<16x32xf32, #tpu.memory_space<vmem>>, vector<16x32xf32>
    tpu.vector_store %arg10[%c0_15, %c0_16], %33 {strides = array<i32>} : memref<16x32xf32, #tpu.memory_space<vmem>>, vector<16x32xf32>,
    %c0_i32_17 = arith.constant 0 : i32
    %35 = arith.cmpi eq, %arg2, %c0_i32_17 : i32
    %36 = arith.extui %35 : i1 to i32
    %c0_i32_18 = arith.constant 0 : i32
    %37 = arith.cmpi ne, %36, %c0_i32_18 : i32
    scf.if %37 {
      %c0_19 = arith.constant 0 : index
      %c0_20 = arith.constant 0 : index
      %38 = vector.load %arg10[%c0_19, %c0_20] : memref<16x32xf32, #tpu.memory_space<vmem>>, vector<16x32xf32>
      %c0_21 = arith.constant 0 : index
      %c0_22 = arith.constant 0 : index
      %39 = vector.load %arg5[%c0_21, %c0_22] : memref<1x32xf32, #tpu.memory_space<vmem>>, vector<1x32xf32>
      %40 = vector.broadcast %39 : vector<1x32xf32> to vector<16x32xf32>
      %41 = arith.addf %38, %40 : vector<16x32xf32>
      %c0_23 = arith.constant 0 : index
      %c0_24 = arith.constant 0 : index
      %42 = vector.load %arg8[%c0_23, %c0_24] : memref<16x32xbf16, #tpu.memory_space<vmem>>, vector<16x32xbf16>
      %43 = arith.extf %42 : vector<16x32xbf16> to vector<16x32xf32>
      %44 = arith.addf %41, %43 : vector<16x32xf32>
      %45 = arith.truncf %44 : vector<16x32xf32> to vector<16x32xbf16>
      %c0_25 = arith.constant 0 : index
      %c0_26 = arith.constant 0 : index
      %46 = vector.load %arg9[%c0_25, %c0_26] : memref<16x32xbf16, #tpu.memory_space<vmem>>, vector<16x32xbf16>
      tpu.vector_store %arg9[%c0_25, %c0_26], %45 {strides = array<i32>} : memref<16x32xbf16, #tpu.memory_space<vmem>>, vector<16x32xbf16>,
    } else {
    }
    return
  }
  func.func @transform_0(%arg0: i32, %arg1: i32, %arg2: i32) -> (i32, i32) {
    %c0_i32 = arith.constant 0 : i32
    return %arg0, %arg2 : i32, i32
  }
  func.func @transform_1(%arg0: i32, %arg1: i32, %arg2: i32) -> (i32, i32) {
    %c0_i32 = arith.constant 0 : i32
    return %arg2, %arg1 : i32, i32
  }
  func.func @transform_2(%arg0: i32, %arg1: i32, %arg2: i32) -> (i32, i32) {
    %c0_i32 = arith.constant 0 : i32
    %c0_i32_0 = arith.constant 0 : i32
    return %c0_i32, %arg1 : i32, i32
  }
  func.func @transform_3(%arg0: i32, %arg1: i32, %arg2: i32) -> (i32, i32) {
    %c0_i32 = arith.constant 0 : i32
    %c0_i32_0 = arith.constant 0 : i32
    return %c0_i32, %arg2 : i32, i32
  }
  func.func @transform_4(%arg0: i32, %arg1: i32, %arg2: i32) -> (i32, i32) {
    %c0_i32 = arith.constant 0 : i32
    %c0_i32_0 = arith.constant 0 : i32
    return %c0_i32, %arg2 : i32, i32
  }
  func.func @transform_5(%arg0: i32, %arg1: i32, %arg2: i32) -> (i32, i32) {
    %c0_i32 = arith.constant 0 : i32
    return %arg0, %arg1 : i32, i32
  }
  func.func @transform_6(%arg0: i32, %arg1: i32, %arg2: i32) -> (i32, i32) {
    %c0_i32 = arith.constant 0 : i32
    return %arg0, %arg1 : i32, i32
  }
}

module attributes {stable_mosaic.version = 11 : i64} {
  func.func @_linear_kernel(%arg0: i32, %arg1: i32, %arg2: i32, %arg3: memref<16x32xbf16, #tpu.memory_space<vmem>>, %arg4: memref<32x64xbf16, #tpu.memory_space<vmem>>, %arg5: memref<1x64xf32, #tpu.memory_space<vmem>>, %arg6: memref<1x32xf32, #tpu.memory_space<vmem>>, %arg7: memref<1x32xf32, #tpu.memory_space<vmem>>, %arg8: memref<16x64xbf16, #tpu.memory_space<vmem>>, %arg9: memref<16x64xf32, #tpu.memory_space<vmem>>) attributes {dimension_semantics = [#tpu.dimension_semantics<parallel>, #tpu.dimension_semantics<parallel>, #tpu.dimension_semantics<arbitrary>], iteration_bounds = array<i64: 1, 1, 1>, scalar_prefetch = 0 : i64, scratch_operands = 1 : i64, tpu.core_type = #tpu.core_type<tc>, window_params = [{transform_indices = @transform_0, window_bounds = array<i64: 16, 32>}, {transform_indices = @transform_1, window_bounds = array<i64: 32, 64>}, {transform_indices = @transform_2, window_bounds = array<i64: 1, 64>}, {transform_indices = @transform_3, window_bounds = array<i64: 1, 32>}, {transform_indices = @transform_4, window_bounds = array<i64: 1, 32>}, {transform_indices = @transform_5, window_bounds = array<i64: 16, 64>}]} {
    %c0_i32 = arith.constant 0 : i32
    %0 = arith.cmpi eq, %arg2, %c0_i32 : i32
    %1 = arith.extui %0 : i1 to i32
    %c0_i32_0 = arith.constant 0 : i32
    %2 = arith.cmpi ne, %1, %c0_i32_0 : i32
    scf.if %2 {
      %cst_19 = arith.constant 0.000000e+00 : f32
      %38 = vector.broadcast %cst_19 : f32 to vector<16x64xf32>
      %c0_20 = arith.constant 0 : index
      %c0_21 = arith.constant 0 : index
      %39 = vector.load %arg9[%c0_20, %c0_21] : memref<16x64xf32, #tpu.memory_space<vmem>>, vector<16x64xf32>
      tpu.vector_store %arg9[%c0_20, %c0_21], %38 {strides = array<i32>} : memref<16x64xf32, #tpu.memory_space<vmem>>, vector<16x64xf32>,
    } else {
    }
    %c0 = arith.constant 0 : index
    %c0_1 = arith.constant 0 : index
    %3 = vector.load %arg3[%c0, %c0_1] : memref<16x32xbf16, #tpu.memory_space<vmem>>, vector<16x32xbf16>
    %4 = arith.extf %3 : vector<16x32xbf16> to vector<16x32xf32>
    %cst = arith.constant dense<0.000000e+00> : vector<16xf32>
    %5 = vector.multi_reduction <add>, %4, %cst [1] : vector<16x32xf32> to vector<16xf32>
    %6 = vector.shape_cast %5 : vector<16xf32> to vector<16x1xf32>
    %cst_2 = arith.constant 3.200000e+01 : f32
    %7 = vector.broadcast %cst_2 : f32 to vector<16x1xf32>
    %8 = arith.divf %6, %7 : vector<16x1xf32>
    %9 = vector.broadcast %8 : vector<16x1xf32> to vector<16x32xf32>
    %10 = arith.subf %4, %9 : vector<16x32xf32>
    %11 = arith.mulf %10, %10 : vector<16x32xf32>
    %cst_3 = arith.constant dense<0.000000e+00> : vector<16xf32>
    %12 = vector.multi_reduction <add>, %11, %cst_3 [1] : vector<16x32xf32> to vector<16xf32>
    %13 = vector.shape_cast %12 : vector<16xf32> to vector<16x1xf32>
    %cst_4 = arith.constant 3.200000e+01 : f32
    %14 = vector.broadcast %cst_4 : f32 to vector<16x1xf32>
    %15 = arith.divf %13, %14 : vector<16x1xf32>
    %16 = vector.broadcast %8 : vector<16x1xf32> to vector<16x32xf32>
    %17 = arith.subf %4, %16 : vector<16x32xf32>
    %cst_5 = arith.constant 9.99999974E-6 : f32
    %18 = vector.broadcast %cst_5 : f32 to vector<16x1xf32>
    %19 = arith.addf %15, %18 : vector<16x1xf32>
    %20 = math.rsqrt %19 : vector<16x1xf32>
    %21 = vector.broadcast %20 : vector<16x1xf32> to vector<16x32xf32>
    %22 = arith.mulf %17, %21 : vector<16x32xf32>
    %c0_6 = arith.constant 0 : index
    %c0_7 = arith.constant 0 : index
    %23 = vector.load %arg6[%c0_6, %c0_7] : memref<1x32xf32, #tpu.memory_space<vmem>>, vector<1x32xf32>
    %24 = vector.broadcast %23 : vector<1x32xf32> to vector<16x32xf32>
    %25 = arith.mulf %22, %24 : vector<16x32xf32>
    %c0_8 = arith.constant 0 : index
    %c0_9 = arith.constant 0 : index
    %26 = vector.load %arg7[%c0_8, %c0_9] : memref<1x32xf32, #tpu.memory_space<vmem>>, vector<1x32xf32>
    %27 = vector.broadcast %26 : vector<1x32xf32> to vector<16x32xf32>
    %28 = arith.addf %25, %27 : vector<16x32xf32>
    %29 = arith.truncf %28 : vector<16x32xf32> to vector<16x32xbf16>
    %c0_10 = arith.constant 0 : index
    %c0_11 = arith.constant 0 : index
    %30 = vector.load %arg9[%c0_10, %c0_11] : memref<16x64xf32, #tpu.memory_space<vmem>>, vector<16x64xf32>
    %c0_12 = arith.constant 0 : index
    %c0_13 = arith.constant 0 : index
    %31 = vector.load %arg4[%c0_12, %c0_13] : memref<32x64xbf16, #tpu.memory_space<vmem>>, vector<32x64xbf16>
    %cst_14 = arith.constant dense<0.000000e+00> : vector<16x64xf32>
    %32 = tpu.matmul %29, %31, %cst_14 {dimension_numbers = #tpu.dot_dimension_numbers<[1], [0], [0], [1], [0, 0, 1, 1], [], []>} : vector<16x32xbf16>, vector<32x64xbf16>, vector<16x64xf32> -> vector<16x64xf32>
    %33 = arith.addf %30, %32 : vector<16x64xf32>
    %c0_15 = arith.constant 0 : index
    %c0_16 = arith.constant 0 : index
    %34 = vector.load %arg9[%c0_15, %c0_16] : memref<16x64xf32, #tpu.memory_space<vmem>>, vector<16x64xf32>
    tpu.vector_store %arg9[%c0_15, %c0_16], %33 {strides = array<i32>} : memref<16x64xf32, #tpu.memory_space<vmem>>, vector<16x64xf32>,
    %c0_i32_17 = arith.constant 0 : i32
    %35 = arith.cmpi eq, %arg2, %c0_i32_17 : i32
    %36 = arith.extui %35 : i1 to i32
    %c0_i32_18 = arith.constant 0 : i32
    %37 = arith.cmpi ne, %36, %c0_i32_18 : i32
    scf.if %37 {
      %c0_19 = arith.constant 0 : index
      %c0_20 = arith.constant 0 : index
      %38 = vector.load %arg9[%c0_19, %c0_20] : memref<16x64xf32, #tpu.memory_space<vmem>>, vector<16x64xf32>
      %c0_21 = arith.constant 0 : index
      %c0_22 = arith.constant 0 : index
      %39 = vector.load %arg5[%c0_21, %c0_22] : memref<1x64xf32, #tpu.memory_space<vmem>>, vector<1x64xf32>
      %40 = vector.broadcast %39 : vector<1x64xf32> to vector<16x64xf32>
      %41 = arith.addf %38, %40 : vector<16x64xf32>
      %cst_23 = arith.constant 0.000000e+00 : f32
      %42 = vector.broadcast %cst_23 : f32 to vector<16x64xf32>
      %43 = arith.maximumf %41, %42 : vector<16x64xf32>
      %44 = arith.truncf %43 : vector<16x64xf32> to vector<16x64xbf16>
      %c0_24 = arith.constant 0 : index
      %c0_25 = arith.constant 0 : index
      %45 = vector.load %arg8[%c0_24, %c0_25] : memref<16x64xbf16, #tpu.memory_space<vmem>>, vector<16x64xbf16>
      tpu.vector_store %arg8[%c0_24, %c0_25], %44 {strides = array<i32>} : memref<16x64xbf16, #tpu.memory_space<vmem>>, vector<16x64xbf16>,
    } else {
    }
    return
  }
  func.func @transform_0(%arg0: i32, %arg1: i32, %arg2: i32) -> (i32, i32) {
    %c0_i32 = arith.constant 0 : i32
    return %arg0, %arg2 : i32, i32
  }
  func.func @transform_1(%arg0: i32, %arg1: i32, %arg2: i32) -> (i32, i32) {
    %c0_i32 = arith.constant 0 : i32
    return %arg2, %arg1 : i32, i32
  }
  func.func @transform_2(%arg0: i32, %arg1: i32, %arg2: i32) -> (i32, i32) {
    %c0_i32 = arith.constant 0 : i32
    %c0_i32_0 = arith.constant 0 : i32
    return %c0_i32, %arg1 : i32, i32
  }
  func.func @transform_3(%arg0: i32, %arg1: i32, %arg2: i32) -> (i32, i32) {
    %c0_i32 = arith.constant 0 : i32
    %c0_i32_0 = arith.constant 0 : i32
    return %c0_i32, %arg2 : i32, i32
  }
  func.func @transform_4(%arg0: i32, %arg1: i32, %arg2: i32) -> (i32, i32) {
    %c0_i32 = arith.constant 0 : i32
    %c0_i32_0 = arith.constant 0 : i32
    return %c0_i32, %arg2 : i32, i32
  }
  func.func @transform_5(%arg0: i32, %arg1: i32, %arg2: i32) -> (i32, i32) {
    %c0_i32 = arith.constant 0 : i32
    return %arg0, %arg1 : i32, i32
  }
}

module attributes {stable_mosaic.version = 11 : i64} {
  func.func @_linear_kernel(%arg0: i32, %arg1: i32, %arg2: i32, %arg3: memref<16x64xbf16, #tpu.memory_space<vmem>>, %arg4: memref<64x32xbf16, #tpu.memory_space<vmem>>, %arg5: memref<1x32xf32, #tpu.memory_space<vmem>>, %arg6: memref<1x64xf32, #tpu.memory_space<vmem>>, %arg7: memref<1x64xf32, #tpu.memory_space<vmem>>, %arg8: memref<16x32xbf16, #tpu.memory_space<vmem>>, %arg9: memref<16x32xbf16, #tpu.memory_space<vmem>>, %arg10: memref<16x32xf32, #tpu.memory_space<vmem>>) attributes {dimension_semantics = [#tpu.dimension_semantics<parallel>, #tpu.dimension_semantics<parallel>, #tpu.dimension_semantics<arbitrary>], iteration_bounds = array<i64: 1, 1, 1>, scalar_prefetch = 0 : i64, scratch_operands = 1 : i64, tpu.core_type = #tpu.core_type<tc>, window_params = [{transform_indices = @transform_0, window_bounds = array<i64: 16, 64>}, {transform_indices = @transform_1, window_bounds = array<i64: 64, 32>}, {transform_indices = @transform_2, window_bounds = array<i64: 1, 32>}, {transform_indices = @transform_3, window_bounds = array<i64: 1, 64>}, {transform_indices = @transform_4, window_bounds = array<i64: 1, 64>}, {transform_indices = @transform_5, window_bounds = array<i64: 16, 32>}, {transform_indices = @transform_6, window_bounds = array<i64: 16, 32>}]} {
    %c0_i32 = arith.constant 0 : i32
    %0 = arith.cmpi eq, %arg2, %c0_i32 : i32
    %1 = arith.extui %0 : i1 to i32
    %c0_i32_0 = arith.constant 0 : i32
    %2 = arith.cmpi ne, %1, %c0_i32_0 : i32
    scf.if %2 {
      %cst_19 = arith.constant 0.000000e+00 : f32
      %38 = vector.broadcast %cst_19 : f32 to vector<16x32xf32>
      %c0_20 = arith.constant 0 : index
      %c0_21 = arith.constant 0 : index
      %39 = vector.load %arg10[%c0_20, %c0_21] : memref<16x32xf32, #tpu.memory_space<vmem>>, vector<16x32xf32>
      tpu.vector_store %arg10[%c0_20, %c0_21], %38 {strides = array<i32>} : memref<16x32xf32, #tpu.memory_space<vmem>>, vector<16x32xf32>,
    } else {
    }
    %c0 = arith.constant 0 : index
    %c0_1 = arith.constant 0 : index
    %3 = vector.load %arg3[%c0, %c0_1] : memref<16x64xbf16, #tpu.memory_space<vmem>>, vector<16x64xbf16>
    %4 = arith.extf %3 : vector<16x64xbf16> to vector<16x64xf32>
    %cst = arith.constant dense<0.000000e+00> : vector<16xf32>
    %5 = vector.multi_reduction <add>, %4, %cst [1] : vector<16x64xf32> to vector<16xf32>
    %6 = vector.shape_cast %5 : vector<16xf32> to vector<16x1xf32>
    %cst_2 = arith.constant 6.400000e+01 : f32
    %7 = vector.broadcast %cst_2 : f32 to vector<16x1xf32>
    %8 = arith.divf %6, %7 : vector<16x1xf32>
    %9 = vector.broadcast %8 : vector<16x1xf32> to vector<16x64xf32>
    %10 = arith.subf %4, %9 : vector<16x64xf32>
    %11 = arith.mulf %10, %10 : vector<16x64xf32>
    %cst_3 = arith.constant dense<0.000000e+00> : vector<16xf32>
    %12 = vector.multi_reduction <add>, %11, %cst_3 [1] : vector<16x64xf32> to vector<16xf32>
    %13 = vector.shape_cast %12 : vector<16xf32> to vector<16x1xf32>
    %cst_4 = arith.constant 6.400000e+01 : f32
    %14 = vector.broadcast %cst_4 : f32 to vector<16x1xf32>
    %15 = arith.divf %13, %14 : vector<16x1xf32>
    %16 = vector.broadcast %8 : vector<16x1xf32> to vector<16x64xf32>
    %17 = arith.subf %4, %16 : vector<16x64xf32>
    %cst_5 = arith.constant 9.99999974E-6 : f32
    %18 = vector.broadcast %cst_5 : f32 to vector<16x1xf32>
    %19 = arith.addf %15, %18 : vector<16x1xf32>
    %20 = math.rsqrt %19 : vector<16x1xf32>
    %21 = vector.broadcast %20 : vector<16x1xf32> to vector<16x64xf32>
    %22 = arith.mulf %17, %21 : vector<16x64xf32>
    %c0_6 = arith.constant 0 : index
    %c0_7 = arith.constant 0 : index
    %23 = vector.load %arg6[%c0_6, %c0_7] : memref<1x64xf32, #tpu.memory_space<vmem>>, vector<1x64xf32>
    %24 = vector.broadcast %23 : vector<1x64xf32> to vector<16x64xf32>
    %25 = arith.mulf %22, %24 : vector<16x64xf32>
    %c0_8 = arith.constant 0 : index
    %c0_9 = arith.constant 0 : index
    %26 = vector.load %arg7[%c0_8, %c0_9] : memref<1x64xf32, #tpu.memory_space<vmem>>, vector<1x64xf32>
    %27 = vector.broadcast %26 : vector<1x64xf32> to vector<16x64xf32>
    %28 = arith.addf %25, %27 : vector<16x64xf32>
    %29 = arith.truncf %28 : vector<16x64xf32> to vector<16x64xbf16>
    %c0_10 = arith.constant 0 : index
    %c0_11 = arith.constant 0 : index
    %30 = vector.load %arg10[%c0_10, %c0_11] : memref<16x32xf32, #tpu.memory_space<vmem>>, vector<16x32xf32>
    %c0_12 = arith.constant 0 : index
    %c0_13 = arith.constant 0 : index
    %31 = vector.load %arg4[%c0_12, %c0_13] : memref<64x32xbf16, #tpu.memory_space<vmem>>, vector<64x32xbf16>
    %cst_14 = arith.constant dense<0.000000e+00> : vector<16x32xf32>
    %32 = tpu.matmul %29, %31, %cst_14 {dimension_numbers = #tpu.dot_dimension_numbers<[1], [0], [0], [1], [0, 0, 1, 1], [], []>} : vector<16x64xbf16>, vector<64x32xbf16>, vector<16x32xf32> -> vector<16x32xf32>
    %33 = arith.addf %30, %32 : vector<16x32xf32>
    %c0_15 = arith.constant 0 : index
    %c0_16 = arith.constant 0 : index
    %34 = vector.load %arg10[%c0_15, %c0_16] : memref<16x32xf32, #tpu.memory_space<vmem>>, vector<16x32xf32>
    tpu.vector_store %arg10[%c0_15, %c0_16], %33 {strides = array<i32>} : memref<16x32xf32, #tpu.memory_space<vmem>>, vector<16x32xf32>,
    %c0_i32_17 = arith.constant 0 : i32
    %35 = arith.cmpi eq, %arg2, %c0_i32_17 : i32
    %36 = arith.extui %35 : i1 to i32
    %c0_i32_18 = arith.constant 0 : i32
    %37 = arith.cmpi ne, %36, %c0_i32_18 : i32
    scf.if %37 {
      %c0_19 = arith.constant 0 : index
      %c0_20 = arith.constant 0 : index
      %38 = vector.load %arg10[%c0_19, %c0_20] : memref<16x32xf32, #tpu.memory_space<vmem>>, vector<16x32xf32>
      %c0_21 = arith.constant 0 : index
      %c0_22 = arith.constant 0 : index
      %39 = vector.load %arg5[%c0_21, %c0_22] : memref<1x32xf32, #tpu.memory_space<vmem>>, vector<1x32xf32>
      %40 = vector.broadcast %39 : vector<1x32xf32> to vector<16x32xf32>
      %41 = arith.addf %38, %40 : vector<16x32xf32>
      %c0_23 = arith.constant 0 : index
      %c0_24 = arith.constant 0 : index
      %42 = vector.load %arg8[%c0_23, %c0_24] : memref<16x32xbf16, #tpu.memory_space<vmem>>, vector<16x32xbf16>
      %43 = arith.extf %42 : vector<16x32xbf16> to vector<16x32xf32>
      %44 = arith.addf %41, %43 : vector<16x32xf32>
      %45 = arith.truncf %44 : vector<16x32xf32> to vector<16x32xbf16>
      %c0_25 = arith.constant 0 : index
      %c0_26 = arith.constant 0 : index
      %46 = vector.load %arg9[%c0_25, %c0_26] : memref<16x32xbf16, #tpu.memory_space<vmem>>, vector<16x32xbf16>
      tpu.vector_store %arg9[%c0_25, %c0_26], %45 {strides = array<i32>} : memref<16x32xbf16, #tpu.memory_space<vmem>>, vector<16x32xbf16>,
    } else {
    }
    return
  }
  func.func @transform_0(%arg0: i32, %arg1: i32, %arg2: i32) -> (i32, i32) {
    %c0_i32 = arith.constant 0 : i32
    return %arg0, %arg2 : i32, i32
  }
  func.func @transform_1(%arg0: i32, %arg1: i32, %arg2: i32) -> (i32, i32) {
    %c0_i32 = arith.constant 0 : i32
    return %arg2, %arg1 : i32, i32
  }
  func.func @transform_2(%arg0: i32, %arg1: i32, %arg2: i32) -> (i32, i32) {
    %c0_i32 = arith.constant 0 : i32
    %c0_i32_0 = arith.constant 0 : i32
    return %c0_i32, %arg1 : i32, i32
  }
  func.func @transform_3(%arg0: i32, %arg1: i32, %arg2: i32) -> (i32, i32) {
    %c0_i32 = arith.constant 0 : i32
    %c0_i32_0 = arith.constant 0 : i32
    return %c0_i32, %arg2 : i32, i32
  }
  func.func @transform_4(%arg0: i32, %arg1: i32, %arg2: i32) -> (i32, i32) {
    %c0_i32 = arith.constant 0 : i32
    %c0_i32_0 = arith.constant 0 : i32
    return %c0_i32, %arg2 : i32, i32
  }
  func.func @transform_5(%arg0: i32, %arg1: i32, %arg2: i32) -> (i32, i32) {
    %c0_i32 = arith.constant 0 : i32
    return %arg0, %arg1 : i32, i32
  }
  func.func @transform_6(%arg0: i32, %arg1: i32, %arg2: i32) -> (i32, i32) {
    %c0_i32 = arith.constant 0 : i32
    return %arg0, %arg1 : i32, i32
  }
}

module attributes {stable_mosaic.version = 11 : i64} {
  func.func @_linear_kernel(%arg0: i32, %arg1: i32, %arg2: i32, %arg3: memref<16x32xbf16, #tpu.memory_space<vmem>>, %arg4: memref<32x32xbf16, #tpu.memory_space<vmem>>, %arg5: memref<1x32xf32, #tpu.memory_space<vmem>>, %arg6: memref<16x32xbf16, #tpu.memory_space<vmem>>, %arg7: memref<16x32xf32, #tpu.memory_space<vmem>>) attributes {dimension_semantics = [#tpu.dimension_semantics<parallel>, #tpu.dimension_semantics<parallel>, #tpu.dimension_semantics<arbitrary>], iteration_bounds = array<i64: 1, 1, 1>, scalar_prefetch = 0 : i64, scratch_operands = 1 : i64, tpu.core_type = #tpu.core_type<tc>, window_params = [{transform_indices = @transform_0, window_bounds = array<i64: 16, 32>}, {transform_indices = @transform_1, window_bounds = array<i64: 32, 32>}, {transform_indices = @transform_2, window_bounds = array<i64: 1, 32>}, {transform_indices = @transform_3, window_bounds = array<i64: 16, 32>}]} {
    %c0_i32 = arith.constant 0 : i32
    %0 = arith.cmpi eq, %arg2, %c0_i32 : i32
    %1 = arith.extui %0 : i1 to i32
    %c0_i32_0 = arith.constant 0 : i32
    %2 = arith.cmpi ne, %1, %c0_i32_0 : i32
    scf.if %2 {
      %cst_10 = arith.constant 0.000000e+00 : f32
      %12 = vector.broadcast %cst_10 : f32 to vector<16x32xf32>
      %c0_11 = arith.constant 0 : index
      %c0_12 = arith.constant 0 : index
      %13 = vector.load %arg7[%c0_11, %c0_12] : memref<16x32xf32, #tpu.memory_space<vmem>>, vector<16x32xf32>
      tpu.vector_store %arg7[%c0_11, %c0_12], %12 {strides = array<i32>} : memref<16x32xf32, #tpu.memory_space<vmem>>, vector<16x32xf32>,
    } else {
    }
    %c0 = arith.constant 0 : index
    %c0_1 = arith.constant 0 : index
    %3 = vector.load %arg3[%c0, %c0_1] : memref<16x32xbf16, #tpu.memory_space<vmem>>, vector<16x32xbf16>
    %c0_2 = arith.constant 0 : index
    %c0_3 = arith.constant 0 : index
    %4 = vector.load %arg7[%c0_2, %c0_3] : memref<16x32xf32, #tpu.memory_space<vmem>>, vector<16x32xf32>
    %c0_4 = arith.constant 0 : index
    %c0_5 = arith.constant 0 : index
    %5 = vector.load %arg4[%c0_4, %c0_5] : memref<32x32xbf16, #tpu.memory_space<vmem>>, vector<32x32xbf16>
    %cst = arith.constant dense<0.000000e+00> : vector<16x32xf32>
    %6 = tpu.matmul %3, %5, %cst {dimension_numbers = #tpu.dot_dimension_numbers<[1], [0], [0], [1], [0, 0, 1, 1], [], []>} : vector<16x32xbf16>, vector<32x32xbf16>, vector<16x32xf32> -> vector<16x32xf32>
    %7 = arith.addf %4, %6 : vector<16x32xf32>
    %c0_6 = arith.constant 0 : index
    %c0_7 = arith.constant 0 : index
    %8 = vector.load %arg7[%c0_6, %c0_7] : memref<16x32xf32, #tpu.memory_space<vmem>>, vector<16x32xf32>
    tpu.vector_store %arg7[%c0_6, %c0_7], %7 {strides = array<i32>} : memref<16x32xf32, #tpu.memory_space<vmem>>, vector<16x32xf32>,
    %c0_i32_8 = arith.constant 0 : i32
    %9 = arith.cmpi eq, %arg2, %c0_i32_8 : i32
    %10 = arith.extui %9 : i1 to i32
    %c0_i32_9 = arith.constant 0 : i32
    %11 = arith.cmpi ne, %10, %c0_i32_9 : i32
    scf.if %11 {
      %c0_10 = arith.constant 0 : index
      %c0_11 = arith.constant 0 : index
      %12 = vector.load %arg7[%c0_10, %c0_11] : memref<16x32xf32, #tpu.memory_space<vmem>>, vector<16x32xf32>
      %c0_12 = arith.constant 0 : index
      %c0_13 = arith.constant 0 : index
      %13 = vector.load %arg5[%c0_12, %c0_13] : memref<1x32xf32, #tpu.memory_space<vmem>>, vector<1x32xf32>
      %14 = vector.broadcast %13 : vector<1x32xf32> to vector<16x32xf32>
      %15 = arith.addf %12, %14 : vector<16x32xf32>
      %16 = arith.truncf %15 : vector<16x32xf32> to vector<16x32xbf16>
      %c0_14 = arith.constant 0 : index
      %c0_15 = arith.constant 0 : index
      %17 = vector.load %arg6[%c0_14, %c0_15] : memref<16x32xbf16, #tpu.memory_space<vmem>>, vector<16x32xbf16>
      tpu.vector_store %arg6[%c0_14, %c0_15], %16 {strides = array<i32>} : memref<16x32xbf16, #tpu.memory_space<vmem>>, vector<16x32xbf16>,
    } else {
    }
    return
  }
  func.func @transform_0(%arg0: i32, %arg1: i32, %arg2: i32) -> (i32, i32) {
    %c0_i32 = arith.constant 0 : i32
    return %arg0, %arg2 : i32, i32
  }
  func.func @transform_1(%arg0: i32, %arg1: i32, %arg2: i32) -> (i32, i32) {
    %c0_i32 = arith.constant 0 : i32
    return %arg2, %arg1 : i32, i32
  }
  func.func @transform_2(%arg0: i32, %arg1: i32, %arg2: i32) -> (i32, i32) {
    %c0_i32 = arith.constant 0 : i32
    %c0_i32_0 = arith.constant 0 : i32
    return %c0_i32, %arg1 : i32, i32
  }
  func.func @transform_3(%arg0: i32, %arg1: i32, %arg2: i32) -> (i32, i32) {
    %c0_i32 = arith.constant 0 : i32
    return %arg0, %arg1 : i32, i32
  }
}

module attributes {stable_mosaic.version = 11 : i64} {
  func.func @_linear_kernel(%arg0: i32, %arg1: i32, %arg2: i32, %arg3: memref<16x16xbf16, #tpu.memory_space<vmem>>, %arg4: memref<16x32xbf16, #tpu.memory_space<vmem>>, %arg5: memref<1x32xf32, #tpu.memory_space<vmem>>, %arg6: memref<16x32xbf16, #tpu.memory_space<vmem>>, %arg7: memref<16x32xbf16, #tpu.memory_space<vmem>>, %arg8: memref<16x32xf32, #tpu.memory_space<vmem>>) attributes {dimension_semantics = [#tpu.dimension_semantics<parallel>, #tpu.dimension_semantics<parallel>, #tpu.dimension_semantics<arbitrary>], iteration_bounds = array<i64: 1, 1, 1>, scalar_prefetch = 0 : i64, scratch_operands = 1 : i64, tpu.core_type = #tpu.core_type<tc>, window_params = [{transform_indices = @transform_0, window_bounds = array<i64: 16, 16>}, {transform_indices = @transform_1, window_bounds = array<i64: 16, 32>}, {transform_indices = @transform_2, window_bounds = array<i64: 1, 32>}, {transform_indices = @transform_3, window_bounds = array<i64: 16, 32>}, {transform_indices = @transform_4, window_bounds = array<i64: 16, 32>}]} {
    %c0_i32 = arith.constant 0 : i32
    %0 = arith.cmpi eq, %arg2, %c0_i32 : i32
    %1 = arith.extui %0 : i1 to i32
    %c0_i32_0 = arith.constant 0 : i32
    %2 = arith.cmpi ne, %1, %c0_i32_0 : i32
    scf.if %2 {
      %cst_10 = arith.constant 0.000000e+00 : f32
      %12 = vector.broadcast %cst_10 : f32 to vector<16x32xf32>
      %c0_11 = arith.constant 0 : index
      %c0_12 = arith.constant 0 : index
      %13 = vector.load %arg8[%c0_11, %c0_12] : memref<16x32xf32, #tpu.memory_space<vmem>>, vector<16x32xf32>
      tpu.vector_store %arg8[%c0_11, %c0_12], %12 {strides = array<i32>} : memref<16x32xf32, #tpu.memory_space<vmem>>, vector<16x32xf32>,
    } else {
    }
    %c0 = arith.constant 0 : index
    %c0_1 = arith.constant 0 : index
    %3 = vector.load %arg3[%c0, %c0_1] : memref<16x16xbf16, #tpu.memory_space<vmem>>, vector<16x16xbf16>
    %c0_2 = arith.constant 0 : index
    %c0_3 = arith.constant 0 : index
    %4 = vector.load %arg8[%c0_2, %c0_3] : memref<16x32xf32, #tpu.memory_space<vmem>>, vector<16x32xf32>
    %c0_4 = arith.constant 0 : index
    %c0_5 = arith.constant 0 : index
    %5 = vector.load %arg4[%c0_4, %c0_5] : memref<16x32xbf16, #tpu.memory_space<vmem>>, vector<16x32xbf16>
    %cst = arith.constant dense<0.000000e+00> : vector<16x32xf32>
    %6 = tpu.matmul %3, %5, %cst {dimension_numbers = #tpu.dot_dimension_numbers<[1], [0], [0], [1], [0, 0, 1, 1], [], []>} : vector<16x16xbf16>, vector<16x32xbf16>, vector<16x32xf32> -> vector<16x32xf32>
    %7 = arith.addf %4, %6 : vector<16x32xf32>
    %c0_6 = arith.constant 0 : index
    %c0_7 = arith.constant 0 : index
    %8 = vector.load %arg8[%c0_6, %c0_7] : memref<16x32xf32, #tpu.memory_space<vmem>>, vector<16x32xf32>
    tpu.vector_store %arg8[%c0_6, %c0_7], %7 {strides = array<i32>} : memref<16x32xf32, #tpu.memory_space<vmem>>, vector<16x32xf32>,
    %c0_i32_8 = arith.constant 0 : i32
    %9 = arith.cmpi eq, %arg2, %c0_i32_8 : i32
    %10 = arith.extui %9 : i1 to i32
    %c0_i32_9 = arith.constant 0 : i32
    %11 = arith.cmpi ne, %10, %c0_i32_9 : i32
    scf.if %11 {
      %c0_10 = arith.constant 0 : index
      %c0_11 = arith.constant 0 : index
      %12 = vector.load %arg8[%c0_10, %c0_11] : memref<16x32xf32, #tpu.memory_space<vmem>>, vector<16x32xf32>
      %c0_12 = arith.constant 0 : index
      %c0_13 = arith.constant 0 : index
      %13 = vector.load %arg5[%c0_12, %c0_13] : memref<1x32xf32, #tpu.memory_space<vmem>>, vector<1x32xf32>
      %14 = vector.broadcast %13 : vector<1x32xf32> to vector<16x32xf32>
      %15 = arith.addf %12, %14 : vector<16x32xf32>
      %c0_14 = arith.constant 0 : index
      %c0_15 = arith.constant 0 : index
      %16 = vector.load %arg6[%c0_14, %c0_15] : memref<16x32xbf16, #tpu.memory_space<vmem>>, vector<16x32xbf16>
      %17 = arith.extf %16 : vector<16x32xbf16> to vector<16x32xf32>
      %18 = arith.addf %15, %17 : vector<16x32xf32>
      %19 = arith.truncf %18 : vector<16x32xf32> to vector<16x32xbf16>
      %c0_16 = arith.constant 0 : index
      %c0_17 = arith.constant 0 : index
      %20 = vector.load %arg7[%c0_16, %c0_17] : memref<16x32xbf16, #tpu.memory_space<vmem>>, vector<16x32xbf16>
      tpu.vector_store %arg7[%c0_16, %c0_17], %19 {strides = array<i32>} : memref<16x32xbf16, #tpu.memory_space<vmem>>, vector<16x32xbf16>,
    } else {
    }
    return
  }
  func.func @transform_0(%arg0: i32, %arg1: i32, %arg2: i32) -> (i32, i32) {
    %c0_i32 = arith.constant 0 : i32
    return %arg0, %arg2 : i32, i32
  }
  func.func @transform_1(%arg0: i32, %arg1: i32, %arg2: i32) -> (i32, i32) {
    %c0_i32 = arith.constant 0 : i32
    return %arg2, %arg1 : i32, i32
  }
  func.func @transform_2(%arg0: i32, %arg1: i32, %arg2: i32) -> (i32, i32) {
    %c0_i32 = arith.constant 0 : i32
    %c0_i32_0 = arith.constant 0 : i32
    return %c0_i32, %arg1 : i32, i32
  }
  func.func @transform_3(%arg0: i32, %arg1: i32, %arg2: i32) -> (i32, i32) {
    %c0_i32 = arith.constant 0 : i32
    return %arg0, %arg1 : i32, i32
  }
  func.func @transform_4(%arg0: i32, %arg1: i32, %arg2: i32) -> (i32, i32) {
    %c0_i32 = arith.constant 0 : i32
    return %arg0, %arg1 : i32, i32
  }
}

module attributes {stable_mosaic.version = 11 : i64} {
  func.func @_linear_kernel(%arg0: i32, %arg1: i32, %arg2: i32, %arg3: memref<16x32xbf16, #tpu.memory_space<vmem>>, %arg4: memref<32x16xbf16, #tpu.memory_space<vmem>>, %arg5: memref<1x16xf32, #tpu.memory_space<vmem>>, %arg6: memref<1x32xf32, #tpu.memory_space<vmem>>, %arg7: memref<1x32xf32, #tpu.memory_space<vmem>>, %arg8: memref<16x16xbf16, #tpu.memory_space<vmem>>, %arg9: memref<16x16xf32, #tpu.memory_space<vmem>>) attributes {dimension_semantics = [#tpu.dimension_semantics<parallel>, #tpu.dimension_semantics<parallel>, #tpu.dimension_semantics<arbitrary>], iteration_bounds = array<i64: 1, 1, 1>, scalar_prefetch = 0 : i64, scratch_operands = 1 : i64, tpu.core_type = #tpu.core_type<tc>, window_params = [{transform_indices = @transform_0, window_bounds = array<i64: 16, 32>}, {transform_indices = @transform_1, window_bounds = array<i64: 32, 16>}, {transform_indices = @transform_2, window_bounds = array<i64: 1, 16>}, {transform_indices = @transform_3, window_bounds = array<i64: 1, 32>}, {transform_indices = @transform_4, window_bounds = array<i64: 1, 32>}, {transform_indices = @transform_5, window_bounds = array<i64: 16, 16>}]} {
    %c0_i32 = arith.constant 0 : i32
    %0 = arith.cmpi eq, %arg2, %c0_i32 : i32
    %1 = arith.extui %0 : i1 to i32
    %c0_i32_0 = arith.constant 0 : i32
    %2 = arith.cmpi ne, %1, %c0_i32_0 : i32
    scf.if %2 {
      %cst_19 = arith.constant 0.000000e+00 : f32
      %38 = vector.broadcast %cst_19 : f32 to vector<16x16xf32>
      %c0_20 = arith.constant 0 : index
      %c0_21 = arith.constant 0 : index
      %39 = vector.load %arg9[%c0_20, %c0_21] : memref<16x16xf32, #tpu.memory_space<vmem>>, vector<16x16xf32>
      tpu.vector_store %arg9[%c0_20, %c0_21], %38 {strides = array<i32>} : memref<16x16xf32, #tpu.memory_space<vmem>>, vector<16x16xf32>,
    } else {
    }
    %c0 = arith.constant 0 : index
    %c0_1 = arith.constant 0 : index
    %3 = vector.load %arg3[%c0, %c0_1] : memref<16x32xbf16, #tpu.memory_space<vmem>>, vector<16x32xbf16>
    %4 = arith.extf %3 : vector<16x32xbf16> to vector<16x32xf32>
    %cst = arith.constant dense<0.000000e+00> : vector<16xf32>
    %5 = vector.multi_reduction <add>, %4, %cst [1] : vector<16x32xf32> to vector<16xf32>
    %6 = vector.shape_cast %5 : vector<16xf32> to vector<16x1xf32>
    %cst_2 = arith.constant 3.200000e+01 : f32
    %7 = vector.broadcast %cst_2 : f32 to vector<16x1xf32>
    %8 = arith.divf %6, %7 : vector<16x1xf32>
    %9 = vector.broadcast %8 : vector<16x1xf32> to vector<16x32xf32>
    %10 = arith.subf %4, %9 : vector<16x32xf32>
    %11 = arith.mulf %10, %10 : vector<16x32xf32>
    %cst_3 = arith.constant dense<0.000000e+00> : vector<16xf32>
    %12 = vector.multi_reduction <add>, %11, %cst_3 [1] : vector<16x32xf32> to vector<16xf32>
    %13 = vector.shape_cast %12 : vector<16xf32> to vector<16x1xf32>
    %cst_4 = arith.constant 3.200000e+01 : f32
    %14 = vector.broadcast %cst_4 : f32 to vector<16x1xf32>
    %15 = arith.divf %13, %14 : vector<16x1xf32>
    %16 = vector.broadcast %8 : vector<16x1xf32> to vector<16x32xf32>
    %17 = arith.subf %4, %16 : vector<16x32xf32>
    %cst_5 = arith.constant 9.99999974E-6 : f32
    %18 = vector.broadcast %cst_5 : f32 to vector<16x1xf32>
    %19 = arith.addf %15, %18 : vector<16x1xf32>
    %20 = math.rsqrt %19 : vector<16x1xf32>
    %21 = vector.broadcast %20 : vector<16x1xf32> to vector<16x32xf32>
    %22 = arith.mulf %17, %21 : vector<16x32xf32>
    %c0_6 = arith.constant 0 : index
    %c0_7 = arith.constant 0 : index
    %23 = vector.load %arg6[%c0_6, %c0_7] : memref<1x32xf32, #tpu.memory_space<vmem>>, vector<1x32xf32>
    %24 = vector.broadcast %23 : vector<1x32xf32> to vector<16x32xf32>
    %25 = arith.mulf %22, %24 : vector<16x32xf32>
    %c0_8 = arith.constant 0 : index
    %c0_9 = arith.constant 0 : index
    %26 = vector.load %arg7[%c0_8, %c0_9] : memref<1x32xf32, #tpu.memory_space<vmem>>, vector<1x32xf32>
    %27 = vector.broadcast %26 : vector<1x32xf32> to vector<16x32xf32>
    %28 = arith.addf %25, %27 : vector<16x32xf32>
    %29 = arith.truncf %28 : vector<16x32xf32> to vector<16x32xbf16>
    %c0_10 = arith.constant 0 : index
    %c0_11 = arith.constant 0 : index
    %30 = vector.load %arg9[%c0_10, %c0_11] : memref<16x16xf32, #tpu.memory_space<vmem>>, vector<16x16xf32>
    %c0_12 = arith.constant 0 : index
    %c0_13 = arith.constant 0 : index
    %31 = vector.load %arg4[%c0_12, %c0_13] : memref<32x16xbf16, #tpu.memory_space<vmem>>, vector<32x16xbf16>
    %cst_14 = arith.constant dense<0.000000e+00> : vector<16x16xf32>
    %32 = tpu.matmul %29, %31, %cst_14 {dimension_numbers = #tpu.dot_dimension_numbers<[1], [0], [0], [1], [0, 0, 1, 1], [], []>} : vector<16x32xbf16>, vector<32x16xbf16>, vector<16x16xf32> -> vector<16x16xf32>
    %33 = arith.addf %30, %32 : vector<16x16xf32>
    %c0_15 = arith.constant 0 : index
    %c0_16 = arith.constant 0 : index
    %34 = vector.load %arg9[%c0_15, %c0_16] : memref<16x16xf32, #tpu.memory_space<vmem>>, vector<16x16xf32>
    tpu.vector_store %arg9[%c0_15, %c0_16], %33 {strides = array<i32>} : memref<16x16xf32, #tpu.memory_space<vmem>>, vector<16x16xf32>,
    %c0_i32_17 = arith.constant 0 : i32
    %35 = arith.cmpi eq, %arg2, %c0_i32_17 : i32
    %36 = arith.extui %35 : i1 to i32
    %c0_i32_18 = arith.constant 0 : i32
    %37 = arith.cmpi ne, %36, %c0_i32_18 : i32
    scf.if %37 {
      %c0_19 = arith.constant 0 : index
      %c0_20 = arith.constant 0 : index
      %38 = vector.load %arg9[%c0_19, %c0_20] : memref<16x16xf32, #tpu.memory_space<vmem>>, vector<16x16xf32>
      %c0_21 = arith.constant 0 : index
      %c0_22 = arith.constant 0 : index
      %39 = vector.load %arg5[%c0_21, %c0_22] : memref<1x16xf32, #tpu.memory_space<vmem>>, vector<1x16xf32>
      %40 = vector.broadcast %39 : vector<1x16xf32> to vector<16x16xf32>
      %41 = arith.addf %38, %40 : vector<16x16xf32>
      %42 = arith.truncf %41 : vector<16x16xf32> to vector<16x16xbf16>
      %c0_23 = arith.constant 0 : index
      %c0_24 = arith.constant 0 : index
      %43 = vector.load %arg8[%c0_23, %c0_24] : memref<16x16xbf16, #tpu.memory_space<vmem>>, vector<16x16xbf16>
      tpu.vector_store %arg8[%c0_23, %c0_24], %42 {strides = array<i32>} : memref<16x16xbf16, #tpu.memory_space<vmem>>, vector<16x16xbf16>,
    } else {
    }
    return
  }
  func.func @transform_0(%arg0: i32, %arg1: i32, %arg2: i32) -> (i32, i32) {
    %c0_i32 = arith.constant 0 : i32
    return %arg0, %arg2 : i32, i32
  }
  func.func @transform_1(%arg0: i32, %arg1: i32, %arg2: i32) -> (i32, i32) {
    %c0_i32 = arith.constant 0 : i32
    return %arg2, %arg1 : i32, i32
  }
  func.func @transform_2(%arg0: i32, %arg1: i32, %arg2: i32) -> (i32, i32) {
    %c0_i32 = arith.constant 0 : i32
    %c0_i32_0 = arith.constant 0 : i32
    return %c0_i32, %arg1 : i32, i32
  }
  func.func @transform_3(%arg0: i32, %arg1: i32, %arg2: i32) -> (i32, i32) {
    %c0_i32 = arith.constant 0 : i32
    %c0_i32_0 = arith.constant 0 : i32
    return %c0_i32, %arg2 : i32, i32
  }
  func.func @transform_4(%arg0: i32, %arg1: i32, %arg2: i32) -> (i32, i32) {
    %c0_i32 = arith.constant 0 : i32
    %c0_i32_0 = arith.constant 0 : i32
    return %c0_i32, %arg2 : i32, i32
  }
  func.func @transform_5(%arg0: i32, %arg1: i32, %arg2: i32) -> (i32, i32) {
    %c0_i32 = arith.constant 0 : i32
    return %arg0, %arg1 : i32, i32
  }
}

module attributes {stable_mosaic.version = 11 : i64} {
  func.func @_linear_kernel(%arg0: i32, %arg1: i32, %arg2: i32, %arg3: memref<16x32xbf16, #tpu.memory_space<vmem>>, %arg4: memref<32x64xbf16, #tpu.memory_space<vmem>>, %arg5: memref<1x64xf32, #tpu.memory_space<vmem>>, %arg6: memref<1x32xf32, #tpu.memory_space<vmem>>, %arg7: memref<1x32xf32, #tpu.memory_space<vmem>>, %arg8: memref<16x64xf32, #tpu.memory_space<vmem>>, %arg9: memref<16x64xf32, #tpu.memory_space<vmem>>) attributes {dimension_semantics = [#tpu.dimension_semantics<parallel>, #tpu.dimension_semantics<parallel>, #tpu.dimension_semantics<arbitrary>], iteration_bounds = array<i64: 1, 1, 1>, scalar_prefetch = 0 : i64, scratch_operands = 1 : i64, tpu.core_type = #tpu.core_type<tc>, window_params = [{transform_indices = @transform_0, window_bounds = array<i64: 16, 32>}, {transform_indices = @transform_1, window_bounds = array<i64: 32, 64>}, {transform_indices = @transform_2, window_bounds = array<i64: 1, 64>}, {transform_indices = @transform_3, window_bounds = array<i64: 1, 32>}, {transform_indices = @transform_4, window_bounds = array<i64: 1, 32>}, {transform_indices = @transform_5, window_bounds = array<i64: 16, 64>}]} {
    %c0_i32 = arith.constant 0 : i32
    %0 = arith.cmpi eq, %arg2, %c0_i32 : i32
    %1 = arith.extui %0 : i1 to i32
    %c0_i32_0 = arith.constant 0 : i32
    %2 = arith.cmpi ne, %1, %c0_i32_0 : i32
    scf.if %2 {
      %cst_19 = arith.constant 0.000000e+00 : f32
      %38 = vector.broadcast %cst_19 : f32 to vector<16x64xf32>
      %c0_20 = arith.constant 0 : index
      %c0_21 = arith.constant 0 : index
      %39 = vector.load %arg9[%c0_20, %c0_21] : memref<16x64xf32, #tpu.memory_space<vmem>>, vector<16x64xf32>
      tpu.vector_store %arg9[%c0_20, %c0_21], %38 {strides = array<i32>} : memref<16x64xf32, #tpu.memory_space<vmem>>, vector<16x64xf32>,
    } else {
    }
    %c0 = arith.constant 0 : index
    %c0_1 = arith.constant 0 : index
    %3 = vector.load %arg3[%c0, %c0_1] : memref<16x32xbf16, #tpu.memory_space<vmem>>, vector<16x32xbf16>
    %4 = arith.extf %3 : vector<16x32xbf16> to vector<16x32xf32>
    %cst = arith.constant dense<0.000000e+00> : vector<16xf32>
    %5 = vector.multi_reduction <add>, %4, %cst [1] : vector<16x32xf32> to vector<16xf32>
    %6 = vector.shape_cast %5 : vector<16xf32> to vector<16x1xf32>
    %cst_2 = arith.constant 3.200000e+01 : f32
    %7 = vector.broadcast %cst_2 : f32 to vector<16x1xf32>
    %8 = arith.divf %6, %7 : vector<16x1xf32>
    %9 = vector.broadcast %8 : vector<16x1xf32> to vector<16x32xf32>
    %10 = arith.subf %4, %9 : vector<16x32xf32>
    %11 = arith.mulf %10, %10 : vector<16x32xf32>
    %cst_3 = arith.constant dense<0.000000e+00> : vector<16xf32>
    %12 = vector.multi_reduction <add>, %11, %cst_3 [1] : vector<16x32xf32> to vector<16xf32>
    %13 = vector.shape_cast %12 : vector<16xf32> to vector<16x1xf32>
    %cst_4 = arith.constant 3.200000e+01 : f32
    %14 = vector.broadcast %cst_4 : f32 to vector<16x1xf32>
    %15 = arith.divf %13, %14 : vector<16x1xf32>
    %16 = vector.broadcast %8 : vector<16x1xf32> to vector<16x32xf32>
    %17 = arith.subf %4, %16 : vector<16x32xf32>
    %cst_5 = arith.constant 9.99999974E-6 : f32
    %18 = vector.broadcast %cst_5 : f32 to vector<16x1xf32>
    %19 = arith.addf %15, %18 : vector<16x1xf32>
    %20 = math.rsqrt %19 : vector<16x1xf32>
    %21 = vector.broadcast %20 : vector<16x1xf32> to vector<16x32xf32>
    %22 = arith.mulf %17, %21 : vector<16x32xf32>
    %c0_6 = arith.constant 0 : index
    %c0_7 = arith.constant 0 : index
    %23 = vector.load %arg6[%c0_6, %c0_7] : memref<1x32xf32, #tpu.memory_space<vmem>>, vector<1x32xf32>
    %24 = vector.broadcast %23 : vector<1x32xf32> to vector<16x32xf32>
    %25 = arith.mulf %22, %24 : vector<16x32xf32>
    %c0_8 = arith.constant 0 : index
    %c0_9 = arith.constant 0 : index
    %26 = vector.load %arg7[%c0_8, %c0_9] : memref<1x32xf32, #tpu.memory_space<vmem>>, vector<1x32xf32>
    %27 = vector.broadcast %26 : vector<1x32xf32> to vector<16x32xf32>
    %28 = arith.addf %25, %27 : vector<16x32xf32>
    %29 = arith.truncf %28 : vector<16x32xf32> to vector<16x32xbf16>
    %c0_10 = arith.constant 0 : index
    %c0_11 = arith.constant 0 : index
    %30 = vector.load %arg9[%c0_10, %c0_11] : memref<16x64xf32, #tpu.memory_space<vmem>>, vector<16x64xf32>
    %c0_12 = arith.constant 0 : index
    %c0_13 = arith.constant 0 : index
    %31 = vector.load %arg4[%c0_12, %c0_13] : memref<32x64xbf16, #tpu.memory_space<vmem>>, vector<32x64xbf16>
    %cst_14 = arith.constant dense<0.000000e+00> : vector<16x64xf32>
    %32 = tpu.matmul %29, %31, %cst_14 {dimension_numbers = #tpu.dot_dimension_numbers<[1], [0], [0], [1], [0, 0, 1, 1], [], []>} : vector<16x32xbf16>, vector<32x64xbf16>, vector<16x64xf32> -> vector<16x64xf32>
    %33 = arith.addf %30, %32 : vector<16x64xf32>
    %c0_15 = arith.constant 0 : index
    %c0_16 = arith.constant 0 : index
    %34 = vector.load %arg9[%c0_15, %c0_16] : memref<16x64xf32, #tpu.memory_space<vmem>>, vector<16x64xf32>
    tpu.vector_store %arg9[%c0_15, %c0_16], %33 {strides = array<i32>} : memref<16x64xf32, #tpu.memory_space<vmem>>, vector<16x64xf32>,
    %c0_i32_17 = arith.constant 0 : i32
    %35 = arith.cmpi eq, %arg2, %c0_i32_17 : i32
    %36 = arith.extui %35 : i1 to i32
    %c0_i32_18 = arith.constant 0 : i32
    %37 = arith.cmpi ne, %36, %c0_i32_18 : i32
    scf.if %37 {
      %c0_19 = arith.constant 0 : index
      %c0_20 = arith.constant 0 : index
      %38 = vector.load %arg9[%c0_19, %c0_20] : memref<16x64xf32, #tpu.memory_space<vmem>>, vector<16x64xf32>
      %c0_21 = arith.constant 0 : index
      %c0_22 = arith.constant 0 : index
      %39 = vector.load %arg5[%c0_21, %c0_22] : memref<1x64xf32, #tpu.memory_space<vmem>>, vector<1x64xf32>
      %40 = vector.broadcast %39 : vector<1x64xf32> to vector<16x64xf32>
      %41 = arith.addf %38, %40 : vector<16x64xf32>
      %c0_23 = arith.constant 0 : index
      %c0_24 = arith.constant 0 : index
      %42 = vector.load %arg8[%c0_23, %c0_24] : memref<16x64xf32, #tpu.memory_space<vmem>>, vector<16x64xf32>
      tpu.vector_store %arg8[%c0_23, %c0_24], %41 {strides = array<i32>} : memref<16x64xf32, #tpu.memory_space<vmem>>, vector<16x64xf32>,
    } else {
    }
    return
  }
  func.func @transform_0(%arg0: i32, %arg1: i32, %arg2: i32) -> (i32, i32) {
    %c0_i32 = arith.constant 0 : i32
    return %arg0, %arg2 : i32, i32
  }
  func.func @transform_1(%arg0: i32, %arg1: i32, %arg2: i32) -> (i32, i32) {
    %c0_i32 = arith.constant 0 : i32
    return %arg2, %arg1 : i32, i32
  }
  func.func @transform_2(%arg0: i32, %arg1: i32, %arg2: i32) -> (i32, i32) {
    %c0_i32 = arith.constant 0 : i32
    %c0_i32_0 = arith.constant 0 : i32
    return %c0_i32, %arg1 : i32, i32
  }
  func.func @transform_3(%arg0: i32, %arg1: i32, %arg2: i32) -> (i32, i32) {
    %c0_i32 = arith.constant 0 : i32
    %c0_i32_0 = arith.constant 0 : i32
    return %c0_i32, %arg2 : i32, i32
  }
  func.func @transform_4(%arg0: i32, %arg1: i32, %arg2: i32) -> (i32, i32) {
    %c0_i32 = arith.constant 0 : i32
    %c0_i32_0 = arith.constant 0 : i32
    return %c0_i32, %arg2 : i32, i32
  }
  func.func @transform_5(%arg0: i32, %arg1: i32, %arg2: i32) -> (i32, i32) {
    %c0_i32 = arith.constant 0 : i32
    return %arg0, %arg1 : i32, i32
  }
}

</mosaic_0001>

<bundles_post_ra>
// kernel: gqa_transformer_lm.30
= control target key start
LH: loop header
LB: loop body
LE: loop exit
PB: predicated region body
PF: predicated region fallthrough
CT: control target
= control target key end

     0   :  { %s502_s15 = smov 0   ;;  %s504_s16 = smov 0   ;;  %s541_s0 = inlined_call_operand.vmem [shape: f32[2,8,32], index: 0, kind: input, shape index: {}]   ;;  %s542_s1 = inlined_call_operand.vmem [shape: f32[2,8,32], index: 1, kind: input, shape index: {}]   ;;  %s543_s2 = inlined_call_operand.vmem [shape: f32[8,32], index: 2, kind: input, shape index: {}]   ;;  %s544_s3 = inlined_call_operand.vmem [shape: f32[8,32], index: 3, kind: input, shape index: {}]   ;;  %s545_s4 = inlined_call_operand.vmem [shape: bf16[2,8,32], index: 4, kind: output, shape index: {}]  }
   0x1   :  { %s506_s17 = smov 0  }
   0x2 LB: > { %s26_s18 = sadd.s32 1, %s471_s16  ;;  %p423_p0 = scmp.ge.s32.totalorder %s475_s17, 1  ;;  %s475_s17 = sphi %s506_s17, %s14_s17   ;;  %s471_s16 = sphi %s504_s16, %s547_s16   ;;  %s467_s15 = sphi %s502_s15, %s546_s15  }
   0x3   : > { %p28_p1 = scmp.ge.s32.totalorder %s26_s18, 2  ;;  %p212_p2 = scmp.lt.s32.totalorder %s475_s17, 3 }
   0x5   : > { %s549_s18 = smov (%p28_p1, %s26_s18), 0  ;;  %p213_p3 = pnand %p423_p0, %p212_p2 }
   0x6   : > { %p257_p4 = scmp.lt.s32.totalorder (!%p213_p3), %s467_s15, 1  ;;  %v288_v0 = vld [vmem:[%s543_s2] sm:$0xff] (!%p213_p3)  ;;  %vm295_vm0 = vcmask (!%p213_p3), 257024  }
   0x7   : > { %216 = sbr.rel (%p213_p3) target bundleno = 27 (0x1b), region = 36  ;;  %v291_v1 = vld [vmem:[%s544_s3] sm:$0xff] (!%p213_p3) }
   0xe   : > { %s551_s15 = smov (!%p257_p4, %s467_s15), 1 }
   0xf   : > { %s424_s19 = sshll.u32 %s551_s15, 3  ;;  %s426_s30 = sshll.u32 %s551_s15, 2 }
  0x10   : > { %s263_s26 = scalar_lea.vmem %s541_s0, %s424_s19  ;;  %s270_s29 = scalar_lea.vmem %s542_s1, %s424_s19 }
  0x11   : > { %v286_v2 = vld [vmem:[%s263_s26] sm:$0xff]  ;;  %s285_s7 = scalar_lea.vmem %s545_s4, %s426_s30 }
  0x12   : > { %v287_v3 = vld [vmem:[%s270_s29] sm:$0xff]  ;;  %v289_v4 = vmul.f32 %v288_v0, %v286_v2 }
  0x13   : > { %v292_v5 = vmul.f32 %v291_v1, %v287_v3 }
  0x14   : > { %v290_v6 = vadd.f32 %v289_v4, %v286_v2 }
  0x16   : > { %v293_v7 = vadd.f32 %v292_v5, %v290_v6 }
  0x18   : > { %v294_v8 = vpack.c.bf16 %v293_v7, %v293_v7 }
  0x1a   : > { %296 = vst.msk [vmem:[%s285_s7] sm:$0xf] %vm295_vm0, %v294_v8 }
  0x1b PF: > { %s14_s17 = sadd.s32 1, %s475_s17   ;;  %s546_s15 = smov %s471_s16 }
  0x1c   : > { %p11_p5 = scmp.ge.s32.totalorder %s14_s17, 4   ;;  %s547_s16 = smov %s549_s18 }
  0x1e   :  { %13 = sbr.rel (!%p11_p5) target bundleno = 2 (0x2), region = 75 }

// kernel: gqa_transformer_lm.33
= control target key start
LH: loop header
LB: loop body
LE: loop exit
PB: predicated region body
PF: predicated region fallthrough
CT: control target
= control target key end

     0   :  { %vm35_vm0 = vcmask 130048   ;;  %vm28_vm1 = vcmask 261120   ;;  %v208_v15 = vmov 0.0   ;;  %vm209_vm2 = vmmov 0   ;;  %s278_s0 = inlined_call_operand.vmem [shape: bf16[16,16], index: 0, kind: input, shape index: {}]   ;;  %s279_s1 = inlined_call_operand.vmem [shape: bf16[16,32], index: 1, kind: input, shape index: {}]   ;;  %s280_s3 = inlined_call_operand.vmem [shape: f32[1,16], index: 3, kind: input, shape index: {}]   ;;  %s281_s4 = inlined_call_operand.vmem [shape: f32[1,16], index: 4, kind: input, shape index: {}]   ;;  %s282_s5 = inlined_call_operand.vmem [shape: bf16[16,32], index: 5, kind: input, shape index: {}]   ;;  %s283_s2 = inlined_call_operand.vmem [shape: f32[1,32], index: 2, kind: input, shape index: {}]   ;;  %s284_s6 = inlined_call_operand.vmem [shape: bf16[16,32], index: 6, kind: output, shape index: {}]  }
   0x1   :  { %v186_v0 = vld [vmem:[%s278_s0] sm:$0xff]   ;;  %29 = vst.msk [vmem:[#allocation2] sm:$0xff] %vm28_vm1, %v208_v15  ;;  %30 = vst.msk [vmem:[#allocation2 + $0x8] sm:$0xff] %vm28_vm1, %v208_v15  ;;  %195 = vmatprep.subr.bf16.mxu0 %v208_v15  ;;  %197 = vmatprep.mubr.msk.bf16.mxu0 %vm209_vm2, %v208_v15  ;;  %vm169_vm3 = vcmask 257024  }
   0x2   :  { %v187_v1 = vunpack.c.l.bf16 %v186_v0  ;;  %v188_v2 = vunpack.c.h.bf16 %v186_v0  ;;  %v203_v16 = vld [vmem:[%s279_s1] sm:$0xff]  }
   0x3   :  { %196 = vmatpush3.bf16.msra.mxu0 %v203_v16  ;;  %v176_v25 = vld [vmem:[%s280_s3] ss:$0 sm:$0xff] }
   0x4   :  { %v36_v3 = vsel %vm35_vm0, %v187_v1, 0.0  ;;  %v39_v4 = vsel %vm35_vm0, %v188_v2, 0.0  ;;  %v177_v29 = vld [vmem:[%s281_s4] ss:$0 sm:$0xff] }
   0x5   :  { %37 = vadd.xlane.f32.xlu0 %v36_v3  ;;  %v190_v42 = vld [vmem:[%s282_s5] sm:$0xff]  }
   0x6   :  { %v180_v43 = vld [vmem:[%s283_s2] ss:$0 sm:$0xff]  ;;  %v191_v44 = vunpack.c.l.bf16 %v190_v42  ;;  %v192_v47 = vunpack.c.h.bf16 %v190_v42 }
   0x8   :  { %v82_v34 = vld [vmem:[#allocation2] sm:$0xff]  ;;  %v83_v36 = vld [vmem:[#allocation2 + $0x8] sm:$0xff] }
   0x9   :  { %40 = vadd.xlane.f32.xlu0 %v39_v4 }
  0x92   :  { %v38_v5 = vpop.xlane.xlu0 %37 }
  0x93   :  { %v43_v6 = vmul.f32 0.0625, %v38_v5 }
  0x95   :  { %v45_v7 = vsub.f32 %v187_v1, %v43_v6 }
  0x96   :  { %v41_v8 = vpop.xlane.xlu0 %40 }
  0x97   :  { %v44_v9 = vmul.f32 0.0625, %v41_v8  ;;  %v47_v10 = vmul.f32 %v45_v7, %v45_v7 }
  0x99   :  { %v46_v11 = vsub.f32 %v188_v2, %v44_v9  ;;  %v49_v12 = vsel %vm35_vm0, %v47_v10, 0.0 }
  0x9a   :  { %50 = vadd.xlane.f32.xlu1 %v49_v12 }
  0x9b   :  { %v48_v13 = vmul.f32 %v46_v11, %v46_v11 }
  0x9d   :  { %v52_v14 = vsel %vm35_vm0, %v48_v13, 0.0 }
  0x9e   :  { %53 = vadd.xlane.f32.xlu1 %v52_v14 }
 0x127   :  { %v51_v17 = vpop.xlane.xlu1 %50 }
 0x128   :  { %v55_v18 = vmul.f32 0.0625, %v51_v17 }
 0x12a   :  { %v57_v19 = vadd.f32 1e-05, %v55_v18 }
 0x12b   :  { %v54_v20 = vpop.xlane.xlu1 %53 }
 0x12c   :  { %204 = vrsqrt.f32 %v57_v19  ;;  %v56_v21 = vmul.f32 0.0625, %v54_v20 }
 0x12e   :  { %v58_v22 = vadd.f32 1e-05, %v56_v21 }
 0x130   :  { %206 = vrsqrt.f32 %v58_v22 }
 0x136   :  { %v205_v23 = vpop.eup %204 }
 0x137   :  { %v61_v24 = vmul.f32 %v205_v23, %v45_v7 }
 0x139   :  { %v70_v28 = vmul.f32 %v176_v25, %v61_v24 }
 0x13a   :  { %v207_v26 = vpop.eup %206 }
 0x13b   :  { %v62_v27 = vmul.f32 %v207_v26, %v46_v11  ;;  %v79_v31 = vadd.f32 %v177_v29, %v70_v28 }
 0x13d   :  { %v71_v30 = vmul.f32 %v176_v25, %v62_v27 }
 0x13f   :  { %v80_v32 = vadd.f32 %v177_v29, %v71_v30 }
 0x141   :  { %v81_v33 = vpack.c.bf16 %v80_v32, %v79_v31 }
 0x143   :  { %198 = vmatmul.mubr.msk.bf16.vlgmr.msra.gmra.mrb[0].mxu0 %vm35_vm0, %v81_v33 }
 0x216   :  { %v129_v35 = vpop.f32.mrb[0].mxu0 }
 0x217   :  { %v136_v37 = vadd.f32 %v129_v35, %v82_v34  ;;  %v199_v38 = vpop.f32.mrb[1].mxu0 }
 0x218   :  { %v132_v39 = vpop.f32.mrb[2].mxu0 }
 0x219   :  { %139 = vst.msk [vmem:[#allocation2] sm:$0xff] %vm28_vm1, %v136_v37  ;;  %v137_v40 = vadd.f32 %v132_v39, %v83_v36  ;;  %v200_v41 = vpop.f32.mrb[3].mxu0 }
 0x21b   :  { %140 = vst.msk [vmem:[#allocation2 + $0x8] sm:$0xff] %vm28_vm1, %v137_v40 }
 0x220   :  { %v144_v45 = vld [vmem:[#allocation2] sm:$0xff] }
 0x221   :  { %v153_v46 = vadd.f32 %v180_v43, %v144_v45 }
 0x222   :  { %v145_v48 = vld [vmem:[#allocation2 + $0x8] sm:$0xff] }
 0x223   :  { %v159_v49 = vadd.f32 %v191_v44, %v153_v46  ;;  %v154_v50 = vadd.f32 %v180_v43, %v145_v48 }
 0x225   :  { %v183_v51 = vpack.c.bf16 %v159_v49, %v159_v49  ;;  %v160_v52 = vadd.f32 %v192_v47, %v154_v50 }
 0x227   :  { %170 = vst.msk [vmem:[%s284_s6] sm:$0xf] %vm169_vm3, %v183_v51  ;;  %v184_v53 = vpack.c.bf16 %v160_v52, %v160_v52 }
 0x229   :  { %171 = vst.msk [vmem:[%s284_s6 + $0x4] sm:$0xf] %vm169_vm3, %v184_v53 }

// kernel: gqa_transformer_lm.31
= control target key start
LH: loop header
LB: loop body
LE: loop exit
PB: predicated region body
PF: predicated region fallthrough
CT: control target
= control target key end

     0   :  { %vm32_vm0 = vcmask 261120   ;;  %v208_v16 = vmov 0.0   ;;  %vm209_vm1 = vmmov 0   ;;  %vm25_vm2 = vcmask 392192   ;;  %s273_s0 = inlined_call_operand.vmem [shape: bf16[16,32], index: 0, kind: input, shape index: {}]   ;;  %s274_s1 = inlined_call_operand.vmem [shape: bf16[32,48], index: 1, kind: input, shape index: {}]   ;;  %s275_s3 = inlined_call_operand.vmem [shape: f32[1,32], index: 3, kind: input, shape index: {}]   ;;  %s276_s4 = inlined_call_operand.vmem [shape: f32[1,32], index: 4, kind: input, shape index: {}]   ;;  %s277_s2 = inlined_call_operand.vmem [shape: f32[1,48], index: 2, kind: input, shape index: {}]   ;;  %s278_s5 = inlined_call_operand.vmem [shape: bf16[16,48], index: 5, kind: output, shape index: {}]  }
   0x1   :  { %v186_v0 = vld [vmem:[%s273_s0] sm:$0xff]   ;;  %192 = vmatprep.subr.bf16.mxu0 %v208_v16  ;;  %v203_v17 = vld [vmem:[%s274_s1 + $0x8] sm:$0xff]   ;;  %196 = vmatprep.mubr.msk.bf16.mxu0 %vm209_vm1, %v208_v16  ;;  %26 = vst.msk [vmem:[#allocation2] sm:$0xff] %vm25_vm2, %v208_v16  ;;  %27 = vst.msk [vmem:[#allocation2 + $0x8] sm:$0xff] %vm25_vm2, %v208_v16  ;;  %vm168_vm3 = vcmask 388096  }
   0x2   :  { %v187_v1 = vunpack.c.l.bf16 %v186_v0  ;;  %v188_v2 = vunpack.c.h.bf16 %v186_v0  ;;  %v202_v15 = vld [vmem:[%s274_s1] sm:$0xff]  }
   0x3   :  { %193 = vmatpush3.bf16.msra.mxu0 %v202_v15  ;;  %v175_v26 = vld [vmem:[%s275_s3] ss:$0 sm:$0xff] }
   0x4   :  { %v33_v3 = vsel %vm32_vm0, %v187_v1, 0.0  ;;  %v36_v4 = vsel %vm32_vm0, %v188_v2, 0.0  ;;  %194 = vmatprep.subr.bf16.mxu0 %v208_v16  ;;  %v176_v30 = vld [vmem:[%s276_s4] ss:$0 sm:$0xff] }
   0x5   :  { %34 = vadd.xlane.f32.xlu0 %v33_v3  ;;  %v180_v43 = vld [vmem:[%s277_s2] ss:$0 sm:$0xff] }
   0x7   :  { %195 = vmatpush3.bf16.msra.mxu0 %v203_v17 }
   0x8   :  { %v79_v35 = vld [vmem:[#allocation2] sm:$0xff]  ;;  %v80_v37 = vld [vmem:[#allocation2 + $0x8] sm:$0xff] }
   0x9   :  { %37 = vadd.xlane.f32.xlu0 %v36_v4 }
  0x92   :  { %v35_v5 = vpop.xlane.xlu0 %34 }
  0x93   :  { %v40_v6 = vmul.f32 0.03125, %v35_v5 }
  0x95   :  { %v42_v7 = vsub.f32 %v187_v1, %v40_v6 }
  0x96   :  { %v38_v8 = vpop.xlane.xlu0 %37 }
  0x97   :  { %v41_v9 = vmul.f32 0.03125, %v38_v8  ;;  %v44_v10 = vmul.f32 %v42_v7, %v42_v7 }
  0x99   :  { %v43_v11 = vsub.f32 %v188_v2, %v41_v9  ;;  %v46_v12 = vsel %vm32_vm0, %v44_v10, 0.0 }
  0x9a   :  { %47 = vadd.xlane.f32.xlu1 %v46_v12 }
  0x9b   :  { %v45_v13 = vmul.f32 %v43_v11, %v43_v11 }
  0x9d   :  { %v49_v14 = vsel %vm32_vm0, %v45_v13, 0.0 }
  0x9e   :  { %50 = vadd.xlane.f32.xlu1 %v49_v14 }
 0x127   :  { %v48_v18 = vpop.xlane.xlu1 %47 }
 0x128   :  { %v52_v19 = vmul.f32 0.03125, %v48_v18 }
 0x12a   :  { %v54_v20 = vadd.f32 1e-05, %v52_v19 }
 0x12b   :  { %v51_v21 = vpop.xlane.xlu1 %50 }
 0x12c   :  { %204 = vrsqrt.f32 %v54_v20  ;;  %v53_v22 = vmul.f32 0.03125, %v51_v21 }
 0x12e   :  { %v55_v23 = vadd.f32 1e-05, %v53_v22 }
 0x130   :  { %206 = vrsqrt.f32 %v55_v23 }
 0x136   :  { %v205_v24 = vpop.eup %204 }
 0x137   :  { %v58_v25 = vmul.f32 %v205_v24, %v42_v7 }
 0x139   :  { %v67_v29 = vmul.f32 %v175_v26, %v58_v25 }
 0x13a   :  { %v207_v27 = vpop.eup %206 }
 0x13b   :  { %v59_v28 = vmul.f32 %v207_v27, %v43_v11  ;;  %v76_v32 = vadd.f32 %v176_v30, %v67_v29 }
 0x13d   :  { %v68_v31 = vmul.f32 %v175_v26, %v59_v28 }
 0x13f   :  { %v77_v33 = vadd.f32 %v176_v30, %v68_v31 }
 0x141   :  { %v78_v34 = vpack.c.bf16 %v77_v33, %v76_v32 }
 0x143   :  { %197 = vmatmul.mubr.msk.bf16.vlgmr.msra.gmra.mrb[0].mxu0 %vm32_vm0, %v78_v34 }
 0x216   :  { %v134_v36 = vpop.f32.mrb[0].mxu0 }
 0x217   :  { %v141_v38 = vadd.f32 %v134_v36, %v79_v35  ;;  %v198_v39 = vpop.f32.mrb[1].mxu0 }
 0x218   :  { %v137_v40 = vpop.f32.mrb[2].mxu0 }
 0x219   :  { %144 = vst.msk [vmem:[#allocation2] sm:$0xff] %vm25_vm2, %v141_v38  ;;  %v142_v41 = vadd.f32 %v137_v40, %v80_v37  ;;  %v199_v42 = vpop.f32.mrb[3].mxu0 }
 0x21b   :  { %145 = vst.msk [vmem:[#allocation2 + $0x8] sm:$0xff] %vm25_vm2, %v142_v41 }
 0x220   :  { %v149_v44 = vld [vmem:[#allocation2] sm:$0xff] }
 0x221   :  { %v158_v45 = vadd.f32 %v180_v43, %v149_v44 }
 0x222   :  { %v150_v46 = vld [vmem:[#allocation2 + $0x8] sm:$0xff] }
 0x223   :  { %v183_v47 = vpack.c.bf16 %v158_v45, %v158_v45  ;;  %v159_v48 = vadd.f32 %v180_v43, %v150_v46 }
 0x225   :  { %169 = vst.msk [vmem:[%s278_s5] sm:$0xf] %vm168_vm3, %v183_v47  ;;  %v184_v49 = vpack.c.bf16 %v159_v48, %v159_v48 }
 0x227   :  { %170 = vst.msk [vmem:[%s278_s5 + $0x4] sm:$0xf] %vm168_vm3, %v184_v49 }

// kernel: gqa_transformer_lm.32
= control target key start
LH: loop header
LB: loop body
LE: loop exit
PB: predicated region body
PF: predicated region fallthrough
CT: control target
= control target key end

     0   :  { %s855_s12 = smov 0   ;;  %s857_s13 = smov 0   ;;  %s959_s0 = inlined_call_operand.vmem [shape: bf16[2,8,16], index: 0, kind: input, shape index: {}]   ;;  %s960_s1 = inlined_call_operand.vmem [shape: bf16[2,8,16], index: 1, kind: input, shape index: {}]   ;;  %s961_s2 = inlined_call_operand.vmem [shape: bf16[2,8,16], index: 2, kind: input, shape index: {}]   ;;  %s962_s3 = inlined_call_operand.vmem [shape: bf16[2,8,16], index: 3, kind: output, shape index: {}]  }
   0x1   :  { %s859_s14 = smov 0  }
   0x2 LB: > { %s32_s15 = sadd.s32 1, %s823_s13  ;;  %p714_p0 = scmp.ge.s32.totalorder %s827_s14, 1  ;;  %s827_s14 = sphi %s859_s14, %s13_s14   ;;  %s823_s13 = sphi %s857_s13, %s964_s13   ;;  %s819_s12 = sphi %s855_s12, %s963_s12  }
   0x3   : > { %p34_p1 = scmp.ge.s32.totalorder %s32_s15, 2  ;;  %p190_p2 = scmp.lt.s32.totalorder %s827_s14, 3 }
   0x5   : > { %s966_s15 = smov (%p34_p1, %s32_s15), 0  ;;  %p191_p3 = pnand %p714_p0, %p190_p2 }
   0x6   : > { %p232_p4 = scmp.lt.s32.totalorder (!%p191_p3), %s819_s12, 1  ;;  %vm270_vm0 = vcmask (!%p191_p3), 64512   ;;  %v829_v0 = vmov (!%p191_p3), 0.0   ;;  %vm830_vm1 = vmmov (!%p191_p3), 0   ;;  %vm265_vm2 = vcmask (!%p191_p3), 7168   ;;  %s833_s23 = smov (!%p191_p3), 120  }
   0x7   : > { %194 = sbr.rel (%p191_p3) target bundleno = 1457 (0x5b1), region = 32  ;;  %736 = vmatprep.subr.bf16.mxu0 (!%p191_p3), %v829_v0  ;;  %271 = vst.msk [vmem:[#allocation4] sm:$0xff] (!%p191_p3), %vm270_vm0, %v829_v0  ;;  %272 = vst.msk [vmem:[#allocation4 + $0x8] sm:$0xff] (!%p191_p3), %vm270_vm0, %v829_v0  ;;  %738 = vmatprep.mubr.msk.bf16.mxu0 (!%p191_p3), %vm830_vm1, %v829_v0  ;;  %v831_v4 = vmov (!%p191_p3), -inf   ;;  %v283_v5 = vlaneseq (!%p191_p3)  ;;  %v832_v15 = vmov (!%p191_p3), 0   ;;  %vm377_vm4 = vcmask (!%p191_p3), 1043456  }
   0x8   : > { %742 = vmatprep.subr.bf16.mxu1 (!%p191_p3), %v829_v0  ;;  %744 = vmatprep.mubr.msk.bf16.mxu1 (!%p191_p3), %vm830_vm1, %v829_v0  ;;  %266 = vst.msk [vmem:[#allocation2] sm:$0xff] (!%p191_p3), %vm265_vm2, %v831_v4  ;;  %267 = vst.msk [vmem:[#allocation2 + $0x8] sm:$0xff] (!%p191_p3), %vm265_vm2, %v831_v4  ;;  %s834_s27 = smov (!%p191_p3), 8   ;;  %vm601_vm5 = vcmask (!%p191_p3), 125952  }
   0x9   : > { %268 = vst.msk [vmem:[#allocation3] sm:$0xff] (!%p191_p3), %vm265_vm2, %v829_v0  ;;  %269 = vst.msk [vmem:[#allocation3 + $0x8] sm:$0xff] (!%p191_p3), %vm265_vm2, %v829_v0  ;;  %v904_v6 = vshrl.u32 (!%p191_p3), %v283_v5, 7  ;;  %v906_v7 = vand.u32 (!%p191_p3), 127, %v283_v5  ;;  %790 = vset.pattern.permute.xlu0 (!%p191_p3), %v832_v15  ;;  %791 = vset.pattern.permute.xlu1 (!%p191_p3), %v832_v15 }
   0xb   : > { %vm291_vm3 = vcmp.ge.s32.totalorder (!%p191_p3), %v904_v6, %v906_v7 }
   0xe   : > { %s968_s12 = smov (!%p232_p4, %s819_s12), 1 }
   0xf   : > { %s883_s16 = sshll.u32 %s968_s12, 2  ;;  %v341_v18 = vld [vmem:[#allocation2] sm:$0xff]  ;;  %v483_v45 = vld [vmem:[#allocation2 + $0x8] sm:$0xff] }
  0x10   : > { %s245_s19 = scalar_lea.vmem %s960_s1, %s883_s16  ;;  %s238_s22 = scalar_lea.vmem %s959_s0, %s883_s16  ;;  %v358_v63 = vld [vmem:[#allocation3] sm:$0xff]  ;;  %v501_v5 = vld [vmem:[#allocation3 + $0x8] sm:$0xff] }
  0x11   : > { %v281_v1 = vld [vmem:[%s245_s19] sm:$0xf]  ;;  %s252_s26 = scalar_lea.vmem %s961_s2, %s883_s16  ;;  %s259_s30 = scalar_lea.vmem %s962_s3, %s883_s16 }
  0x12   : > { %v297_v2 = vsel %vm270_vm0, %v281_v1, 0  ;;  %v280_v3 = vld [vmem:[%s238_s22] sm:$0xf]  ;;  %v722_v16 = vcombine.low %v281_v1, %v281_v1 }
  0x13   : > { %737 = vmatpush3.bf16.xpose.msra.mxu0 %v297_v2  ;;  %v721_v17 = vcombine.low %v280_v3, %v280_v3  ;;  %v282_v22 = vld [vmem:[%s252_s26] sm:$0xf] }
  0x14   : > { %754 = vmatprep.subr.bf16.mxu0 %v829_v0  ;;  %432 = vrot.lane.b32.xlu1 %v722_v16, %s833_s23  ;;  %v379_v23 = vsel %vm377_vm4, %v282_v22, 0  ;;  %v724_v24 = vcombine.low %v282_v22, %v282_v22  ;;  %v509_v16 = vld [vmem:[#allocation4 + $0x8] sm:$0xff] }
  0x15   : > { %743 = vmatpush3.bf16.msra.mxu1 %v379_v23 }
  0x16   : > { %748 = vmatprep.subr.bf16.mxu1 %v829_v0 }
  0x18   : > { %427 = vrot.lane.b32.xlu1 %v721_v17, %s833_s23 }
  0x1a   : > { %739 = vmatmul.mubr.msk.bf16.vlgmr.msra.gmra.mrb[0].mxu0 %vm270_vm0, %v280_v3 }
  0x1b   : > { %756 = vmatprep.mubr.msk.bf16.mxu0 %vm830_vm1, %v829_v0 }
  0x86   : > { %v433_v28 = vpop.permute.xlu1 %432 }
  0x87   : > { %v438_v31 = vsel %vm270_vm0, %v433_v28, 0 }
  0x8a   : > { %v428_v33 = vpop.permute.xlu1 %427 }
  0xed   : > { %v333_v8 = vpop.f32.mrb[0].mxu0 }
  0xee   : > { %v339_v9 = vmul.f32 0.35355338, %v333_v8  ;;  %v740_v10 = vpop.f32.mrb[1].mxu0 }
  0xef   : > { %v336_v11 = vpop.f32.mrb[2].mxu0  ;;  %v366_v10 = vld [vmem:[#allocation4] sm:$0xff] }
  0xf0   : > { %v741_v12 = vpop.f32.mrb[3].mxu0  ;;  %v340_v13 = vsel %vm291_vm3, %v339_v9, -1e+30 }
  0xf1   : > { %v342_v14 = vsel %vm270_vm0, %v340_v13, -inf }
  0xf2   : > { %343 = vmax.xlane.f32.xlu0 %v342_v14 }
 0x17f   : > { %v344_v19 = vpop.xlane.xlu0 %343 }
 0x180   : > { %v345_v20 = vmax.f32 %v341_v18, %v344_v19 }
 0x182   : > { %v346_v21 = vsub.f32 %v341_v18, %v345_v20  ;;  %423 = vst.msk [vmem:[#allocation2] sm:$0xff] %vm265_vm2, %v345_v20  ;;  %351 = vperm.xlu0 %790, %v345_v20  }
 0x184   : > { %v347_v60 = vmul.f32 1.442695, %v346_v21 }
 0x186   : > { %520 = vrot.lane.b32.xlu0 %v724_v24, %s833_s23 }
 0x201   : > { %v352_v25 = vpop.permute.xlu0 %351 }
 0x202   : > { %v354_v26 = vsub.f32 %v340_v13, %v352_v25 }
 0x204   : > { %v355_v27 = vmul.f32 1.442695, %v354_v26 }
 0x205   : > { %v521_v49 = vpop.permute.xlu0 %520 }
 0x206   : > { %793 = vpow2.f32 %v355_v27  ;;  %v526_v50 = vsel %vm377_vm4, %v521_v49, 0 }
 0x207   : > { %755 = vmatpush3.bf16.msra.mxu0 %v526_v50 }
 0x210   : > { %v794_v29 = vpop.eup %793 }
 0x211   : > { %v357_v30 = vsel %vm291_vm3, %v794_v29, 0.0 }
 0x212   : > { %v373_v32 = vpack.c.bf16 %v357_v30, %v357_v30  ;;  %v360_v51 = vsel %vm270_vm0, %v357_v30, 0.0 }
 0x214   : > { %745 = vmatmul.mubr.msk.bf16.vlgmr.msra.gmra.mrb[0].mxu1 %vm270_vm0, %v373_v32 }
 0x215   : > { %749 = vmatpush3.bf16.xpose.msra.mxu1 %v438_v31  ;;  %750 = vmatprep.mubr.msk.bf16.mxu1 %vm830_vm1, %v829_v0 }
 0x21c   : > { %751 = vmatmul.mubr.msk.bf16.vlgmr.msra.gmra.mrb[4].mxu1 %vm270_vm0, %v428_v33 }
 0x2e7   : > { %v415_v34 = vpop.f32.mrb[0].mxu1 }
 0x2e8   : > { %v746_v35 = vpop.f32.mrb[1].mxu1 }
 0x2e9   : > { %v418_v36 = vpop.f32.mrb[2].mxu1 }
 0x2ea   : > { %v747_v37 = vpop.f32.mrb[3].mxu1 }
 0x2ef   : > { %v474_v38 = vpop.f32.mrb[4].mxu1 }
 0x2f0   : > { %v480_v39 = vmul.f32 0.35355338, %v474_v38  ;;  %v752_v40 = vpop.f32.mrb[5].mxu1 }
 0x2f1   : > { %v477_v41 = vpop.f32.mrb[6].mxu1 }
 0x2f2   : > { %v753_v42 = vpop.f32.mrb[7].mxu1  ;;  %v481_v43 = vsel %vm291_vm3, %v480_v39, -1e+30 }
 0x2f3   : > { %v484_v44 = vsel %vm270_vm0, %v481_v43, -inf }
 0x2f4   : > { %485 = vmax.xlane.f32.xlu1 %v484_v44 }
 0x381   : > { %v486_v46 = vpop.xlane.xlu1 %485 }
 0x382   : > { %v487_v47 = vmax.f32 %v483_v45, %v486_v46 }
 0x384   : > { %v488_v48 = vsub.f32 %v483_v45, %v487_v47  ;;  %570 = vst.msk [vmem:[#allocation2 + $0x8] sm:$0xff] %vm265_vm2, %v487_v47  ;;  %493 = vperm.xlu1 %791, %v487_v47  }
 0x386   : > { %v489_v59 = vmul.f32 1.442695, %v488_v48 }
 0x3a8   : > { %361 = vadd.xlane.f32.xlu1 %v360_v51 }
 0x403   : > { %v494_v52 = vpop.permute.xlu1 %493 }
 0x404   : > { %v496_v53 = vsub.f32 %v481_v43, %v494_v52 }
 0x406   : > { %v497_v54 = vmul.f32 1.442695, %v496_v53 }
 0x408   : > { %795 = vpow2.f32 %v497_v54 }
 0x409   : > { %797 = vpow2.f32 %v489_v59 }
 0x40a   : > { %799 = vpow2.f32 %v347_v60 }
 0x412   : > { %v796_v55 = vpop.eup %795 }
 0x413   : > { %v499_v56 = vsel %vm291_vm3, %v796_v55, 0.0  ;;  %v798_v61 = vpop.eup %797 }
 0x414   : > { %v503_v57 = vsel %vm270_vm0, %v499_v56, 0.0  ;;  %v516_v58 = vpack.c.bf16 %v499_v56, %v499_v56  ;;  %v800_v62 = vpop.eup %799  ;;  %v502_v6 = vmul.f32 %v798_v61, %v501_v5 }
 0x415   : > { %504 = vadd.xlane.f32.xlu0 %v503_v57  ;;  %v359_v0 = vmul.f32 %v800_v62, %v358_v63 }
 0x416   : > { %757 = vmatmul.mubr.msk.bf16.vlgmr.msra.gmra.mrb[4].mxu0 %vm270_vm0, %v516_v58 }
 0x42b   : > { %512 = vperm.xlu0 %790, %v798_v61  }
 0x42f   : > { %369 = vperm.xlu0 %790, %v800_v62  }
 0x435   : > { %v362_v1 = vpop.xlane.xlu1 %361 }
 0x436   : > { %v363_v2 = vadd.f32 %v362_v1, %v359_v0 }
 0x438   : > { %365 = vst.msk [vmem:[#allocation3] sm:$0xff] %vm265_vm2, %v363_v2 }
 0x43f   : > { %v574_v3 = vld [vmem:[#allocation3] sm:$0xff] }
 0x440   : > { %801 = vrcp.f32 %v574_v3 }
 0x44a   : > { %v802_v4 = vpop.eup %801 }
 0x44b   : > { %579 = vperm.xlu0 %790, %v802_v4  }
 0x4a2   : > { %v505_v7 = vpop.xlane.xlu0 %504 }
 0x4a3   : > { %v506_v8 = vadd.f32 %v505_v7, %v502_v6 }
 0x4a5   : > { %507 = vst.msk [vmem:[#allocation3 + $0x8] sm:$0xff] %vm265_vm2, %v506_v8 }
 0x4aa   : > { %v513_v9 = vpop.permute.xlu0 %512 }
 0x4ab   : > { %v515_v17 = vmul.f32 %v513_v9, %v509_v16 }
 0x4ac   : > { %v584_v11 = vld [vmem:[#allocation3 + $0x8] sm:$0xff] }
 0x4ad   : > { %803 = vrcp.f32 %v584_v11 }
 0x4ae   : > { %v370_v12 = vpop.permute.xlu0 %369 }
 0x4af   : > { %v372_v13 = vmul.f32 %v370_v12, %v366_v10 }
 0x4b1   : > { %v421_v14 = vadd.f32 %v415_v34, %v372_v13 }
 0x4b3   : > { %422 = vst.msk [vmem:[#allocation4] sm:$0xff] %vm270_vm0, %v421_v14 }
 0x4b7   : > { %v804_v15 = vpop.eup %803 }
 0x4b8   : > { %590 = vperm.xlu1 %791, %v804_v15  }
 0x4ba   : > { %v576_v27 = vld [vmem:[#allocation4] sm:$0xff] }
 0x4ca   : > { %v580_v26 = vpop.permute.xlu0 %579 }
 0x4cb   : > { %v582_v28 = vmul.f32 %v580_v26, %v576_v27 }
 0x4e9   : > { %v562_v18 = vpop.f32.mrb[4].mxu0 }
 0x4ea   : > { %v568_v19 = vadd.f32 %v562_v18, %v515_v17  ;;  %v758_v20 = vpop.f32.mrb[5].mxu0 }
 0x4eb   : > { %v565_v21 = vpop.f32.mrb[6].mxu0 }
 0x4ec   : > { %569 = vst.msk [vmem:[#allocation4 + $0x8] sm:$0xff] %vm270_vm0, %v568_v19  ;;  %v759_v22 = vpop.f32.mrb[7].mxu0 }
 0x4f3   : > { %v587_v24 = vld [vmem:[#allocation4 + $0x8] sm:$0xff] }
 0x537   : > { %v591_v23 = vpop.permute.xlu1 %590 }
 0x538   : > { %v593_v25 = vmul.f32 %v591_v23, %v587_v24 }
 0x53a   : > { %595 = vrot.lane.b32.xlu0 %v593_v25, %s834_s27 }
 0x5ac   : > { %v596_v29 = vpop.permute.xlu0 %595 }
 0x5ad   : > { %v599_v30 = vsel %vm270_vm0, %v582_v28, %v596_v29 }
 0x5ae   : > { %v600_v31 = vpack.c.bf16 %v599_v30, %v599_v30 }
 0x5b0   : > { %602 = vst.msk [vmem:[%s259_s30] sm:$0xf] %vm601_vm5, %v600_v31 }
 0x5b1 PF: > { %s13_s14 = sadd.s32 1, %s827_s14   ;;  %s963_s12 = smov %s823_s13 }
 0x5b2   : > { %p10_p5 = scmp.ge.s32.totalorder %s13_s14, 4   ;;  %s964_s13 = smov %s966_s15 }
 0x5b4   :  { %12 = sbr.rel (!%p10_p5) target bundleno = 2 (0x2), region = 85 }

// kernel: gqa_transformer_lm.34
= control target key start
LH: loop header
LB: loop body
LE: loop exit
PB: predicated region body
PF: predicated region fallthrough
CT: control target
= control target key end

     0   :  { %vm32_vm0 = vcmask 261120   ;;  %v210_v16 = vmov 0.0   ;;  %vm211_vm1 = vmmov 0   ;;  %vm25_vm2 = vcmask 523264   ;;  %s275_s0 = inlined_call_operand.vmem [shape: bf16[16,32], index: 0, kind: input, shape index: {}]   ;;  %s276_s1 = inlined_call_operand.vmem [shape: bf16[32,64], index: 1, kind: input, shape index: {}]   ;;  %s277_s3 = inlined_call_operand.vmem [shape: f32[1,32], index: 3, kind: input, shape index: {}]   ;;  %s278_s4 = inlined_call_operand.vmem [shape: f32[1,32], index: 4, kind: input, shape index: {}]   ;;  %s279_s2 = inlined_call_operand.vmem [shape: f32[1,64], index: 2, kind: input, shape index: {}]   ;;  %s280_s5 = inlined_call_operand.vmem [shape: bf16[16,64], index: 5, kind: output, shape index: {}]  }
   0x1   :  { %v188_v0 = vld [vmem:[%s275_s0] sm:$0xff]   ;;  %194 = vmatprep.subr.bf16.mxu0 %v210_v16  ;;  %v205_v17 = vld [vmem:[%s276_s1 + $0x8] sm:$0xff]   ;;  %198 = vmatprep.mubr.msk.bf16.mxu0 %vm211_vm1, %v210_v16  ;;  %26 = vst.msk [vmem:[#allocation2] sm:$0xff] %vm25_vm2, %v210_v16  ;;  %27 = vst.msk [vmem:[#allocation2 + $0x8] sm:$0xff] %vm25_vm2, %v210_v16  ;;  %vm170_vm3 = vcmask 519168  }
   0x2   :  { %v189_v1 = vunpack.c.l.bf16 %v188_v0  ;;  %v190_v2 = vunpack.c.h.bf16 %v188_v0  ;;  %v204_v15 = vld [vmem:[%s276_s1] sm:$0xff]  }
   0x3   :  { %195 = vmatpush3.bf16.msra.mxu0 %v204_v15  ;;  %v177_v26 = vld [vmem:[%s277_s3] ss:$0 sm:$0xff] }
   0x4   :  { %v33_v3 = vsel %vm32_vm0, %v189_v1, 0.0  ;;  %v36_v4 = vsel %vm32_vm0, %v190_v2, 0.0  ;;  %196 = vmatprep.subr.bf16.mxu0 %v210_v16  ;;  %v178_v30 = vld [vmem:[%s278_s4] ss:$0 sm:$0xff] }
   0x5   :  { %34 = vadd.xlane.f32.xlu0 %v33_v3  ;;  %v182_v43 = vld [vmem:[%s279_s2] ss:$0 sm:$0xff] }
   0x7   :  { %197 = vmatpush3.bf16.msra.mxu0 %v205_v17 }
   0x8   :  { %v79_v35 = vld [vmem:[#allocation2] sm:$0xff]  ;;  %v80_v37 = vld [vmem:[#allocation2 + $0x8] sm:$0xff] }
   0x9   :  { %37 = vadd.xlane.f32.xlu0 %v36_v4 }
  0x92   :  { %v35_v5 = vpop.xlane.xlu0 %34 }
  0x93   :  { %v40_v6 = vmul.f32 0.03125, %v35_v5 }
  0x95   :  { %v42_v7 = vsub.f32 %v189_v1, %v40_v6 }
  0x96   :  { %v38_v8 = vpop.xlane.xlu0 %37 }
  0x97   :  { %v41_v9 = vmul.f32 0.03125, %v38_v8  ;;  %v44_v10 = vmul.f32 %v42_v7, %v42_v7 }
  0x99   :  { %v43_v11 = vsub.f32 %v190_v2, %v41_v9  ;;  %v46_v12 = vsel %vm32_vm0, %v44_v10, 0.0 }
  0x9a   :  { %47 = vadd.xlane.f32.xlu1 %v46_v12 }
  0x9b   :  { %v45_v13 = vmul.f32 %v43_v11, %v43_v11 }
  0x9d   :  { %v49_v14 = vsel %vm32_vm0, %v45_v13, 0.0 }
  0x9e   :  { %50 = vadd.xlane.f32.xlu1 %v49_v14 }
 0x127   :  { %v48_v18 = vpop.xlane.xlu1 %47 }
 0x128   :  { %v52_v19 = vmul.f32 0.03125, %v48_v18 }
 0x12a   :  { %v54_v20 = vadd.f32 1e-05, %v52_v19 }
 0x12b   :  { %v51_v21 = vpop.xlane.xlu1 %50 }
 0x12c   :  { %206 = vrsqrt.f32 %v54_v20  ;;  %v53_v22 = vmul.f32 0.03125, %v51_v21 }
 0x12e   :  { %v55_v23 = vadd.f32 1e-05, %v53_v22 }
 0x130   :  { %208 = vrsqrt.f32 %v55_v23 }
 0x136   :  { %v207_v24 = vpop.eup %206 }
 0x137   :  { %v58_v25 = vmul.f32 %v207_v24, %v42_v7 }
 0x139   :  { %v67_v29 = vmul.f32 %v177_v26, %v58_v25 }
 0x13a   :  { %v209_v27 = vpop.eup %208 }
 0x13b   :  { %v59_v28 = vmul.f32 %v209_v27, %v43_v11  ;;  %v76_v32 = vadd.f32 %v178_v30, %v67_v29 }
 0x13d   :  { %v68_v31 = vmul.f32 %v177_v26, %v59_v28 }
 0x13f   :  { %v77_v33 = vadd.f32 %v178_v30, %v68_v31 }
 0x141   :  { %v78_v34 = vpack.c.bf16 %v77_v33, %v76_v32 }
 0x143   :  { %199 = vmatmul.mubr.msk.bf16.vlgmr.msra.gmra.mrb[0].mxu0 %vm32_vm0, %v78_v34 }
 0x216   :  { %v134_v36 = vpop.f32.mrb[0].mxu0 }
 0x217   :  { %v141_v38 = vadd.f32 %v134_v36, %v79_v35  ;;  %v200_v39 = vpop.f32.mrb[1].mxu0 }
 0x218   :  { %v137_v40 = vpop.f32.mrb[2].mxu0 }
 0x219   :  { %144 = vst.msk [vmem:[#allocation2] sm:$0xff] %vm25_vm2, %v141_v38  ;;  %v142_v41 = vadd.f32 %v137_v40, %v80_v37  ;;  %v201_v42 = vpop.f32.mrb[3].mxu0 }
 0x21b   :  { %145 = vst.msk [vmem:[#allocation2 + $0x8] sm:$0xff] %vm25_vm2, %v142_v41 }
 0x220   :  { %v149_v44 = vld [vmem:[#allocation2] sm:$0xff] }
 0x221   :  { %v158_v45 = vadd.f32 %v182_v43, %v149_v44 }
 0x222   :  { %v150_v46 = vld [vmem:[#allocation2 + $0x8] sm:$0xff] }
 0x223   :  { %v160_v47 = vmax.f32 %v158_v45, 0.0  ;;  %v159_v48 = vadd.f32 %v182_v43, %v150_v46 }
 0x225   :  { %v185_v49 = vpack.c.bf16 %v160_v47, %v160_v47  ;;  %v161_v50 = vmax.f32 %v159_v48, 0.0 }
 0x227   :  { %171 = vst.msk [vmem:[%s280_s5] sm:$0xf] %vm170_vm3, %v185_v49  ;;  %v186_v51 = vpack.c.bf16 %v161_v50, %v161_v50 }
 0x229   :  { %172 = vst.msk [vmem:[%s280_s5 + $0x4] sm:$0xf] %vm170_vm3, %v186_v51 }

// kernel: gqa_transformer_lm.35
= control target key start
LH: loop header
LB: loop body
LE: loop exit
PB: predicated region body
PF: predicated region fallthrough
CT: control target
= control target key end

     0   :  { %vm35_vm0 = vcmask 523264   ;;  %v247_v16 = vmov 0.0   ;;  %vm248_vm1 = vmmov 0   ;;  %vm28_vm2 = vcmask 261120   ;;  %s326_s0 = inlined_call_operand.vmem [shape: bf16[16,64], index: 0, kind: input, shape index: {}]   ;;  %s327_s1 = inlined_call_operand.vmem [shape: bf16[64,32], index: 1, kind: input, shape index: {}]   ;;  %s328_s3 = inlined_call_operand.vmem [shape: f32[1,64], index: 3, kind: input, shape index: {}]   ;;  %s329_s4 = inlined_call_operand.vmem [shape: f32[1,64], index: 4, kind: input, shape index: {}]   ;;  %s330_s5 = inlined_call_operand.vmem [shape: bf16[16,32], index: 5, kind: input, shape index: {}]   ;;  %s331_s2 = inlined_call_operand.vmem [shape: f32[1,32], index: 2, kind: input, shape index: {}]   ;;  %s332_s6 = inlined_call_operand.vmem [shape: bf16[16,32], index: 6, kind: output, shape index: {}]  }
   0x1   :  { %v213_v0 = vld [vmem:[%s326_s0] sm:$0xff]   ;;  %225 = vmatprep.subr.bf16.mxu0 %v247_v16  ;;  %v240_v17 = vld [vmem:[%s327_s1 + $0x8] sm:$0xff]   ;;  %v241_v18 = vld [vmem:[%s327_s1 + $0x10] sm:$0xff]   ;;  %233 = vmatprep.mubr.msk.bf16.mxu0 %vm248_vm1, %v247_v16  ;;  %29 = vst.msk [vmem:[#allocation2] sm:$0xff] %vm28_vm2, %v247_v16  ;;  %vm193_vm3 = vcmask 257024  }
   0x2   :  { %v214_v1 = vunpack.c.l.bf16 %v213_v0  ;;  %v215_v2 = vunpack.c.h.bf16 %v213_v0  ;;  %v239_v15 = vld [vmem:[%s327_s1] sm:$0xff]   ;;  %v242_v19 = vld [vmem:[%s327_s1 + $0x18] sm:$0xff]   ;;  %30 = vst.msk [vmem:[#allocation2 + $0x8] sm:$0xff] %vm28_vm2, %v247_v16 }
   0x3   :  { %226 = vmatpush3.bf16.msra.mxu0 %v239_v15  ;;  %v200_v28 = vld [vmem:[%s328_s3] ss:$0 sm:$0xff] }
   0x4   :  { %v36_v3 = vsel %vm35_vm0, %v214_v1, 0.0  ;;  %v39_v4 = vsel %vm35_vm0, %v215_v2, 0.0  ;;  %227 = vmatprep.subr.bf16.mxu0 %v247_v16  ;;  %v201_v32 = vld [vmem:[%s329_s4] ss:$0 sm:$0xff] }
   0x5   :  { %37 = vadd.xlane.f32.xlu0 %v36_v3  ;;  %v217_v45 = vld [vmem:[%s330_s5] sm:$0xff]  }
   0x6   :  { %v207_v46 = vld [vmem:[%s331_s2] ss:$0 sm:$0xff]  ;;  %v218_v47 = vunpack.c.l.bf16 %v217_v45  ;;  %v219_v50 = vunpack.c.h.bf16 %v217_v45 }
   0x7   :  { %228 = vmatpush3.bf16.msra.mxu0 %v240_v17 }
   0x8   :  { %229 = vmatprep.subr.bf16.mxu0 %v247_v16  ;;  %v82_v37 = vld [vmem:[#allocation2] sm:$0xff] }
   0x9   :  { %40 = vadd.xlane.f32.xlu0 %v39_v4  ;;  %v83_v39 = vld [vmem:[#allocation2 + $0x8] sm:$0xff] }
   0xb   :  { %230 = vmatpush3.bf16.msra.mxu0 %v241_v18 }
   0xc   :  { %231 = vmatprep.subr.bf16.mxu0 %v247_v16 }
   0xf   :  { %232 = vmatpush3.bf16.msra.mxu0 %v242_v19 }
  0x92   :  { %v38_v5 = vpop.xlane.xlu0 %37 }
  0x93   :  { %v43_v6 = vmul.f32 0.015625, %v38_v5 }
  0x95   :  { %v45_v7 = vsub.f32 %v214_v1, %v43_v6 }
  0x96   :  { %v41_v8 = vpop.xlane.xlu0 %40 }
  0x97   :  { %v44_v9 = vmul.f32 0.015625, %v41_v8  ;;  %v47_v10 = vmul.f32 %v45_v7, %v45_v7 }
  0x99   :  { %v46_v11 = vsub.f32 %v215_v2, %v44_v9  ;;  %v49_v12 = vsel %vm35_vm0, %v47_v10, 0.0 }
  0x9a   :  { %50 = vadd.xlane.f32.xlu1 %v49_v12 }
  0x9b   :  { %v48_v13 = vmul.f32 %v46_v11, %v46_v11 }
  0x9d   :  { %v52_v14 = vsel %vm35_vm0, %v48_v13, 0.0 }
  0x9e   :  { %53 = vadd.xlane.f32.xlu1 %v52_v14 }
 0x127   :  { %v51_v20 = vpop.xlane.xlu1 %50 }
 0x128   :  { %v55_v21 = vmul.f32 0.015625, %v51_v20 }
 0x12a   :  { %v57_v22 = vadd.f32 1e-05, %v55_v21 }
 0x12b   :  { %v54_v23 = vpop.xlane.xlu1 %53 }
 0x12c   :  { %243 = vrsqrt.f32 %v57_v22  ;;  %v56_v24 = vmul.f32 0.015625, %v54_v23 }
 0x12e   :  { %v58_v25 = vadd.f32 1e-05, %v56_v24 }
 0x130   :  { %245 = vrsqrt.f32 %v58_v25 }
 0x136   :  { %v244_v26 = vpop.eup %243 }
 0x137   :  { %v61_v27 = vmul.f32 %v244_v26, %v45_v7 }
 0x139   :  { %v70_v31 = vmul.f32 %v200_v28, %v61_v27 }
 0x13a   :  { %v246_v29 = vpop.eup %245 }
 0x13b   :  { %v62_v30 = vmul.f32 %v246_v29, %v46_v11  ;;  %v79_v34 = vadd.f32 %v201_v32, %v70_v31 }
 0x13d   :  { %v71_v33 = vmul.f32 %v200_v28, %v62_v30 }
 0x13f   :  { %v80_v35 = vadd.f32 %v201_v32, %v71_v33 }
 0x141   :  { %v81_v36 = vpack.c.bf16 %v80_v35, %v79_v34 }
 0x143   :  { %234 = vmatmul.mubr.msk.bf16.vlgmr.msra.gmra.mrb[0].mxu0 %vm35_vm0, %v81_v36 }
 0x216   :  { %v153_v38 = vpop.f32.mrb[0].mxu0 }
 0x217   :  { %v160_v40 = vadd.f32 %v153_v38, %v82_v37  ;;  %v235_v41 = vpop.f32.mrb[1].mxu0 }
 0x218   :  { %v156_v42 = vpop.f32.mrb[2].mxu0 }
 0x219   :  { %163 = vst.msk [vmem:[#allocation2] sm:$0xff] %vm28_vm2, %v160_v40  ;;  %v161_v43 = vadd.f32 %v156_v42, %v83_v39  ;;  %v236_v44 = vpop.f32.mrb[3].mxu0 }
 0x21b   :  { %164 = vst.msk [vmem:[#allocation2 + $0x8] sm:$0xff] %vm28_vm2, %v161_v43 }
 0x220   :  { %v168_v48 = vld [vmem:[#allocation2] sm:$0xff] }
 0x221   :  { %v177_v49 = vadd.f32 %v207_v46, %v168_v48 }
 0x222   :  { %v169_v51 = vld [vmem:[#allocation2 + $0x8] sm:$0xff] }
 0x223   :  { %v183_v52 = vadd.f32 %v218_v47, %v177_v49  ;;  %v178_v53 = vadd.f32 %v207_v46, %v169_v51 }
 0x225   :  { %v210_v54 = vpack.c.bf16 %v183_v52, %v183_v52  ;;  %v184_v55 = vadd.f32 %v219_v50, %v178_v53 }
 0x227   :  { %194 = vst.msk [vmem:[%s332_s6] sm:$0xf] %vm193_vm3, %v210_v54  ;;  %v211_v56 = vpack.c.bf16 %v184_v55, %v184_v55 }
 0x229   :  { %195 = vst.msk [vmem:[%s332_s6 + $0x4] sm:$0xf] %vm193_vm3, %v211_v56 }

// kernel: gqa_transformer_lm.45
= control target key start
LH: loop header
LB: loop body
LE: loop exit
PB: predicated region body
PF: predicated region fallthrough
CT: control target
= control target key end

     0   :  { %vm19_vm0 = vcmask 261120   ;;  %v150_v0 = vmov 0.0   ;;  %vm151_vm1 = vmmov 0   ;;  %vm118_vm2 = vcmask 257024   ;;  %s195_s1 = inlined_call_operand.vmem [shape: bf16[32,32], index: 1, kind: input, shape index: {}]   ;;  %s196_s0 = inlined_call_operand.vmem [shape: bf16[16,32], index: 0, kind: input, shape index: {}]   ;;  %s197_s2 = inlined_call_operand.vmem [shape: f32[1,32], index: 2, kind: input, shape index: {}]   ;;  %s198_s3 = inlined_call_operand.vmem [shape: bf16[16,32], index: 3, kind: output, shape index: {}]  }
   0x1   :  { %137 = vmatprep.subr.bf16.mxu0 %v150_v0  ;;  %v147_v1 = vld [vmem:[%s195_s1] sm:$0xff]   ;;  %141 = vmatprep.mubr.msk.bf16.mxu0 %vm151_vm1, %v150_v0  ;;  %20 = vst.msk [vmem:[#allocation2] sm:$0xff] %vm19_vm0, %v150_v0  ;;  %21 = vst.msk [vmem:[#allocation2 + $0x8] sm:$0xff] %vm19_vm0, %v150_v0  ;;  %v148_v2 = vld [vmem:[%s195_s1 + $0x8] sm:$0xff]  }
   0x2   :  { %138 = vmatpush3.bf16.msra.mxu0 %v147_v1  ;;  %v149_v3 = vld [vmem:[%s196_s0] sm:$0xff]  }
   0x3   :  { %139 = vmatprep.subr.bf16.mxu0 %v150_v0  ;;  %v129_v12 = vld [vmem:[%s197_s2] ss:$0 sm:$0xff] }
   0x6   :  { %140 = vmatpush3.bf16.msra.mxu0 %v148_v2 }
   0x8   :  { %v24_v4 = vld [vmem:[#allocation2] sm:$0xff]  ;;  %v25_v6 = vld [vmem:[#allocation2 + $0x8] sm:$0xff] }
   0x9   :  { %142 = vmatmul.mubr.msk.bf16.vlgmr.msra.gmra.mrb[0].mxu0 %vm19_vm0, %v149_v3 }
  0xdc   :  { %v85_v5 = vpop.f32.mrb[0].mxu0 }
  0xdd   :  { %v92_v7 = vadd.f32 %v85_v5, %v24_v4  ;;  %v143_v8 = vpop.f32.mrb[1].mxu0 }
  0xde   :  { %v88_v9 = vpop.f32.mrb[2].mxu0 }
  0xdf   :  { %94 = vst.msk [vmem:[#allocation2] sm:$0xff] %vm19_vm0, %v92_v7  ;;  %v93_v10 = vadd.f32 %v88_v9, %v25_v6  ;;  %v144_v11 = vpop.f32.mrb[3].mxu0 }
  0xe1   :  { %95 = vst.msk [vmem:[#allocation2 + $0x8] sm:$0xff] %vm19_vm0, %v93_v10 }
  0xe6   :  { %v99_v13 = vld [vmem:[#allocation2] sm:$0xff] }
  0xe7   :  { %v108_v14 = vadd.f32 %v129_v12, %v99_v13 }
  0xe8   :  { %v100_v15 = vld [vmem:[#allocation2 + $0x8] sm:$0xff] }
  0xe9   :  { %v132_v16 = vpack.c.bf16 %v108_v14, %v108_v14  ;;  %v109_v17 = vadd.f32 %v129_v12, %v100_v15 }
  0xeb   :  { %119 = vst.msk [vmem:[%s198_s3] sm:$0xf] %vm118_vm2, %v132_v16  ;;  %v133_v18 = vpack.c.bf16 %v109_v17, %v109_v17 }
  0xed   :  { %120 = vst.msk [vmem:[%s198_s3 + $0x4] sm:$0xf] %vm118_vm2, %v133_v18 }

// kernel: gqa_transformer_lm.43
= control target key start
LH: loop header
LB: loop body
LE: loop exit
PB: predicated region body
PF: predicated region fallthrough
CT: control target
= control target key end

     0   :  { %vm22_vm0 = vcmask 261120   ;;  %v151_v0 = vmov 0.0   ;;  %vm152_vm1 = vmmov 0   ;;  %vm42_vm2 = vcmask 130048   ;;  %s200_s1 = inlined_call_operand.vmem [shape: bf16[16,32], index: 1, kind: input, shape index: {}]   ;;  %s201_s0 = inlined_call_operand.vmem [shape: bf16[16,16], index: 0, kind: input, shape index: {}]   ;;  %s202_s3 = inlined_call_operand.vmem [shape: bf16[16,32], index: 3, kind: input, shape index: {}]   ;;  %s203_s2 = inlined_call_operand.vmem [shape: f32[1,32], index: 2, kind: input, shape index: {}]   ;;  %s204_s4 = inlined_call_operand.vmem [shape: bf16[16,32], index: 4, kind: output, shape index: {}]  }
   0x1   :  { %23 = vst.msk [vmem:[#allocation2] sm:$0xff] %vm22_vm0, %v151_v0  ;;  %24 = vst.msk [vmem:[#allocation2 + $0x8] sm:$0xff] %vm22_vm0, %v151_v0  ;;  %141 = vmatprep.subr.bf16.mxu0 %v151_v0  ;;  %v149_v1 = vld [vmem:[%s200_s1] sm:$0xff]   ;;  %143 = vmatprep.mubr.msk.bf16.mxu0 %vm152_vm1, %v151_v0  ;;  %vm120_vm3 = vcmask 257024  }
   0x2   :  { %v150_v2 = vld [vmem:[%s201_s0] sm:$0xff]   ;;  %142 = vmatpush3.bf16.msra.mxu0 %v149_v1 }
   0x3   :  { %v136_v11 = vld [vmem:[%s202_s3] sm:$0xff]  }
   0x4   :  { %v130_v12 = vld [vmem:[%s203_s2] ss:$0 sm:$0xff]  ;;  %v137_v13 = vunpack.c.l.bf16 %v136_v11  ;;  %v138_v16 = vunpack.c.h.bf16 %v136_v11 }
   0x5   :  { %144 = vmatmul.mubr.msk.bf16.vlgmr.msra.gmra.mrb[0].mxu0 %vm42_vm2, %v150_v2 }
   0x8   :  { %v27_v3 = vld [vmem:[#allocation2] sm:$0xff]  ;;  %v28_v5 = vld [vmem:[#allocation2 + $0x8] sm:$0xff] }
  0xd8   :  { %v80_v4 = vpop.f32.mrb[0].mxu0 }
  0xd9   :  { %v87_v6 = vadd.f32 %v80_v4, %v27_v3  ;;  %v145_v7 = vpop.f32.mrb[1].mxu0 }
  0xda   :  { %v83_v8 = vpop.f32.mrb[2].mxu0 }
  0xdb   :  { %90 = vst.msk [vmem:[#allocation2] sm:$0xff] %vm22_vm0, %v87_v6  ;;  %v88_v9 = vadd.f32 %v83_v8, %v28_v5  ;;  %v146_v10 = vpop.f32.mrb[3].mxu0 }
  0xdd   :  { %91 = vst.msk [vmem:[#allocation2 + $0x8] sm:$0xff] %vm22_vm0, %v88_v9 }
  0xe2   :  { %v95_v14 = vld [vmem:[#allocation2] sm:$0xff] }
  0xe3   :  { %v104_v15 = vadd.f32 %v130_v12, %v95_v14 }
  0xe4   :  { %v96_v17 = vld [vmem:[#allocation2 + $0x8] sm:$0xff] }
  0xe5   :  { %v110_v18 = vadd.f32 %v137_v13, %v104_v15  ;;  %v105_v19 = vadd.f32 %v130_v12, %v96_v17 }
  0xe7   :  { %v133_v20 = vpack.c.bf16 %v110_v18, %v110_v18  ;;  %v111_v21 = vadd.f32 %v138_v16, %v105_v19 }
  0xe9   :  { %121 = vst.msk [vmem:[%s204_s4] sm:$0xf] %vm120_vm3, %v133_v20  ;;  %v134_v22 = vpack.c.bf16 %v111_v21, %v111_v21 }
  0xeb   :  { %122 = vst.msk [vmem:[%s204_s4 + $0x4] sm:$0xf] %vm120_vm3, %v134_v22 }

// kernel: gqa_transformer_lm.59
= control target key start
LH: loop header
LB: loop body
LE: loop exit
PB: predicated region body
PF: predicated region fallthrough
CT: control target
= control target key end

     0   :  { %vm33_vm0 = vcmask 261120   ;;  %s311_s0 = inlined_call_operand.vmem [shape: bf16[16,32], index: 0, kind: input, shape index: {}]   ;;  %s312_s1 = inlined_call_operand.vmem [shape: bf16[32,64], index: 1, kind: input, shape index: {}]   ;;  %s313_s2 = inlined_call_operand.vmem [shape: f32[1,64], index: 2, kind: input, shape index: {}]   ;;  %s314_s3 = inlined_call_operand.vmem [shape: f32[1,32], index: 3, kind: input, shape index: {}]   ;;  %s315_s4 = inlined_call_operand.vmem [shape: f32[1,32], index: 4, kind: input, shape index: {}]   ;;  %s316_s5 = inlined_call_operand.hbm [shape: f32[16,64], index: 5, kind: output, shape index: {}]  }
   0x1   :  { %v186_v0 = vld [vmem:[%s311_s0] sm:$0xff]  }
   0x2   :  { %v187_v1 = vunpack.c.l.bf16 %v186_v0  ;;  %v188_v2 = vunpack.c.h.bf16 %v186_v0 }
   0x3   :  { %10 = vsyncpa [#allocation4], 0  ;;  %v205_v15 = vld [vmem:[%s312_s1] sm:$0xff]   ;;  %v235_v16 = vmov 0.0   ;;  %v206_v17 = vld [vmem:[%s312_s1 + $0x8] sm:$0xff]   ;;  %vm236_vm1 = vmmov 0  }
   0x4   :  { %v34_v3 = vsel %vm33_vm0, %v187_v1, 0.0  ;;  %v37_v4 = vsel %vm33_vm0, %v188_v2, 0.0  ;;  %192 = vmatprep.subr.bf16.mxu0 %v235_v16  ;;  %196 = vmatprep.mubr.msk.bf16.mxu0 %vm236_vm1, %v235_v16  ;;  %vm26_vm2 = vcmask 523264   ;;  %v179_v26 = vld [vmem:[%s314_s3] ss:$0 sm:$0xff]  ;;  %s237_s26 = smov [#allocation3]  }
   0x5   :  { %35 = vadd.xlane.f32.xlu0 %v34_v3  ;;  %193 = vmatpush3.bf16.msra.mxu0 %v205_v15  ;;  %27 = vst.msk [vmem:[#allocation2] sm:$0xff] %vm26_vm2, %v235_v16  ;;  %28 = vst.msk [vmem:[#allocation2 + $0x8] sm:$0xff] %vm26_vm2, %v235_v16  ;;  %v180_v30 = vld [vmem:[%s315_s4] ss:$0 sm:$0xff]  ;;  %s168_s27 = sshll.u32 %s237_s26, 4  ;;  %s169_s27 = int_to_ptr.vmem [resolvable:$true] %s168_s27 }
   0x6   :  { %194 = vmatprep.subr.bf16.mxu0 %v235_v16  ;;  %v184_v43 = vld [vmem:[%s313_s2] ss:$0 sm:$0xff]  ;;  %s211_s28 = scalar_lea.vmem %s169_s27, 256  ;;  %p216_p1 = scmp.lt.s32.totalorder %s169_s27, %s169_s27 }
   0x7   :  { %p212_p0 = scmp.ne.s32.totalorder %s169_s27, %s211_s28  ;;  %p217_p2 = scmp.lt.s32.totalorder %s211_s28, %s211_s28 }
   0x9   :  { %38 = vadd.xlane.f32.xlu0 %v37_v4  ;;  %195 = vmatpush3.bf16.msra.mxu0 %v206_v17  ;;  %p218_p3 = por %p217_p2, %p216_p1 }
   0xb   :  { %p219_p4 = pnand %p218_p3, %p212_p0 }
   0xc   :  { %v80_v35 = vld [vmem:[#allocation2] sm:$0xff]  ;;  %v81_v37 = vld [vmem:[#allocation2 + $0x8] sm:$0xff] }
  0x92   :  { %v36_v5 = vpop.xlane.xlu0 %35 }
  0x93   :  { %v41_v6 = vmul.f32 0.03125, %v36_v5 }
  0x95   :  { %v43_v7 = vsub.f32 %v187_v1, %v41_v6 }
  0x96   :  { %v39_v8 = vpop.xlane.xlu0 %38 }
  0x97   :  { %v42_v9 = vmul.f32 0.03125, %v39_v8  ;;  %v45_v10 = vmul.f32 %v43_v7, %v43_v7 }
  0x99   :  { %v44_v11 = vsub.f32 %v188_v2, %v42_v9  ;;  %v47_v12 = vsel %vm33_vm0, %v45_v10, 0.0 }
  0x9a   :  { %48 = vadd.xlane.f32.xlu1 %v47_v12 }
  0x9b   :  { %v46_v13 = vmul.f32 %v44_v11, %v44_v11 }
  0x9d   :  { %v50_v14 = vsel %vm33_vm0, %v46_v13, 0.0 }
  0x9e   :  { %51 = vadd.xlane.f32.xlu1 %v50_v14 }
 0x127   :  { %v49_v18 = vpop.xlane.xlu1 %48 }
 0x128   :  { %v53_v19 = vmul.f32 0.03125, %v49_v18 }
 0x12a   :  { %v55_v20 = vadd.f32 1e-05, %v53_v19 }
 0x12b   :  { %v52_v21 = vpop.xlane.xlu1 %51 }
 0x12c   :  { %207 = vrsqrt.f32 %v55_v20  ;;  %v54_v22 = vmul.f32 0.03125, %v52_v21 }
 0x12e   :  { %v56_v23 = vadd.f32 1e-05, %v54_v22 }
 0x130   :  { %209 = vrsqrt.f32 %v56_v23 }
 0x136   :  { %v208_v24 = vpop.eup %207 }
 0x137   :  { %v59_v25 = vmul.f32 %v208_v24, %v43_v7 }
 0x139   :  { %v68_v29 = vmul.f32 %v179_v26, %v59_v25 }
 0x13a   :  { %v210_v27 = vpop.eup %209 }
 0x13b   :  { %v60_v28 = vmul.f32 %v210_v27, %v44_v11  ;;  %v77_v32 = vadd.f32 %v180_v30, %v68_v29 }
 0x13d   :  { %v69_v31 = vmul.f32 %v179_v26, %v60_v28 }
 0x13f   :  { %v78_v33 = vadd.f32 %v180_v30, %v69_v31 }
 0x141   :  { %v79_v34 = vpack.c.bf16 %v78_v33, %v77_v32 }
 0x143   :  { %197 = vmatmul.mubr.msk.bf16.vlgmr.msra.gmra.mrb[0].mxu0 %vm33_vm0, %v79_v34 }
 0x216   :  { %v135_v36 = vpop.f32.mrb[0].mxu0 }
 0x217   :  { %v142_v38 = vadd.f32 %v135_v36, %v80_v35  ;;  %v198_v39 = vpop.f32.mrb[1].mxu0 }
 0x218   :  { %v138_v40 = vpop.f32.mrb[2].mxu0 }
 0x219   :  { %145 = vst.msk [vmem:[#allocation2] sm:$0xff] %vm26_vm2, %v142_v38  ;;  %v143_v41 = vadd.f32 %v138_v40, %v81_v37  ;;  %v199_v42 = vpop.f32.mrb[3].mxu0 }
 0x21b   :  { %146 = vst.msk [vmem:[#allocation2 + $0x8] sm:$0xff] %vm26_vm2, %v143_v41 }
 0x220   :  { %v150_v44 = vld [vmem:[#allocation2] sm:$0xff] }
 0x221   :  { %v159_v45 = vadd.f32 %v184_v43, %v150_v44 }
 0x222   :  { %v151_v46 = vld [vmem:[#allocation2 + $0x8] sm:$0xff] }
 0x223   :  { %v160_v47 = vadd.f32 %v184_v43, %v151_v46  ;;  %161 = vst.msk [vmem:[#allocation3] sm:$0xff] %vm26_vm2, %v159_v45 }
 0x225   :  { %162 = vst.msk [vmem:[#allocation3 + $0x8] sm:$0xff] %vm26_vm2, %v160_v47 }
 0x226   :  { %222 = shalt.err (!%p219_p4)
}
 0x227   :  { %s223_s30 = scalar_lea.hbm %s316_s5, 256 }
 0x228   :  { %p224_p5 = scmp.ne.s32.totalorder %s316_s5, %s223_s30  ;;  %p227_p6 = scmp.lt.u32.totalorder %s223_s30, %s316_s5 }
 0x22a   :  { %p229_p7 = pnand %p227_p6, %p224_p5 }
 0x22c   :  { %232 = shalt.err (!%p229_p7)
}
 0x22d   :  { %s238_s10 = smov 128   ;;  %s239_s11 = smov 8  }
 0x22e   :  { %174 = dma.vmem_to_hbm [thread:$0]  %s169_s27, 256, %s316_s5, [#allocation4], %s238_s10, %s238_s10, %s239_s11  }
 0x22f   :  { %233 = dma.done.wait [#allocation4], 256  }
 0x230   :  { %234 = vsyncadd [#allocation4], 4294967040 }
 0x231   :  { %178 = vsyncpa [#allocation4], 1 }

// kernel: gqa_transformer_lm.44
= control target key start
LH: loop header
LB: loop body
LE: loop exit
PB: predicated region body
PF: predicated region fallthrough
CT: control target
= control target key end

     0   :  { %vm32_vm0 = vcmask 261120   ;;  %v208_v16 = vmov 0.0   ;;  %vm209_vm1 = vmmov 0   ;;  %vm25_vm2 = vcmask 130048   ;;  %s273_s0 = inlined_call_operand.vmem [shape: bf16[16,32], index: 0, kind: input, shape index: {}]   ;;  %s274_s1 = inlined_call_operand.vmem [shape: bf16[32,16], index: 1, kind: input, shape index: {}]   ;;  %s275_s3 = inlined_call_operand.vmem [shape: f32[1,32], index: 3, kind: input, shape index: {}]   ;;  %s276_s4 = inlined_call_operand.vmem [shape: f32[1,32], index: 4, kind: input, shape index: {}]   ;;  %s277_s2 = inlined_call_operand.vmem [shape: f32[1,16], index: 2, kind: input, shape index: {}]   ;;  %s278_s5 = inlined_call_operand.vmem [shape: bf16[16,16], index: 5, kind: output, shape index: {}]  }
   0x1   :  { %v186_v0 = vld [vmem:[%s273_s0] sm:$0xff]   ;;  %192 = vmatprep.subr.bf16.mxu0 %v208_v16  ;;  %v203_v17 = vld [vmem:[%s274_s1 + $0x8] sm:$0xff]   ;;  %196 = vmatprep.mubr.msk.bf16.mxu0 %vm209_vm1, %v208_v16  ;;  %26 = vst.msk [vmem:[#allocation2] sm:$0xff] %vm25_vm2, %v208_v16  ;;  %27 = vst.msk [vmem:[#allocation2 + $0x8] sm:$0xff] %vm25_vm2, %v208_v16  ;;  %vm168_vm3 = vcmask 125952  }
   0x2   :  { %v187_v1 = vunpack.c.l.bf16 %v186_v0  ;;  %v188_v2 = vunpack.c.h.bf16 %v186_v0  ;;  %v202_v15 = vld [vmem:[%s274_s1] sm:$0xff]  }
   0x3   :  { %193 = vmatpush3.bf16.msra.mxu0 %v202_v15  ;;  %v175_v26 = vld [vmem:[%s275_s3] ss:$0 sm:$0xff] }
   0x4   :  { %v33_v3 = vsel %vm32_vm0, %v187_v1, 0.0  ;;  %v36_v4 = vsel %vm32_vm0, %v188_v2, 0.0  ;;  %194 = vmatprep.subr.bf16.mxu0 %v208_v16  ;;  %v176_v30 = vld [vmem:[%s276_s4] ss:$0 sm:$0xff] }
   0x5   :  { %34 = vadd.xlane.f32.xlu0 %v33_v3  ;;  %v180_v43 = vld [vmem:[%s277_s2] ss:$0 sm:$0xff] }
   0x7   :  { %195 = vmatpush3.bf16.msra.mxu0 %v203_v17 }
   0x8   :  { %v79_v35 = vld [vmem:[#allocation2] sm:$0xff]  ;;  %v80_v37 = vld [vmem:[#allocation2 + $0x8] sm:$0xff] }
   0x9   :  { %37 = vadd.xlane.f32.xlu0 %v36_v4 }
  0x92   :  { %v35_v5 = vpop.xlane.xlu0 %34 }
  0x93   :  { %v40_v6 = vmul.f32 0.03125, %v35_v5 }
  0x95   :  { %v42_v7 = vsub.f32 %v187_v1, %v40_v6 }
  0x96   :  { %v38_v8 = vpop.xlane.xlu0 %37 }
  0x97   :  { %v41_v9 = vmul.f32 0.03125, %v38_v8  ;;  %v44_v10 = vmul.f32 %v42_v7, %v42_v7 }
  0x99   :  { %v43_v11 = vsub.f32 %v188_v2, %v41_v9  ;;  %v46_v12 = vsel %vm32_vm0, %v44_v10, 0.0 }
  0x9a   :  { %47 = vadd.xlane.f32.xlu1 %v46_v12 }
  0x9b   :  { %v45_v13 = vmul.f32 %v43_v11, %v43_v11 }
  0x9d   :  { %v49_v14 = vsel %vm32_vm0, %v45_v13, 0.0 }
  0x9e   :  { %50 = vadd.xlane.f32.xlu1 %v49_v14 }
 0x127   :  { %v48_v18 = vpop.xlane.xlu1 %47 }
 0x128   :  { %v52_v19 = vmul.f32 0.03125, %v48_v18 }
 0x12a   :  { %v54_v20 = vadd.f32 1e-05, %v52_v19 }
 0x12b   :  { %v51_v21 = vpop.xlane.xlu1 %50 }
 0x12c   :  { %204 = vrsqrt.f32 %v54_v20  ;;  %v53_v22 = vmul.f32 0.03125, %v51_v21 }
 0x12e   :  { %v55_v23 = vadd.f32 1e-05, %v53_v22 }
 0x130   :  { %206 = vrsqrt.f32 %v55_v23 }
 0x136   :  { %v205_v24 = vpop.eup %204 }
 0x137   :  { %v58_v25 = vmul.f32 %v205_v24, %v42_v7 }
 0x139   :  { %v67_v29 = vmul.f32 %v175_v26, %v58_v25 }
 0x13a   :  { %v207_v27 = vpop.eup %206 }
 0x13b   :  { %v59_v28 = vmul.f32 %v207_v27, %v43_v11  ;;  %v76_v32 = vadd.f32 %v176_v30, %v67_v29 }
 0x13d   :  { %v68_v31 = vmul.f32 %v175_v26, %v59_v28 }
 0x13f   :  { %v77_v33 = vadd.f32 %v176_v30, %v68_v31 }
 0x141   :  { %v78_v34 = vpack.c.bf16 %v77_v33, %v76_v32 }
 0x143   :  { %197 = vmatmul.mubr.msk.bf16.vlgmr.msra.gmra.mrb[0].mxu0 %vm32_vm0, %v78_v34 }
 0x216   :  { %v134_v36 = vpop.f32.mrb[0].mxu0 }
 0x217   :  { %v141_v38 = vadd.f32 %v134_v36, %v79_v35  ;;  %v198_v39 = vpop.f32.mrb[1].mxu0 }
 0x218   :  { %v137_v40 = vpop.f32.mrb[2].mxu0 }
 0x219   :  { %144 = vst.msk [vmem:[#allocation2] sm:$0xff] %vm25_vm2, %v141_v38  ;;  %v142_v41 = vadd.f32 %v137_v40, %v80_v37  ;;  %v199_v42 = vpop.f32.mrb[3].mxu0 }
 0x21b   :  { %145 = vst.msk [vmem:[#allocation2 + $0x8] sm:$0xff] %vm25_vm2, %v142_v41 }
 0x220   :  { %v149_v44 = vld [vmem:[#allocation2] sm:$0xff] }
 0x221   :  { %v158_v45 = vadd.f32 %v180_v43, %v149_v44 }
 0x222   :  { %v150_v46 = vld [vmem:[#allocation2 + $0x8] sm:$0xff] }
 0x223   :  { %v183_v47 = vpack.c.bf16 %v158_v45, %v158_v45  ;;  %v159_v48 = vadd.f32 %v180_v43, %v150_v46 }
 0x225   :  { %169 = vst.msk [vmem:[%s278_s5] sm:$0xf] %vm168_vm3, %v183_v47  ;;  %v184_v49 = vpack.c.bf16 %v159_v48, %v159_v48 }
 0x227   :  { %170 = vst.msk [vmem:[%s278_s5 + $0x4] sm:$0xf] %vm168_vm3, %v184_v49 }

</bundles_post_ra>
